<compile_context>
chip_gen: v6e
topology: v6e:2x2x1
jax: 0.10.0
libtpu: 0.0.40
codegen_flags: <defaults>
</compile_context>

<pallas_src>
import functools
import math

import jax
import jax.numpy as jnp
from jax.experimental import pallas as pl
from jax.experimental.pallas import tpu as pltpu


_VMEM_LIMIT = 32 * 1024 * 1024  # safe on v5e/v6e/v7x (<= physical everywhere)


# ----------------------------------------------------------------------------
# helpers
# ----------------------------------------------------------------------------
def _row_tile(n, max_rows=512):
    """Largest row tile <= max_rows; prefer an exact multiple-of-8 divisor."""
    if n <= max_rows:
        return n
    for t in range(max_rows, 7, -8):
        if n % t == 0:
            return t
    return max_rows


def _gelu(x):
    # TODO(synk): torch F.gelu defaults to the exact erf form; tanh approx is
    # used here for guaranteed Mosaic lowering (diff ~1e-3).
    c = math.sqrt(2.0 / math.pi)
    return 0.5 * x * (1.0 + jnp.tanh(c * (x + 0.044715 * x * x * x)))


# ----------------------------------------------------------------------------
# Kernel 1: row-tiled linear (+ optional GELU)   y = act(x @ W + b)
#   x: (N, D), W: (D, F), b: (1, F)   — W/b resident, rows pipelined.
# ----------------------------------------------------------------------------
def _linear_kernel(x_ref, w_ref, b_ref, o_ref, *, act):
    y = jnp.dot(x_ref[...], w_ref[...], preferred_element_type=jnp.float32)
    y = y + b_ref[...]
    if act == "gelu":
        y = _gelu(y)
    o_ref[...] = y


def linear(x, w, b, act=None):
    n, d = x.shape
    f = w.shape[1]
    tm = _row_tile(n)
    flops = 2 * n * d * f
    return pl.pallas_call(
        functools.partial(_linear_kernel, act=act),
        out_shape=jax.ShapeDtypeStruct((n, f), jnp.float32),
        grid=(pl.cdiv(n, tm),),
        in_specs=[
            pl.BlockSpec((tm, d), lambda i: (i, 0)),
            pl.BlockSpec((d, f), lambda i: (0, 0)),
            pl.BlockSpec((1, f), lambda i: (0, 0)),
        ],
        out_specs=pl.BlockSpec((tm, f), lambda i: (i, 0)),
        compiler_params=pltpu.CompilerParams(
            dimension_semantics=("parallel",),
            vmem_limit_bytes=_VMEM_LIMIT,
        ),
        cost_estimate=pl.CostEstimate(
            flops=flops,
            transcendentals=(n * f if act == "gelu" else 0),
            bytes_accessed=4 * (n * d + d * f + n * f),
        ),
    )(x, w, b.reshape(1, f))


# ----------------------------------------------------------------------------
# Kernel 2: fused linear + (optional residual) + LayerNorm (eps = 1e-5)
#   residual input is only DMA'd when residual=True.
# ----------------------------------------------------------------------------
def _linear_ln_kernel(x_ref, w_ref, b_ref, *rest, residual):
    if residual:
        res_ref, g_ref, beta_ref, o_ref = rest
    else:
        g_ref, beta_ref, o_ref = rest
    y = jnp.dot(x_ref[...], w_ref[...], preferred_element_type=jnp.float32)
    y = y + b_ref[...]
    if residual:
        y = y + res_ref[...]
    mean = jnp.mean(y, axis=-1, keepdims=True)
    var = jnp.mean((y - mean) ** 2, axis=-1, keepdims=True)
    o_ref[...] = ((y - mean) * jax.lax.rsqrt(var + 1e-5)) * g_ref[...] + beta_ref[...]


def linear_res_ln(x, w, b, res, gamma, beta, *, residual):
    n, d = x.shape
    f = w.shape[1]
    tm = _row_tile(n)
    row_spec = pl.BlockSpec((tm, f), lambda i: (i, 0))
    vec_spec = pl.BlockSpec((1, f), lambda i: (0, 0))
    in_specs = [
        pl.BlockSpec((tm, d), lambda i: (i, 0)),
        pl.BlockSpec((d, f), lambda i: (0, 0)),
        vec_spec,
    ]
    args = [x, w, b.reshape(1, f)]
    if residual:
        in_specs.append(row_spec)
        args.append(res)
    in_specs += [vec_spec, vec_spec]
    args += [gamma.reshape(1, f), beta.reshape(1, f)]
    bytes_accessed = 4 * (n * d + d * f + 2 * n * f + (n * f if residual else 0))
    return pl.pallas_call(
        functools.partial(_linear_ln_kernel, residual=residual),
        out_shape=jax.ShapeDtypeStruct((n, f), jnp.float32),
        grid=(pl.cdiv(n, tm),),
        in_specs=in_specs,
        out_specs=row_spec,
        compiler_params=pltpu.CompilerParams(
            dimension_semantics=("parallel",),
            vmem_limit_bytes=_VMEM_LIMIT,
        ),
        cost_estimate=pl.CostEstimate(
            flops=2 * n * d * f + 10 * n * f,
            transcendentals=n,
            bytes_accessed=bytes_accessed,
        ),
    )(*args)


# ----------------------------------------------------------------------------
# Kernel 3: row-tiled LayerNorm
# ----------------------------------------------------------------------------
def _ln_kernel(x_ref, g_ref, b_ref, o_ref):
    y = x_ref[...]
    mean = jnp.mean(y, axis=-1, keepdims=True)
    var = jnp.mean((y - mean) ** 2, axis=-1, keepdims=True)
    o_ref[...] = ((y - mean) * jax.lax.rsqrt(var + 1e-5)) * g_ref[...] + b_ref[...]


def layernorm(x, gamma, beta):
    n, d = x.shape
    tm = _row_tile(n)
    vec_spec = pl.BlockSpec((1, d), lambda i: (0, 0))
    return pl.pallas_call(
        _ln_kernel,
        out_shape=jax.ShapeDtypeStruct((n, d), jnp.float32),
        grid=(pl.cdiv(n, tm),),
        in_specs=[pl.BlockSpec((tm, d), lambda i: (i, 0)), vec_spec, vec_spec],
        out_specs=pl.BlockSpec((tm, d), lambda i: (i, 0)),
        compiler_params=pltpu.CompilerParams(
            dimension_semantics=("parallel",),
            vmem_limit_bytes=_VMEM_LIMIT,
        ),
        cost_estimate=pl.CostEstimate(
            flops=10 * n * d, transcendentals=n, bytes_accessed=8 * n * d
        ),
    )(x, gamma.reshape(1, d), beta.reshape(1, d))


# ----------------------------------------------------------------------------
# Kernel 4: multi-head attention core over groups of (batch*head) slices.
#   q,k,v: (B*H, L, A)  ->  context (B*H, L, A)
# ----------------------------------------------------------------------------
def _attn_kernel(q_ref, k_ref, v_ref, o_ref, *, scale):
    q = q_ref[...] * scale                                     # scale on (L,A), not (L,L)
    s = jnp.einsum("bqd,bkd->bqk", q, k_ref[...],
                   preferred_element_type=jnp.float32)
    s = s - jnp.max(s, axis=-1, keepdims=True)
    p = jnp.exp(s)
    p = p * pl.reciprocal(jnp.sum(p, axis=-1, keepdims=True), approx=True)
    o_ref[...] = jnp.einsum("bqk,bkd->bqd", p, v_ref[...],
                            preferred_element_type=jnp.float32)


def _heads_per_step(bh, l, a, budget_bytes=2 * 1024 * 1024):
    per_head = 4 * (4 * l * a + 2 * l * l)  # q,k,v,o + scores/probs (f32)
    hb = min(bh, 16, max(1, budget_bytes // max(per_head, 1)))
    while bh % hb != 0:
        hb -= 1
    return hb


def attention_core(q, k, v, atten_dim):
    bh, l, a = q.shape
    hb = _heads_per_step(bh, l, a)
    spec = pl.BlockSpec((hb, l, a), lambda i: (i, 0, 0))
    kern = functools.partial(_attn_kernel, scale=1.0 / math.sqrt(atten_dim))
    return pl.pallas_call(
        kern,
        out_shape=jax.ShapeDtypeStruct((bh, l, a), jnp.float32),
        grid=(bh // hb,),
        in_specs=[spec, spec, spec],
        out_specs=spec,
        compiler_params=pltpu.CompilerParams(
            dimension_semantics=("parallel",),
            vmem_limit_bytes=_VMEM_LIMIT,
        ),
        cost_estimate=pl.CostEstimate(
            flops=4 * bh * l * l * a,
            transcendentals=bh * l * l,
            bytes_accessed=4 * 4 * bh * l * a,
        ),
    )(q, k, v)


# ----------------------------------------------------------------------------
# Module-level forward pieces
# ----------------------------------------------------------------------------
def ord_self_attention(p, x, head_num, atten_dim):
    """OrdAttention with Q=K=V=x and residual=True (as used in this model)."""
    B, L, Dm = x.shape
    HA = head_num * atten_dim
    N = B * L
    x2 = x.reshape(N, Dm)
    # fused Q|K|V projection: one matmul instead of three
    qkv = linear(x2, p["wqkv_w"], p["wqkv_b"])                       # (N, 3*HA)
    qkv = qkv.reshape(B, L, 3, head_num, atten_dim)
    qkv = qkv.transpose(2, 0, 3, 1, 4).reshape(3, B * head_num, L, atten_dim)
    ctx = attention_core(qkv[0], qkv[1], qkv[2], atten_dim)          # (B*H, L, A)
    ctx = (ctx.reshape(B, head_num, L, atten_dim)
              .transpose(0, 2, 1, 3)
              .reshape(N, HA))
    out = linear_res_ln(ctx, p["fc_w"], p["fc_b"], x2,
                        p["ln_g"], p["ln_b"], residual=True)
    return out.reshape(B, L, Dm)


def _ffn_res_ln(p, x):
    """gelu(conv1(x)) -> conv2 -> +x -> LayerNorm   (1x1 convs == linears)."""
    B, S, Dm = x.shape
    x2 = x.reshape(B * S, Dm)
    h = linear(x2, p["conv1_w"], p["conv1_b"], act="gelu")
    out = linear_res_ln(h, p["conv2_w"], p["conv2_b"], x2,
                        p["ln_g"], p["ln_b"], residual=True)
    return out.reshape(B, S, Dm)


def temporal_block(p, x, head_num, atten_dim):
    a = ord_self_attention(p["attn"], x, head_num, atten_dim)
    return _ffn_res_ln(p, a)


def spatial_block(p, x, head_num, atten_dim):
    xt = jnp.transpose(x, (0, 2, 1))                 # (B, Dm, S): attend across features
    a = ord_self_attention(p["attn"], xt, head_num, atten_dim)
    a = jnp.transpose(a, (0, 2, 1))                  # back to (B, S, Dm)
    return _ffn_res_ln(p, a)


def st_block(p, x, head_num, atten_dim):
    B, S, Dm = x.shape
    N = B * S
    tx = temporal_block(p["time"], x, head_num, atten_dim)
    fx = spatial_block(p["feat"], x, head_num, atten_dim)
    cat = jnp.concatenate([tx, fx], axis=-1).reshape(N, 2 * Dm)
    n1 = layernorm(cat, p["norm1_g"], p["norm1_b"])
    h = linear(n1, p["conv1_w"], p["conv1_b"], act="gelu")
    out = linear_res_ln(h, p["conv2_w"], p["conv2_b"], None,
                        p["norm2_g"], p["norm2_b"], residual=False)
    return out.reshape(B, S, Dm)


def position_embedding(S, Dm, ln_g, ln_b):
    position = jnp.arange(S, dtype=jnp.float32)[:, None]
    div_term = jnp.exp(jnp.arange(0, Dm, 2, dtype=jnp.float32)
                       * (-math.log(10000.0) / Dm))
    pe = jnp.zeros((S, Dm), dtype=jnp.float32)
    pe = pe.at[:, 0::2].set(jnp.sin(position * div_term))
    pe = pe.at[:, 1::2].set(jnp.cos(position * div_term))
    return layernorm(pe, ln_g, ln_b)                 # (S, Dm)


def reconstruction_forward(params, noise, trend, time, *, head_num, atten_dim):
    B, S, Fn = noise.shape
    Dm = params["data_w"].shape[1]
    N = B * S

    # data embedding of noise and trend fused into a single linear call
    stacked = jnp.concatenate([noise.reshape(N, Fn), trend.reshape(N, Fn)], axis=0)
    emb = linear(stacked, params["data_w"], params["data_b"])        # (2N, Dm)
    noise_emb = emb[:N].reshape(B, S, Dm)
    trend_emb = emb[N:].reshape(B, S, Dm)

    # time embedding: conv1x1 + LayerNorm fused in one kernel
    te = linear_res_ln(time.reshape(N, -1), params["time_w"], params["time_b"],
                       None, params["time_ln_g"], params["time_ln_b"],
                       residual=False).reshape(B, S, Dm)

    pe = position_embedding(S, Dm, params["pos_ln_g"], params["pos_ln_b"])

    x = (noise_emb - trend_emb) + pe[None, :, :] + te
    for bp in params["blocks"]:
        x = st_block(bp, x, head_num, atten_dim)

    out = linear((x + trend_emb).reshape(N, Dm), params["fc1_w"], params["fc1_b"])
    return out.reshape(B, S, Fn)


# ----------------------------------------------------------------------------
# Parameter construction (weights stored as (in, out); QKV pre-fused)
# ----------------------------------------------------------------------------
class _KeyGen:
    def __init__(self, key):
        self.key = key
        self.i = 0

    def __call__(self):
        self.i += 1
        return jax.random.fold_in(self.key, self.i)


def _w(key, shape):
    return 0.02 * jax.random.normal(key, shape, dtype=jnp.float32)


def _attn_params(kg, in_dim, atten_dim, head_num):
    HA = atten_dim * head_num
    return {
        "wqkv_w": _w(kg(), (in_dim, 3 * HA)),   # [W_Q | W_K | W_V]
        "wqkv_b": _w(kg(), (3 * HA,)),
        "fc_w": _w(kg(), (HA, in_dim)),
        "fc_b": _w(kg(), (in_dim,)),
        "ln_g": jnp.ones((in_dim,), jnp.float32),
        "ln_b": jnp.zeros((in_dim,), jnp.float32),
    }


def _sub_block_params(kg, attn_in_dim, model_dim, ff_dim, atten_dim, head_num):
    return {
        "attn": _attn_params(kg, attn_in_dim, atten_dim, head_num),
        "conv1_w": _w(kg(), (model_dim, ff_dim)),
        "conv1_b": _w(kg(), (ff_dim,)),
        "conv2_w": _w(kg(), (ff_dim, model_dim)),
        "conv2_b": _w(kg(), (model_dim,)),
        "ln_g": jnp.ones((model_dim,), jnp.float32),
        "ln_b": jnp.zeros((model_dim,), jnp.float32),
    }


def _st_block_params(kg, window_size, model_dim, ff_dim, atten_dim, head_num):
    return {
        "time": _sub_block_params(kg, model_dim, model_dim, ff_dim, atten_dim, head_num),
        "feat": _sub_block_params(kg, window_size, model_dim, ff_dim, atten_dim, head_num),
        "norm1_g": jnp.ones((2 * model_dim,), jnp.float32),
        "norm1_b": jnp.zeros((2 * model_dim,), jnp.float32),
        "conv1_w": _w(kg(), (2 * model_dim, ff_dim)),
        "conv1_b": _w(kg(), (ff_dim,)),
        "conv2_w": _w(kg(), (ff_dim, model_dim)),
        "conv2_b": _w(kg(), (model_dim,)),
        "norm2_g": jnp.ones((model_dim,), jnp.float32),
        "norm2_b": jnp.zeros((model_dim,), jnp.float32),
    }


def init_params(key, *, window_size, model_dim, ff_dim, atten_dim,
                feature_num, time_num, block_num, head_num):
    kg = _KeyGen(key)
    return {
        "data_w": _w(kg(), (feature_num, model_dim)),
        "data_b": _w(kg(), (model_dim,)),
        "time_w": _w(kg(), (time_num, model_dim)),
        "time_b": _w(kg(), (model_dim,)),
        "time_ln_g": jnp.ones((model_dim,), jnp.float32),
        "time_ln_b": jnp.zeros((model_dim,), jnp.float32),
        "pos_ln_g": jnp.ones((model_dim,), jnp.float32),
        "pos_ln_b": jnp.zeros((model_dim,), jnp.float32),
        "blocks": [
            _st_block_params(kg, window_size, model_dim, ff_dim, atten_dim, head_num)
            for _ in range(block_num)
        ],
        "fc1_w": _w(kg(), (model_dim, feature_num)),
        "fc1_b": _w(kg(), (feature_num,)),
    }


# ----------------------------------------------------------------------------
if __name__ == "__main__":
    B = 2
    window_size = 16          # sequence length == window_size (required by the model)
    model_dim = 32
    ff_dim = 64
    atten_dim = 16
    head_num = 2
    feature_num = 4
    time_num = 4
    block_num = 2

    key = jax.random.PRNGKey(0)
    k1, k2, k3, kp = jax.random.split(key, 4)
    noise = jax.random.normal(k1, (B, window_size, feature_num), dtype=jnp.float32)
    trend = jax.random.normal(k2, (B, window_size, feature_num), dtype=jnp.float32)
    time_feat = jax.random.normal(k3, (B, window_size, time_num), dtype=jnp.float32)

    params = init_params(
        kp, window_size=window_size, model_dim=model_dim, ff_dim=ff_dim,
        atten_dim=atten_dim, feature_num=feature_num, time_num=time_num,
        block_num=block_num, head_num=head_num,
    )

    fwd = jax.jit(functools.partial(
        reconstruction_forward, head_num=head_num, atten_dim=atten_dim))
    out = fwd(params, noise, trend, time_feat)
    jax.block_until_ready(out)
    assert out.shape == (B, window_size, feature_num)
    print("KERNEL_OK")
</pallas_src>

<mosaic_0001>
module attributes {stable_mosaic.version = 11 : i64} {
  func.func @_linear_ln_kernel(%arg0: i32, %arg1: memref<32x4xf32, #tpu.memory_space<vmem>>, %arg2: memref<4x32xf32, #tpu.memory_space<vmem>>, %arg3: memref<1x32xf32, #tpu.memory_space<vmem>>, %arg4: memref<1x32xf32, #tpu.memory_space<vmem>>, %arg5: memref<1x32xf32, #tpu.memory_space<vmem>>, %arg6: memref<32x32xf32, #tpu.memory_space<vmem>>) attributes {dimension_semantics = [#tpu.dimension_semantics<parallel>], iteration_bounds = array<i64: 1>, scalar_prefetch = 0 : i64, scratch_operands = 0 : i64, tpu.core_type = #tpu.core_type<tc>, window_params = [{transform_indices = @transform_0, window_bounds = array<i64: 32, 4>}, {pipeline_mode = #tpu.pipeline_mode<synchronous>, transform_indices = @transform_1, window_bounds = array<i64: 4, 32>}, {pipeline_mode = #tpu.pipeline_mode<synchronous>, transform_indices = @transform_2, window_bounds = array<i64: 1, 32>}, {pipeline_mode = #tpu.pipeline_mode<synchronous>, transform_indices = @transform_3, window_bounds = array<i64: 1, 32>}, {pipeline_mode = #tpu.pipeline_mode<synchronous>, transform_indices = @transform_4, window_bounds = array<i64: 1, 32>}, {transform_indices = @transform_5, window_bounds = array<i64: 32, 32>}]} {
    %c0 = arith.constant 0 : index
    %c0_0 = arith.constant 0 : index
    %0 = vector.load %arg1[%c0, %c0_0] : memref<32x4xf32, #tpu.memory_space<vmem>>, vector<32x4xf32>
    %c0_1 = arith.constant 0 : index
    %c0_2 = arith.constant 0 : index
    %1 = vector.load %arg2[%c0_1, %c0_2] : memref<4x32xf32, #tpu.memory_space<vmem>>, vector<4x32xf32>
    %cst = arith.constant dense<0.000000e+00> : vector<32x32xf32>
    %2 = tpu.matmul %0, %1, %cst {dimension_numbers = #tpu.dot_dimension_numbers<[1], [0], [0], [1], [0, 0, 1, 1], [], []>} : vector<32x4xf32>, vector<4x32xf32>, vector<32x32xf32> -> vector<32x32xf32>
    %c0_3 = arith.constant 0 : index
    %c0_4 = arith.constant 0 : index
    %3 = vector.load %arg3[%c0_3, %c0_4] : memref<1x32xf32, #tpu.memory_space<vmem>>, vector<1x32xf32>
    %4 = vector.broadcast %3 : vector<1x32xf32> to vector<32x32xf32>
    %5 = arith.addf %2, %4 : vector<32x32xf32>
    %cst_5 = arith.constant dense<0.000000e+00> : vector<32xf32>
    %6 = vector.multi_reduction <add>, %5, %cst_5 [1] : vector<32x32xf32> to vector<32xf32>
    %7 = vector.shape_cast %6 : vector<32xf32> to vector<32x1xf32>
    %cst_6 = arith.constant 3.200000e+01 : f32
    %8 = vector.broadcast %cst_6 : f32 to vector<32x1xf32>
    %9 = arith.divf %7, %8 : vector<32x1xf32>
    %10 = vector.broadcast %9 : vector<32x1xf32> to vector<32x32xf32>
    %11 = arith.subf %5, %10 : vector<32x32xf32>
    %12 = arith.mulf %11, %11 : vector<32x32xf32>
    %cst_7 = arith.constant dense<0.000000e+00> : vector<32xf32>
    %13 = vector.multi_reduction <add>, %12, %cst_7 [1] : vector<32x32xf32> to vector<32xf32>
    %14 = vector.shape_cast %13 : vector<32xf32> to vector<32x1xf32>
    %cst_8 = arith.constant 3.200000e+01 : f32
    %15 = vector.broadcast %cst_8 : f32 to vector<32x1xf32>
    %16 = arith.divf %14, %15 : vector<32x1xf32>
    %17 = vector.broadcast %9 : vector<32x1xf32> to vector<32x32xf32>
    %18 = arith.subf %5, %17 : vector<32x32xf32>
    %cst_9 = arith.constant 9.99999974E-6 : f32
    %19 = vector.broadcast %cst_9 : f32 to vector<32x1xf32>
    %20 = arith.addf %16, %19 : vector<32x1xf32>
    %21 = math.rsqrt %20 : vector<32x1xf32>
    %22 = vector.broadcast %21 : vector<32x1xf32> to vector<32x32xf32>
    %23 = arith.mulf %18, %22 : vector<32x32xf32>
    %c0_10 = arith.constant 0 : index
    %c0_11 = arith.constant 0 : index
    %24 = vector.load %arg4[%c0_10, %c0_11] : memref<1x32xf32, #tpu.memory_space<vmem>>, vector<1x32xf32>
    %25 = vector.broadcast %24 : vector<1x32xf32> to vector<32x32xf32>
    %26 = arith.mulf %23, %25 : vector<32x32xf32>
    %c0_12 = arith.constant 0 : index
    %c0_13 = arith.constant 0 : index
    %27 = vector.load %arg5[%c0_12, %c0_13] : memref<1x32xf32, #tpu.memory_space<vmem>>, vector<1x32xf32>
    %28 = vector.broadcast %27 : vector<1x32xf32> to vector<32x32xf32>
    %29 = arith.addf %26, %28 : vector<32x32xf32>
    %c0_14 = arith.constant 0 : index
    %c0_15 = arith.constant 0 : index
    %30 = vector.load %arg6[%c0_14, %c0_15] : memref<32x32xf32, #tpu.memory_space<vmem>>, vector<32x32xf32>
    tpu.vector_store %arg6[%c0_14, %c0_15], %29 {strides = array<i32>} : memref<32x32xf32, #tpu.memory_space<vmem>>, vector<32x32xf32>,
    return
  }
  func.func @transform_0(%arg0: i32) -> (i32, i32) {
    %c0_i32 = arith.constant 0 : i32
    %c0_i32_0 = arith.constant 0 : i32
    return %arg0, %c0_i32 : i32, i32
  }
  func.func @transform_1(%arg0: i32) -> (i32, i32) {
    %c0_i32 = arith.constant 0 : i32
    %c0_i32_0 = arith.constant 0 : i32
    %c0_i32_1 = arith.constant 0 : i32
    return %c0_i32, %c0_i32_0 : i32, i32
  }
  func.func @transform_2(%arg0: i32) -> (i32, i32) {
    %c0_i32 = arith.constant 0 : i32
    %c0_i32_0 = arith.constant 0 : i32
    %c0_i32_1 = arith.constant 0 : i32
    return %c0_i32, %c0_i32_0 : i32, i32
  }
  func.func @transform_3(%arg0: i32) -> (i32, i32) {
    %c0_i32 = arith.constant 0 : i32
    %c0_i32_0 = arith.constant 0 : i32
    %c0_i32_1 = arith.constant 0 : i32
    return %c0_i32, %c0_i32_0 : i32, i32
  }
  func.func @transform_4(%arg0: i32) -> (i32, i32) {
    %c0_i32 = arith.constant 0 : i32
    %c0_i32_0 = arith.constant 0 : i32
    %c0_i32_1 = arith.constant 0 : i32
    return %c0_i32, %c0_i32_0 : i32, i32
  }
  func.func @transform_5(%arg0: i32) -> (i32, i32) {
    %c0_i32 = arith.constant 0 : i32
    %c0_i32_0 = arith.constant 0 : i32
    return %arg0, %c0_i32 : i32, i32
  }
}

module attributes {stable_mosaic.version = 11 : i64} {
  func.func @_ln_kernel(%arg0: i32, %arg1: memref<16x32xf32, #tpu.memory_space<vmem>>, %arg2: memref<1x32xf32, #tpu.memory_space<vmem>>, %arg3: memref<1x32xf32, #tpu.memory_space<vmem>>, %arg4: memref<16x32xf32, #tpu.memory_space<vmem>>) attributes {dimension_semantics = [#tpu.dimension_semantics<parallel>], iteration_bounds = array<i64: 1>, scalar_prefetch = 0 : i64, scratch_operands = 0 : i64, tpu.core_type = #tpu.core_type<tc>, window_params = [{transform_indices = @transform_0, window_bounds = array<i64: 16, 32>}, {pipeline_mode = #tpu.pipeline_mode<synchronous>, transform_indices = @transform_1, window_bounds = array<i64: 1, 32>}, {pipeline_mode = #tpu.pipeline_mode<synchronous>, transform_indices = @transform_2, window_bounds = array<i64: 1, 32>}, {transform_indices = @transform_3, window_bounds = array<i64: 16, 32>}]} {
    %c0 = arith.constant 0 : index
    %c0_0 = arith.constant 0 : index
    %0 = vector.load %arg1[%c0, %c0_0] : memref<16x32xf32, #tpu.memory_space<vmem>>, vector<16x32xf32>
    %cst = arith.constant dense<0.000000e+00> : vector<16xf32>
    %1 = vector.multi_reduction <add>, %0, %cst [1] : vector<16x32xf32> to vector<16xf32>
    %2 = vector.shape_cast %1 : vector<16xf32> to vector<16x1xf32>
    %cst_1 = arith.constant 3.200000e+01 : f32
    %3 = vector.broadcast %cst_1 : f32 to vector<16x1xf32>
    %4 = arith.divf %2, %3 : vector<16x1xf32>
    %5 = vector.broadcast %4 : vector<16x1xf32> to vector<16x32xf32>
    %6 = arith.subf %0, %5 : vector<16x32xf32>
    %7 = arith.mulf %6, %6 : vector<16x32xf32>
    %cst_2 = arith.constant dense<0.000000e+00> : vector<16xf32>
    %8 = vector.multi_reduction <add>, %7, %cst_2 [1] : vector<16x32xf32> to vector<16xf32>
    %9 = vector.shape_cast %8 : vector<16xf32> to vector<16x1xf32>
    %cst_3 = arith.constant 3.200000e+01 : f32
    %10 = vector.broadcast %cst_3 : f32 to vector<16x1xf32>
    %11 = arith.divf %9, %10 : vector<16x1xf32>
    %12 = vector.broadcast %4 : vector<16x1xf32> to vector<16x32xf32>
    %13 = arith.subf %0, %12 : vector<16x32xf32>
    %cst_4 = arith.constant 9.99999974E-6 : f32
    %14 = vector.broadcast %cst_4 : f32 to vector<16x1xf32>
    %15 = arith.addf %11, %14 : vector<16x1xf32>
    %16 = math.rsqrt %15 : vector<16x1xf32>
    %17 = vector.broadcast %16 : vector<16x1xf32> to vector<16x32xf32>
    %18 = arith.mulf %13, %17 : vector<16x32xf32>
    %c0_5 = arith.constant 0 : index
    %c0_6 = arith.constant 0 : index
    %19 = vector.load %arg2[%c0_5, %c0_6] : memref<1x32xf32, #tpu.memory_space<vmem>>, vector<1x32xf32>
    %20 = vector.broadcast %19 : vector<1x32xf32> to vector<16x32xf32>
    %21 = arith.mulf %18, %20 : vector<16x32xf32>
    %c0_7 = arith.constant 0 : index
    %c0_8 = arith.constant 0 : index
    %22 = vector.load %arg3[%c0_7, %c0_8] : memref<1x32xf32, #tpu.memory_space<vmem>>, vector<1x32xf32>
    %23 = vector.broadcast %22 : vector<1x32xf32> to vector<16x32xf32>
    %24 = arith.addf %21, %23 : vector<16x32xf32>
    %c0_9 = arith.constant 0 : index
    %c0_10 = arith.constant 0 : index
    %25 = vector.load %arg4[%c0_9, %c0_10] : memref<16x32xf32, #tpu.memory_space<vmem>>, vector<16x32xf32>
    tpu.vector_store %arg4[%c0_9, %c0_10], %24 {strides = array<i32>} : memref<16x32xf32, #tpu.memory_space<vmem>>, vector<16x32xf32>,
    return
  }
  func.func @transform_0(%arg0: i32) -> (i32, i32) {
    %c0_i32 = arith.constant 0 : i32
    %c0_i32_0 = arith.constant 0 : i32
    return %arg0, %c0_i32 : i32, i32
  }
  func.func @transform_1(%arg0: i32) -> (i32, i32) {
    %c0_i32 = arith.constant 0 : i32
    %c0_i32_0 = arith.constant 0 : i32
    %c0_i32_1 = arith.constant 0 : i32
    return %c0_i32, %c0_i32_0 : i32, i32
  }
  func.func @transform_2(%arg0: i32) -> (i32, i32) {
    %c0_i32 = arith.constant 0 : i32
    %c0_i32_0 = arith.constant 0 : i32
    %c0_i32_1 = arith.constant 0 : i32
    return %c0_i32, %c0_i32_0 : i32, i32
  }
  func.func @transform_3(%arg0: i32) -> (i32, i32) {
    %c0_i32 = arith.constant 0 : i32
    %c0_i32_0 = arith.constant 0 : i32
    return %arg0, %c0_i32 : i32, i32
  }
}

module attributes {stable_mosaic.version = 11 : i64} {
  func.func @_linear_kernel(%arg0: i32, %arg1: memref<64x4xf32, #tpu.memory_space<vmem>>, %arg2: memref<4x32xf32, #tpu.memory_space<vmem>>, %arg3: memref<1x32xf32, #tpu.memory_space<vmem>>, %arg4: memref<64x32xf32, #tpu.memory_space<vmem>>) attributes {dimension_semantics = [#tpu.dimension_semantics<parallel>], iteration_bounds = array<i64: 1>, scalar_prefetch = 0 : i64, scratch_operands = 0 : i64, tpu.core_type = #tpu.core_type<tc>, window_params = [{transform_indices = @transform_0, window_bounds = array<i64: 64, 4>}, {pipeline_mode = #tpu.pipeline_mode<synchronous>, transform_indices = @transform_1, window_bounds = array<i64: 4, 32>}, {pipeline_mode = #tpu.pipeline_mode<synchronous>, transform_indices = @transform_2, window_bounds = array<i64: 1, 32>}, {transform_indices = @transform_3, window_bounds = array<i64: 64, 32>}]} {
    %c0 = arith.constant 0 : index
    %c0_0 = arith.constant 0 : index
    %0 = vector.load %arg1[%c0, %c0_0] : memref<64x4xf32, #tpu.memory_space<vmem>>, vector<64x4xf32>
    %c0_1 = arith.constant 0 : index
    %c0_2 = arith.constant 0 : index
    %1 = vector.load %arg2[%c0_1, %c0_2] : memref<4x32xf32, #tpu.memory_space<vmem>>, vector<4x32xf32>
    %cst = arith.constant dense<0.000000e+00> : vector<64x32xf32>
    %2 = tpu.matmul %0, %1, %cst {dimension_numbers = #tpu.dot_dimension_numbers<[1], [0], [0], [1], [0, 0, 1, 1], [], []>} : vector<64x4xf32>, vector<4x32xf32>, vector<64x32xf32> -> vector<64x32xf32>
    %c0_3 = arith.constant 0 : index
    %c0_4 = arith.constant 0 : index
    %3 = vector.load %arg3[%c0_3, %c0_4] : memref<1x32xf32, #tpu.memory_space<vmem>>, vector<1x32xf32>
    %4 = vector.broadcast %3 : vector<1x32xf32> to vector<64x32xf32>
    %5 = arith.addf %2, %4 : vector<64x32xf32>
    %c0_5 = arith.constant 0 : index
    %c0_6 = arith.constant 0 : index
    %6 = vector.load %arg4[%c0_5, %c0_6] : memref<64x32xf32, #tpu.memory_space<vmem>>, vector<64x32xf32>
    tpu.vector_store %arg4[%c0_5, %c0_6], %5 {strides = array<i32>} : memref<64x32xf32, #tpu.memory_space<vmem>>, vector<64x32xf32>,
    return
  }
  func.func @transform_0(%arg0: i32) -> (i32, i32) {
    %c0_i32 = arith.constant 0 : i32
    %c0_i32_0 = arith.constant 0 : i32
    return %arg0, %c0_i32 : i32, i32
  }
  func.func @transform_1(%arg0: i32) -> (i32, i32) {
    %c0_i32 = arith.constant 0 : i32
    %c0_i32_0 = arith.constant 0 : i32
    %c0_i32_1 = arith.constant 0 : i32
    return %c0_i32, %c0_i32_0 : i32, i32
  }
  func.func @transform_2(%arg0: i32) -> (i32, i32) {
    %c0_i32 = arith.constant 0 : i32
    %c0_i32_0 = arith.constant 0 : i32
    %c0_i32_1 = arith.constant 0 : i32
    return %c0_i32, %c0_i32_0 : i32, i32
  }
  func.func @transform_3(%arg0: i32) -> (i32, i32) {
    %c0_i32 = arith.constant 0 : i32
    %c0_i32_0 = arith.constant 0 : i32
    return %arg0, %c0_i32 : i32, i32
  }
}

module attributes {stable_mosaic.version = 11 : i64} {
  func.func @_linear_kernel(%arg0: i32, %arg1: memref<64x16xf32, #tpu.memory_space<vmem>>, %arg2: memref<16x96xf32, #tpu.memory_space<vmem>>, %arg3: memref<1x96xf32, #tpu.memory_space<vmem>>, %arg4: memref<64x96xf32, #tpu.memory_space<vmem>>) attributes {dimension_semantics = [#tpu.dimension_semantics<parallel>], iteration_bounds = array<i64: 1>, scalar_prefetch = 0 : i64, scratch_operands = 0 : i64, tpu.core_type = #tpu.core_type<tc>, window_params = [{transform_indices = @transform_0, window_bounds = array<i64: 64, 16>}, {pipeline_mode = #tpu.pipeline_mode<synchronous>, transform_indices = @transform_1, window_bounds = array<i64: 16, 96>}, {pipeline_mode = #tpu.pipeline_mode<synchronous>, transform_indices = @transform_2, window_bounds = array<i64: 1, 96>}, {transform_indices = @transform_3, window_bounds = array<i64: 64, 96>}]} {
    %c0 = arith.constant 0 : index
    %c0_0 = arith.constant 0 : index
    %0 = vector.load %arg1[%c0, %c0_0] : memref<64x16xf32, #tpu.memory_space<vmem>>, vector<64x16xf32>
    %c0_1 = arith.constant 0 : index
    %c0_2 = arith.constant 0 : index
    %1 = vector.load %arg2[%c0_1, %c0_2] : memref<16x96xf32, #tpu.memory_space<vmem>>, vector<16x96xf32>
    %cst = arith.constant dense<0.000000e+00> : vector<64x96xf32>
    %2 = tpu.matmul %0, %1, %cst {dimension_numbers = #tpu.dot_dimension_numbers<[1], [0], [0], [1], [0, 0, 1, 1], [], []>} : vector<64x16xf32>, vector<16x96xf32>, vector<64x96xf32> -> vector<64x96xf32>
    %c0_3 = arith.constant 0 : index
    %c0_4 = arith.constant 0 : index
    %3 = vector.load %arg3[%c0_3, %c0_4] : memref<1x96xf32, #tpu.memory_space<vmem>>, vector<1x96xf32>
    %4 = vector.broadcast %3 : vector<1x96xf32> to vector<64x96xf32>
    %5 = arith.addf %2, %4 : vector<64x96xf32>
    %c0_5 = arith.constant 0 : index
    %c0_6 = arith.constant 0 : index
    %6 = vector.load %arg4[%c0_5, %c0_6] : memref<64x96xf32, #tpu.memory_space<vmem>>, vector<64x96xf32>
    tpu.vector_store %arg4[%c0_5, %c0_6], %5 {strides = array<i32>} : memref<64x96xf32, #tpu.memory_space<vmem>>, vector<64x96xf32>,
    return
  }
  func.func @transform_0(%arg0: i32) -> (i32, i32) {
    %c0_i32 = arith.constant 0 : i32
    %c0_i32_0 = arith.constant 0 : i32
    return %arg0, %c0_i32 : i32, i32
  }
  func.func @transform_1(%arg0: i32) -> (i32, i32) {
    %c0_i32 = arith.constant 0 : i32
    %c0_i32_0 = arith.constant 0 : i32
    %c0_i32_1 = arith.constant 0 : i32
    return %c0_i32, %c0_i32_0 : i32, i32
  }
  func.func @transform_2(%arg0: i32) -> (i32, i32) {
    %c0_i32 = arith.constant 0 : i32
    %c0_i32_0 = arith.constant 0 : i32
    %c0_i32_1 = arith.constant 0 : i32
    return %c0_i32, %c0_i32_0 : i32, i32
  }
  func.func @transform_3(%arg0: i32) -> (i32, i32) {
    %c0_i32 = arith.constant 0 : i32
    %c0_i32_0 = arith.constant 0 : i32
    return %arg0, %c0_i32 : i32, i32
  }
}

module attributes {stable_mosaic.version = 11 : i64} {
  func.func @_attn_kernel(%arg0: i32, %arg1: memref<4x32x16xf32, #tpu.memory_space<vmem>>, %arg2: memref<4x32x16xf32, #tpu.memory_space<vmem>>, %arg3: memref<4x32x16xf32, #tpu.memory_space<vmem>>, %arg4: memref<4x32x16xf32, #tpu.memory_space<vmem>>) attributes {dimension_semantics = [#tpu.dimension_semantics<parallel>], iteration_bounds = array<i64: 1>, scalar_prefetch = 0 : i64, scratch_operands = 0 : i64, tpu.core_type = #tpu.core_type<tc>, window_params = [{transform_indices = @transform_0, window_bounds = array<i64: 4, 32, 16>}, {transform_indices = @transform_1, window_bounds = array<i64: 4, 32, 16>}, {transform_indices = @transform_2, window_bounds = array<i64: 4, 32, 16>}, {transform_indices = @transform_3, window_bounds = array<i64: 4, 32, 16>}]} {
    %c0 = arith.constant 0 : index
    %c0_0 = arith.constant 0 : index
    %c0_1 = arith.constant 0 : index
    %0 = vector.load %arg1[%c0, %c0_0, %c0_1] : memref<4x32x16xf32, #tpu.memory_space<vmem>>, vector<4x32x16xf32>
    %cst = arith.constant 2.500000e-01 : f32
    %1 = vector.broadcast %cst : f32 to vector<4x32x16xf32>
    %2 = arith.mulf %0, %1 : vector<4x32x16xf32>
    %c0_2 = arith.constant 0 : index
    %c0_3 = arith.constant 0 : index
    %c0_4 = arith.constant 0 : index
    %3 = vector.load %arg2[%c0_2, %c0_3, %c0_4] : memref<4x32x16xf32, #tpu.memory_space<vmem>>, vector<4x32x16xf32>
    "tpu.trace_start"() <{level = 10 : i32, message = "bqd,bkd->bqk"}> : () -> ()
    %cst_5 = arith.constant dense<0.000000e+00> : vector<4x32x32xf32>
    %4 = tpu.matmul %2, %3, %cst_5 {dimension_numbers = #tpu.dot_dimension_numbers<[2], [2], [1], [1], [0, 0, 0, 1, 1, 1], [0], [0]>} : vector<4x32x16xf32>, vector<4x32x16xf32>, vector<4x32x32xf32> -> vector<4x32x32xf32>
    "tpu.trace_stop"() : () -> ()
    %cst_6 = arith.constant dense<0xFF800000> : vector<4x32xf32>
    %5 = vector.multi_reduction <maximumf>, %4, %cst_6 [2] : vector<4x32x32xf32> to vector<4x32xf32>
    %6 = vector.shape_cast %5 : vector<4x32xf32> to vector<4x32x1xf32>
    %7 = vector.broadcast %6 : vector<4x32x1xf32> to vector<4x32x32xf32>
    %8 = arith.subf %4, %7 : vector<4x32x32xf32>
    %9 = math.exp %8 : vector<4x32x32xf32>
    %cst_7 = arith.constant dense<0.000000e+00> : vector<4x32xf32>
    %10 = vector.multi_reduction <add>, %9, %cst_7 [2] : vector<4x32x32xf32> to vector<4x32xf32>
    %11 = vector.shape_cast %10 : vector<4x32xf32> to vector<4x32x1xf32>
    %12 = tpu.reciprocal %11 {approx = true} : vector<4x32x1xf32> -> vector<4x32x1xf32>
    %13 = vector.broadcast %12 : vector<4x32x1xf32> to vector<4x32x32xf32>
    %14 = arith.mulf %9, %13 : vector<4x32x32xf32>
    %c0_8 = arith.constant 0 : index
    %c0_9 = arith.constant 0 : index
    %c0_10 = arith.constant 0 : index
    %15 = vector.load %arg3[%c0_8, %c0_9, %c0_10] : memref<4x32x16xf32, #tpu.memory_space<vmem>>, vector<4x32x16xf32>
    "tpu.trace_start"() <{level = 10 : i32, message = "bqk,bkd->bqd"}> : () -> ()
    %cst_11 = arith.constant dense<0.000000e+00> : vector<4x32x16xf32>
    %16 = tpu.matmul %14, %15, %cst_11 {dimension_numbers = #tpu.dot_dimension_numbers<[2], [1], [1], [2], [0, 0, 0, 1, 1, 2], [0], [0]>} : vector<4x32x32xf32>, vector<4x32x16xf32>, vector<4x32x16xf32> -> vector<4x32x16xf32>
    "tpu.trace_stop"() : () -> ()
    %c0_12 = arith.constant 0 : index
    %c0_13 = arith.constant 0 : index
    %c0_14 = arith.constant 0 : index
    %17 = vector.load %arg4[%c0_12, %c0_13, %c0_14] : memref<4x32x16xf32, #tpu.memory_space<vmem>>, vector<4x32x16xf32>
    tpu.vector_store %arg4[%c0_12, %c0_13, %c0_14], %16 {strides = array<i32>} : memref<4x32x16xf32, #tpu.memory_space<vmem>>, vector<4x32x16xf32>,
    return
  }
  func.func @transform_0(%arg0: i32) -> (i32, i32, i32) {
    %c0_i32 = arith.constant 0 : i32
    %c0_i32_0 = arith.constant 0 : i32
    %c0_i32_1 = arith.constant 0 : i32
    return %arg0, %c0_i32, %c0_i32_0 : i32, i32, i32
  }
  func.func @transform_1(%arg0: i32) -> (i32, i32, i32) {
    %c0_i32 = arith.constant 0 : i32
    %c0_i32_0 = arith.constant 0 : i32
    %c0_i32_1 = arith.constant 0 : i32
    return %arg0, %c0_i32, %c0_i32_0 : i32, i32, i32
  }
  func.func @transform_2(%arg0: i32) -> (i32, i32, i32) {
    %c0_i32 = arith.constant 0 : i32
    %c0_i32_0 = arith.constant 0 : i32
    %c0_i32_1 = arith.constant 0 : i32
    return %arg0, %c0_i32, %c0_i32_0 : i32, i32, i32
  }
  func.func @transform_3(%arg0: i32) -> (i32, i32, i32) {
    %c0_i32 = arith.constant 0 : i32
    %c0_i32_0 = arith.constant 0 : i32
    %c0_i32_1 = arith.constant 0 : i32
    return %arg0, %c0_i32, %c0_i32_0 : i32, i32, i32
  }
}

module attributes {stable_mosaic.version = 11 : i64} {
  func.func @_linear_ln_kernel(%arg0: i32, %arg1: memref<64x32xf32, #tpu.memory_space<vmem>>, %arg2: memref<32x16xf32, #tpu.memory_space<vmem>>, %arg3: memref<1x16xf32, #tpu.memory_space<vmem>>, %arg4: memref<64x16xf32, #tpu.memory_space<vmem>>, %arg5: memref<1x16xf32, #tpu.memory_space<vmem>>, %arg6: memref<1x16xf32, #tpu.memory_space<vmem>>, %arg7: memref<64x16xf32, #tpu.memory_space<vmem>>) attributes {dimension_semantics = [#tpu.dimension_semantics<parallel>], iteration_bounds = array<i64: 1>, scalar_prefetch = 0 : i64, scratch_operands = 0 : i64, tpu.core_type = #tpu.core_type<tc>, window_params = [{transform_indices = @transform_0, window_bounds = array<i64: 64, 32>}, {pipeline_mode = #tpu.pipeline_mode<synchronous>, transform_indices = @transform_1, window_bounds = array<i64: 32, 16>}, {pipeline_mode = #tpu.pipeline_mode<synchronous>, transform_indices = @transform_2, window_bounds = array<i64: 1, 16>}, {transform_indices = @transform_3, window_bounds = array<i64: 64, 16>}, {pipeline_mode = #tpu.pipeline_mode<synchronous>, transform_indices = @transform_4, window_bounds = array<i64: 1, 16>}, {pipeline_mode = #tpu.pipeline_mode<synchronous>, transform_indices = @transform_5, window_bounds = array<i64: 1, 16>}, {transform_indices = @transform_6, window_bounds = array<i64: 64, 16>}]} {
    %c0 = arith.constant 0 : index
    %c0_0 = arith.constant 0 : index
    %0 = vector.load %arg1[%c0, %c0_0] : memref<64x32xf32, #tpu.memory_space<vmem>>, vector<64x32xf32>
    %c0_1 = arith.constant 0 : index
    %c0_2 = arith.constant 0 : index
    %1 = vector.load %arg2[%c0_1, %c0_2] : memref<32x16xf32, #tpu.memory_space<vmem>>, vector<32x16xf32>
    %cst = arith.constant dense<0.000000e+00> : vector<64x16xf32>
    %2 = tpu.matmul %0, %1, %cst {dimension_numbers = #tpu.dot_dimension_numbers<[1], [0], [0], [1], [0, 0, 1, 1], [], []>} : vector<64x32xf32>, vector<32x16xf32>, vector<64x16xf32> -> vector<64x16xf32>
    %c0_3 = arith.constant 0 : index
    %c0_4 = arith.constant 0 : index
    %3 = vector.load %arg3[%c0_3, %c0_4] : memref<1x16xf32, #tpu.memory_space<vmem>>, vector<1x16xf32>
    %4 = vector.broadcast %3 : vector<1x16xf32> to vector<64x16xf32>
    %5 = arith.addf %2, %4 : vector<64x16xf32>
    %c0_5 = arith.constant 0 : index
    %c0_6 = arith.constant 0 : index
    %6 = vector.load %arg4[%c0_5, %c0_6] : memref<64x16xf32, #tpu.memory_space<vmem>>, vector<64x16xf32>
    %7 = arith.addf %5, %6 : vector<64x16xf32>
    %cst_7 = arith.constant dense<0.000000e+00> : vector<64xf32>
    %8 = vector.multi_reduction <add>, %7, %cst_7 [1] : vector<64x16xf32> to vector<64xf32>
    %9 = vector.shape_cast %8 : vector<64xf32> to vector<64x1xf32>
    %cst_8 = arith.constant 1.600000e+01 : f32
    %10 = vector.broadcast %cst_8 : f32 to vector<64x1xf32>
    %11 = arith.divf %9, %10 : vector<64x1xf32>
    %12 = vector.broadcast %11 : vector<64x1xf32> to vector<64x16xf32>
    %13 = arith.subf %7, %12 : vector<64x16xf32>
    %14 = arith.mulf %13, %13 : vector<64x16xf32>
    %cst_9 = arith.constant dense<0.000000e+00> : vector<64xf32>
    %15 = vector.multi_reduction <add>, %14, %cst_9 [1] : vector<64x16xf32> to vector<64xf32>
    %16 = vector.shape_cast %15 : vector<64xf32> to vector<64x1xf32>
    %cst_10 = arith.constant 1.600000e+01 : f32
    %17 = vector.broadcast %cst_10 : f32 to vector<64x1xf32>
    %18 = arith.divf %16, %17 : vector<64x1xf32>
    %19 = vector.broadcast %11 : vector<64x1xf32> to vector<64x16xf32>
    %20 = arith.subf %7, %19 : vector<64x16xf32>
    %cst_11 = arith.constant 9.99999974E-6 : f32
    %21 = vector.broadcast %cst_11 : f32 to vector<64x1xf32>
    %22 = arith.addf %18, %21 : vector<64x1xf32>
    %23 = math.rsqrt %22 : vector<64x1xf32>
    %24 = vector.broadcast %23 : vector<64x1xf32> to vector<64x16xf32>
    %25 = arith.mulf %20, %24 : vector<64x16xf32>
    %c0_12 = arith.constant 0 : index
    %c0_13 = arith.constant 0 : index
    %26 = vector.load %arg5[%c0_12, %c0_13] : memref<1x16xf32, #tpu.memory_space<vmem>>, vector<1x16xf32>
    %27 = vector.broadcast %26 : vector<1x16xf32> to vector<64x16xf32>
    %28 = arith.mulf %25, %27 : vector<64x16xf32>
    %c0_14 = arith.constant 0 : index
    %c0_15 = arith.constant 0 : index
    %29 = vector.load %arg6[%c0_14, %c0_15] : memref<1x16xf32, #tpu.memory_space<vmem>>, vector<1x16xf32>
    %30 = vector.broadcast %29 : vector<1x16xf32> to vector<64x16xf32>
    %31 = arith.addf %28, %30 : vector<64x16xf32>
    %c0_16 = arith.constant 0 : index
    %c0_17 = arith.constant 0 : index
    %32 = vector.load %arg7[%c0_16, %c0_17] : memref<64x16xf32, #tpu.memory_space<vmem>>, vector<64x16xf32>
    tpu.vector_store %arg7[%c0_16, %c0_17], %31 {strides = array<i32>} : memref<64x16xf32, #tpu.memory_space<vmem>>, vector<64x16xf32>,
    return
  }
  func.func @transform_0(%arg0: i32) -> (i32, i32) {
    %c0_i32 = arith.constant 0 : i32
    %c0_i32_0 = arith.constant 0 : i32
    return %arg0, %c0_i32 : i32, i32
  }
  func.func @transform_1(%arg0: i32) -> (i32, i32) {
    %c0_i32 = arith.constant 0 : i32
    %c0_i32_0 = arith.constant 0 : i32
    %c0_i32_1 = arith.constant 0 : i32
    return %c0_i32, %c0_i32_0 : i32, i32
  }
  func.func @transform_2(%arg0: i32) -> (i32, i32) {
    %c0_i32 = arith.constant 0 : i32
    %c0_i32_0 = arith.constant 0 : i32
    %c0_i32_1 = arith.constant 0 : i32
    return %c0_i32, %c0_i32_0 : i32, i32
  }
  func.func @transform_3(%arg0: i32) -> (i32, i32) {
    %c0_i32 = arith.constant 0 : i32
    %c0_i32_0 = arith.constant 0 : i32
    return %arg0, %c0_i32 : i32, i32
  }
  func.func @transform_4(%arg0: i32) -> (i32, i32) {
    %c0_i32 = arith.constant 0 : i32
    %c0_i32_0 = arith.constant 0 : i32
    %c0_i32_1 = arith.constant 0 : i32
    return %c0_i32, %c0_i32_0 : i32, i32
  }
  func.func @transform_5(%arg0: i32) -> (i32, i32) {
    %c0_i32 = arith.constant 0 : i32
    %c0_i32_0 = arith.constant 0 : i32
    %c0_i32_1 = arith.constant 0 : i32
    return %c0_i32, %c0_i32_0 : i32, i32
  }
  func.func @transform_6(%arg0: i32) -> (i32, i32) {
    %c0_i32 = arith.constant 0 : i32
    %c0_i32_0 = arith.constant 0 : i32
    return %arg0, %c0_i32 : i32, i32
  }
}

module attributes {stable_mosaic.version = 11 : i64} {
  func.func @_linear_kernel(%arg0: i32, %arg1: memref<32x32xf32, #tpu.memory_space<vmem>>, %arg2: memref<32x64xf32, #tpu.memory_space<vmem>>, %arg3: memref<1x64xf32, #tpu.memory_space<vmem>>, %arg4: memref<32x64xf32, #tpu.memory_space<vmem>>) attributes {dimension_semantics = [#tpu.dimension_semantics<parallel>], iteration_bounds = array<i64: 1>, scalar_prefetch = 0 : i64, scratch_operands = 0 : i64, tpu.core_type = #tpu.core_type<tc>, window_params = [{transform_indices = @transform_0, window_bounds = array<i64: 32, 32>}, {pipeline_mode = #tpu.pipeline_mode<synchronous>, transform_indices = @transform_1, window_bounds = array<i64: 32, 64>}, {pipeline_mode = #tpu.pipeline_mode<synchronous>, transform_indices = @transform_2, window_bounds = array<i64: 1, 64>}, {transform_indices = @transform_3, window_bounds = array<i64: 32, 64>}]} {
    %c0 = arith.constant 0 : index
    %c0_0 = arith.constant 0 : index
    %0 = vector.load %arg1[%c0, %c0_0] : memref<32x32xf32, #tpu.memory_space<vmem>>, vector<32x32xf32>
    %c0_1 = arith.constant 0 : index
    %c0_2 = arith.constant 0 : index
    %1 = vector.load %arg2[%c0_1, %c0_2] : memref<32x64xf32, #tpu.memory_space<vmem>>, vector<32x64xf32>
    %cst = arith.constant dense<0.000000e+00> : vector<32x64xf32>
    %2 = tpu.matmul %0, %1, %cst {dimension_numbers = #tpu.dot_dimension_numbers<[1], [0], [0], [1], [0, 0, 1, 1], [], []>} : vector<32x32xf32>, vector<32x64xf32>, vector<32x64xf32> -> vector<32x64xf32>
    %c0_3 = arith.constant 0 : index
    %c0_4 = arith.constant 0 : index
    %3 = vector.load %arg3[%c0_3, %c0_4] : memref<1x64xf32, #tpu.memory_space<vmem>>, vector<1x64xf32>
    %4 = vector.broadcast %3 : vector<1x64xf32> to vector<32x64xf32>
    %5 = arith.addf %2, %4 : vector<32x64xf32>
    %cst_5 = arith.constant 5.000000e-01 : f32
    %6 = vector.broadcast %cst_5 : f32 to vector<32x64xf32>
    %7 = arith.mulf %6, %5 : vector<32x64xf32>
    %cst_6 = arith.constant 4.471500e-02 : f32
    %8 = vector.broadcast %cst_6 : f32 to vector<32x64xf32>
    %9 = arith.mulf %8, %5 : vector<32x64xf32>
    %10 = arith.mulf %9, %5 : vector<32x64xf32>
    %11 = arith.mulf %10, %5 : vector<32x64xf32>
    %12 = arith.addf %5, %11 : vector<32x64xf32>
    %cst_7 = arith.constant 0.797884583 : f32
    %13 = vector.broadcast %cst_7 : f32 to vector<32x64xf32>
    %14 = arith.mulf %13, %12 : vector<32x64xf32>
    %15 = math.tanh %14 : vector<32x64xf32>
    %cst_8 = arith.constant 1.000000e+00 : f32
    %16 = vector.broadcast %cst_8 : f32 to vector<32x64xf32>
    %17 = arith.addf %16, %15 : vector<32x64xf32>
    %18 = arith.mulf %7, %17 : vector<32x64xf32>
    %c0_9 = arith.constant 0 : index
    %c0_10 = arith.constant 0 : index
    %19 = vector.load %arg4[%c0_9, %c0_10] : memref<32x64xf32, #tpu.memory_space<vmem>>, vector<32x64xf32>
    tpu.vector_store %arg4[%c0_9, %c0_10], %18 {strides = array<i32>} : memref<32x64xf32, #tpu.memory_space<vmem>>, vector<32x64xf32>,
    return
  }
  func.func @transform_0(%arg0: i32) -> (i32, i32) {
    %c0_i32 = arith.constant 0 : i32
    %c0_i32_0 = arith.constant 0 : i32
    return %arg0, %c0_i32 : i32, i32
  }
  func.func @transform_1(%arg0: i32) -> (i32, i32) {
    %c0_i32 = arith.constant 0 : i32
    %c0_i32_0 = arith.constant 0 : i32
    %c0_i32_1 = arith.constant 0 : i32
    return %c0_i32, %c0_i32_0 : i32, i32
  }
  func.func @transform_2(%arg0: i32) -> (i32, i32) {
    %c0_i32 = arith.constant 0 : i32
    %c0_i32_0 = arith.constant 0 : i32
    %c0_i32_1 = arith.constant 0 : i32
    return %c0_i32, %c0_i32_0 : i32, i32
  }
  func.func @transform_3(%arg0: i32) -> (i32, i32) {
    %c0_i32 = arith.constant 0 : i32
    %c0_i32_0 = arith.constant 0 : i32
    return %arg0, %c0_i32 : i32, i32
  }
}

module attributes {stable_mosaic.version = 11 : i64} {
  func.func @_linear_ln_kernel(%arg0: i32, %arg1: memref<32x64xf32, #tpu.memory_space<vmem>>, %arg2: memref<64x32xf32, #tpu.memory_space<vmem>>, %arg3: memref<1x32xf32, #tpu.memory_space<vmem>>, %arg4: memref<32x32xf32, #tpu.memory_space<vmem>>, %arg5: memref<1x32xf32, #tpu.memory_space<vmem>>, %arg6: memref<1x32xf32, #tpu.memory_space<vmem>>, %arg7: memref<32x32xf32, #tpu.memory_space<vmem>>) attributes {dimension_semantics = [#tpu.dimension_semantics<parallel>], iteration_bounds = array<i64: 1>, scalar_prefetch = 0 : i64, scratch_operands = 0 : i64, tpu.core_type = #tpu.core_type<tc>, window_params = [{transform_indices = @transform_0, window_bounds = array<i64: 32, 64>}, {pipeline_mode = #tpu.pipeline_mode<synchronous>, transform_indices = @transform_1, window_bounds = array<i64: 64, 32>}, {pipeline_mode = #tpu.pipeline_mode<synchronous>, transform_indices = @transform_2, window_bounds = array<i64: 1, 32>}, {transform_indices = @transform_3, window_bounds = array<i64: 32, 32>}, {pipeline_mode = #tpu.pipeline_mode<synchronous>, transform_indices = @transform_4, window_bounds = array<i64: 1, 32>}, {pipeline_mode = #tpu.pipeline_mode<synchronous>, transform_indices = @transform_5, window_bounds = array<i64: 1, 32>}, {transform_indices = @transform_6, window_bounds = array<i64: 32, 32>}]} {
    %c0 = arith.constant 0 : index
    %c0_0 = arith.constant 0 : index
    %0 = vector.load %arg1[%c0, %c0_0] : memref<32x64xf32, #tpu.memory_space<vmem>>, vector<32x64xf32>
    %c0_1 = arith.constant 0 : index
    %c0_2 = arith.constant 0 : index
    %1 = vector.load %arg2[%c0_1, %c0_2] : memref<64x32xf32, #tpu.memory_space<vmem>>, vector<64x32xf32>
    %cst = arith.constant dense<0.000000e+00> : vector<32x32xf32>
    %2 = tpu.matmul %0, %1, %cst {dimension_numbers = #tpu.dot_dimension_numbers<[1], [0], [0], [1], [0, 0, 1, 1], [], []>} : vector<32x64xf32>, vector<64x32xf32>, vector<32x32xf32> -> vector<32x32xf32>
    %c0_3 = arith.constant 0 : index
    %c0_4 = arith.constant 0 : index
    %3 = vector.load %arg3[%c0_3, %c0_4] : memref<1x32xf32, #tpu.memory_space<vmem>>, vector<1x32xf32>
    %4 = vector.broadcast %3 : vector<1x32xf32> to vector<32x32xf32>
    %5 = arith.addf %2, %4 : vector<32x32xf32>
    %c0_5 = arith.constant 0 : index
    %c0_6 = arith.constant 0 : index
    %6 = vector.load %arg4[%c0_5, %c0_6] : memref<32x32xf32, #tpu.memory_space<vmem>>, vector<32x32xf32>
    %7 = arith.addf %5, %6 : vector<32x32xf32>
    %cst_7 = arith.constant dense<0.000000e+00> : vector<32xf32>
    %8 = vector.multi_reduction <add>, %7, %cst_7 [1] : vector<32x32xf32> to vector<32xf32>
    %9 = vector.shape_cast %8 : vector<32xf32> to vector<32x1xf32>
    %cst_8 = arith.constant 3.200000e+01 : f32
    %10 = vector.broadcast %cst_8 : f32 to vector<32x1xf32>
    %11 = arith.divf %9, %10 : vector<32x1xf32>
    %12 = vector.broadcast %11 : vector<32x1xf32> to vector<32x32xf32>
    %13 = arith.subf %7, %12 : vector<32x32xf32>
    %14 = arith.mulf %13, %13 : vector<32x32xf32>
    %cst_9 = arith.constant dense<0.000000e+00> : vector<32xf32>
    %15 = vector.multi_reduction <add>, %14, %cst_9 [1] : vector<32x32xf32> to vector<32xf32>
    %16 = vector.shape_cast %15 : vector<32xf32> to vector<32x1xf32>
    %cst_10 = arith.constant 3.200000e+01 : f32
    %17 = vector.broadcast %cst_10 : f32 to vector<32x1xf32>
    %18 = arith.divf %16, %17 : vector<32x1xf32>
    %19 = vector.broadcast %11 : vector<32x1xf32> to vector<32x32xf32>
    %20 = arith.subf %7, %19 : vector<32x32xf32>
    %cst_11 = arith.constant 9.99999974E-6 : f32
    %21 = vector.broadcast %cst_11 : f32 to vector<32x1xf32>
    %22 = arith.addf %18, %21 : vector<32x1xf32>
    %23 = math.rsqrt %22 : vector<32x1xf32>
    %24 = vector.broadcast %23 : vector<32x1xf32> to vector<32x32xf32>
    %25 = arith.mulf %20, %24 : vector<32x32xf32>
    %c0_12 = arith.constant 0 : index
    %c0_13 = arith.constant 0 : index
    %26 = vector.load %arg5[%c0_12, %c0_13] : memref<1x32xf32, #tpu.memory_space<vmem>>, vector<1x32xf32>
    %27 = vector.broadcast %26 : vector<1x32xf32> to vector<32x32xf32>
    %28 = arith.mulf %25, %27 : vector<32x32xf32>
    %c0_14 = arith.constant 0 : index
    %c0_15 = arith.constant 0 : index
    %29 = vector.load %arg6[%c0_14, %c0_15] : memref<1x32xf32, #tpu.memory_space<vmem>>, vector<1x32xf32>
    %30 = vector.broadcast %29 : vector<1x32xf32> to vector<32x32xf32>
    %31 = arith.addf %28, %30 : vector<32x32xf32>
    %c0_16 = arith.constant 0 : index
    %c0_17 = arith.constant 0 : index
    %32 = vector.load %arg7[%c0_16, %c0_17] : memref<32x32xf32, #tpu.memory_space<vmem>>, vector<32x32xf32>
    tpu.vector_store %arg7[%c0_16, %c0_17], %31 {strides = array<i32>} : memref<32x32xf32, #tpu.memory_space<vmem>>, vector<32x32xf32>,
    return
  }
  func.func @transform_0(%arg0: i32) -> (i32, i32) {
    %c0_i32 = arith.constant 0 : i32
    %c0_i32_0 = arith.constant 0 : i32
    return %arg0, %c0_i32 : i32, i32
  }
  func.func @transform_1(%arg0: i32) -> (i32, i32) {
    %c0_i32 = arith.constant 0 : i32
    %c0_i32_0 = arith.constant 0 : i32
    %c0_i32_1 = arith.constant 0 : i32
    return %c0_i32, %c0_i32_0 : i32, i32
  }
  func.func @transform_2(%arg0: i32) -> (i32, i32) {
    %c0_i32 = arith.constant 0 : i32
    %c0_i32_0 = arith.constant 0 : i32
    %c0_i32_1 = arith.constant 0 : i32
    return %c0_i32, %c0_i32_0 : i32, i32
  }
  func.func @transform_3(%arg0: i32) -> (i32, i32) {
    %c0_i32 = arith.constant 0 : i32
    %c0_i32_0 = arith.constant 0 : i32
    return %arg0, %c0_i32 : i32, i32
  }
  func.func @transform_4(%arg0: i32) -> (i32, i32) {
    %c0_i32 = arith.constant 0 : i32
    %c0_i32_0 = arith.constant 0 : i32
    %c0_i32_1 = arith.constant 0 : i32
    return %c0_i32, %c0_i32_0 : i32, i32
  }
  func.func @transform_5(%arg0: i32) -> (i32, i32) {
    %c0_i32 = arith.constant 0 : i32
    %c0_i32_0 = arith.constant 0 : i32
    %c0_i32_1 = arith.constant 0 : i32
    return %c0_i32, %c0_i32_0 : i32, i32
  }
  func.func @transform_6(%arg0: i32) -> (i32, i32) {
    %c0_i32 = arith.constant 0 : i32
    %c0_i32_0 = arith.constant 0 : i32
    return %arg0, %c0_i32 : i32, i32
  }
}

module attributes {stable_mosaic.version = 11 : i64} {
  func.func @_linear_kernel(%arg0: i32, %arg1: memref<32x32xf32, #tpu.memory_space<vmem>>, %arg2: memref<32x96xf32, #tpu.memory_space<vmem>>, %arg3: memref<1x96xf32, #tpu.memory_space<vmem>>, %arg4: memref<32x96xf32, #tpu.memory_space<vmem>>) attributes {dimension_semantics = [#tpu.dimension_semantics<parallel>], iteration_bounds = array<i64: 1>, scalar_prefetch = 0 : i64, scratch_operands = 0 : i64, tpu.core_type = #tpu.core_type<tc>, window_params = [{transform_indices = @transform_0, window_bounds = array<i64: 32, 32>}, {pipeline_mode = #tpu.pipeline_mode<synchronous>, transform_indices = @transform_1, window_bounds = array<i64: 32, 96>}, {pipeline_mode = #tpu.pipeline_mode<synchronous>, transform_indices = @transform_2, window_bounds = array<i64: 1, 96>}, {transform_indices = @transform_3, window_bounds = array<i64: 32, 96>}]} {
    %c0 = arith.constant 0 : index
    %c0_0 = arith.constant 0 : index
    %0 = vector.load %arg1[%c0, %c0_0] : memref<32x32xf32, #tpu.memory_space<vmem>>, vector<32x32xf32>
    %c0_1 = arith.constant 0 : index
    %c0_2 = arith.constant 0 : index
    %1 = vector.load %arg2[%c0_1, %c0_2] : memref<32x96xf32, #tpu.memory_space<vmem>>, vector<32x96xf32>
    %cst = arith.constant dense<0.000000e+00> : vector<32x96xf32>
    %2 = tpu.matmul %0, %1, %cst {dimension_numbers = #tpu.dot_dimension_numbers<[1], [0], [0], [1], [0, 0, 1, 1], [], []>} : vector<32x32xf32>, vector<32x96xf32>, vector<32x96xf32> -> vector<32x96xf32>
    %c0_3 = arith.constant 0 : index
    %c0_4 = arith.constant 0 : index
    %3 = vector.load %arg3[%c0_3, %c0_4] : memref<1x96xf32, #tpu.memory_space<vmem>>, vector<1x96xf32>
    %4 = vector.broadcast %3 : vector<1x96xf32> to vector<32x96xf32>
    %5 = arith.addf %2, %4 : vector<32x96xf32>
    %c0_5 = arith.constant 0 : index
    %c0_6 = arith.constant 0 : index
    %6 = vector.load %arg4[%c0_5, %c0_6] : memref<32x96xf32, #tpu.memory_space<vmem>>, vector<32x96xf32>
    tpu.vector_store %arg4[%c0_5, %c0_6], %5 {strides = array<i32>} : memref<32x96xf32, #tpu.memory_space<vmem>>, vector<32x96xf32>,
    return
  }
  func.func @transform_0(%arg0: i32) -> (i32, i32) {
    %c0_i32 = arith.constant 0 : i32
    %c0_i32_0 = arith.constant 0 : i32
    return %arg0, %c0_i32 : i32, i32
  }
  func.func @transform_1(%arg0: i32) -> (i32, i32) {
    %c0_i32 = arith.constant 0 : i32
    %c0_i32_0 = arith.constant 0 : i32
    %c0_i32_1 = arith.constant 0 : i32
    return %c0_i32, %c0_i32_0 : i32, i32
  }
  func.func @transform_2(%arg0: i32) -> (i32, i32) {
    %c0_i32 = arith.constant 0 : i32
    %c0_i32_0 = arith.constant 0 : i32
    %c0_i32_1 = arith.constant 0 : i32
    return %c0_i32, %c0_i32_0 : i32, i32
  }
  func.func @transform_3(%arg0: i32) -> (i32, i32) {
    %c0_i32 = arith.constant 0 : i32
    %c0_i32_0 = arith.constant 0 : i32
    return %arg0, %c0_i32 : i32, i32
  }
}

module attributes {stable_mosaic.version = 11 : i64} {
  func.func @_attn_kernel(%arg0: i32, %arg1: memref<4x16x16xf32, #tpu.memory_space<vmem>>, %arg2: memref<4x16x16xf32, #tpu.memory_space<vmem>>, %arg3: memref<4x16x16xf32, #tpu.memory_space<vmem>>, %arg4: memref<4x16x16xf32, #tpu.memory_space<vmem>>) attributes {dimension_semantics = [#tpu.dimension_semantics<parallel>], iteration_bounds = array<i64: 1>, scalar_prefetch = 0 : i64, scratch_operands = 0 : i64, tpu.core_type = #tpu.core_type<tc>, window_params = [{transform_indices = @transform_0, window_bounds = array<i64: 4, 16, 16>}, {transform_indices = @transform_1, window_bounds = array<i64: 4, 16, 16>}, {transform_indices = @transform_2, window_bounds = array<i64: 4, 16, 16>}, {transform_indices = @transform_3, window_bounds = array<i64: 4, 16, 16>}]} {
    %c0 = arith.constant 0 : index
    %c0_0 = arith.constant 0 : index
    %c0_1 = arith.constant 0 : index
    %0 = vector.load %arg1[%c0, %c0_0, %c0_1] : memref<4x16x16xf32, #tpu.memory_space<vmem>>, vector<4x16x16xf32>
    %cst = arith.constant 2.500000e-01 : f32
    %1 = vector.broadcast %cst : f32 to vector<4x16x16xf32>
    %2 = arith.mulf %0, %1 : vector<4x16x16xf32>
    %c0_2 = arith.constant 0 : index
    %c0_3 = arith.constant 0 : index
    %c0_4 = arith.constant 0 : index
    %3 = vector.load %arg2[%c0_2, %c0_3, %c0_4] : memref<4x16x16xf32, #tpu.memory_space<vmem>>, vector<4x16x16xf32>
    "tpu.trace_start"() <{level = 10 : i32, message = "bqd,bkd->bqk"}> : () -> ()
    %cst_5 = arith.constant dense<0.000000e+00> : vector<4x16x16xf32>
    %4 = tpu.matmul %2, %3, %cst_5 {dimension_numbers = #tpu.dot_dimension_numbers<[2], [2], [1], [1], [0, 0, 0, 1, 1, 1], [0], [0]>} : vector<4x16x16xf32>, vector<4x16x16xf32>, vector<4x16x16xf32> -> vector<4x16x16xf32>
    "tpu.trace_stop"() : () -> ()
    %cst_6 = arith.constant dense<0xFF800000> : vector<4x16xf32>
    %5 = vector.multi_reduction <maximumf>, %4, %cst_6 [2] : vector<4x16x16xf32> to vector<4x16xf32>
    %6 = vector.shape_cast %5 : vector<4x16xf32> to vector<4x16x1xf32>
    %7 = vector.broadcast %6 : vector<4x16x1xf32> to vector<4x16x16xf32>
    %8 = arith.subf %4, %7 : vector<4x16x16xf32>
    %9 = math.exp %8 : vector<4x16x16xf32>
    %cst_7 = arith.constant dense<0.000000e+00> : vector<4x16xf32>
    %10 = vector.multi_reduction <add>, %9, %cst_7 [2] : vector<4x16x16xf32> to vector<4x16xf32>
    %11 = vector.shape_cast %10 : vector<4x16xf32> to vector<4x16x1xf32>
    %12 = tpu.reciprocal %11 {approx = true} : vector<4x16x1xf32> -> vector<4x16x1xf32>
    %13 = vector.broadcast %12 : vector<4x16x1xf32> to vector<4x16x16xf32>
    %14 = arith.mulf %9, %13 : vector<4x16x16xf32>
    %c0_8 = arith.constant 0 : index
    %c0_9 = arith.constant 0 : index
    %c0_10 = arith.constant 0 : index
    %15 = vector.load %arg3[%c0_8, %c0_9, %c0_10] : memref<4x16x16xf32, #tpu.memory_space<vmem>>, vector<4x16x16xf32>
    "tpu.trace_start"() <{level = 10 : i32, message = "bqk,bkd->bqd"}> : () -> ()
    %cst_11 = arith.constant dense<0.000000e+00> : vector<4x16x16xf32>
    %16 = tpu.matmul %14, %15, %cst_11 {dimension_numbers = #tpu.dot_dimension_numbers<[2], [1], [1], [2], [0, 0, 0, 1, 1, 2], [0], [0]>} : vector<4x16x16xf32>, vector<4x16x16xf32>, vector<4x16x16xf32> -> vector<4x16x16xf32>
    "tpu.trace_stop"() : () -> ()
    %c0_12 = arith.constant 0 : index
    %c0_13 = arith.constant 0 : index
    %c0_14 = arith.constant 0 : index
    %17 = vector.load %arg4[%c0_12, %c0_13, %c0_14] : memref<4x16x16xf32, #tpu.memory_space<vmem>>, vector<4x16x16xf32>
    tpu.vector_store %arg4[%c0_12, %c0_13, %c0_14], %16 {strides = array<i32>} : memref<4x16x16xf32, #tpu.memory_space<vmem>>, vector<4x16x16xf32>,
    return
  }
  func.func @transform_0(%arg0: i32) -> (i32, i32, i32) {
    %c0_i32 = arith.constant 0 : i32
    %c0_i32_0 = arith.constant 0 : i32
    %c0_i32_1 = arith.constant 0 : i32
    return %arg0, %c0_i32, %c0_i32_0 : i32, i32, i32
  }
  func.func @transform_1(%arg0: i32) -> (i32, i32, i32) {
    %c0_i32 = arith.constant 0 : i32
    %c0_i32_0 = arith.constant 0 : i32
    %c0_i32_1 = arith.constant 0 : i32
    return %arg0, %c0_i32, %c0_i32_0 : i32, i32, i32
  }
  func.func @transform_2(%arg0: i32) -> (i32, i32, i32) {
    %c0_i32 = arith.constant 0 : i32
    %c0_i32_0 = arith.constant 0 : i32
    %c0_i32_1 = arith.constant 0 : i32
    return %arg0, %c0_i32, %c0_i32_0 : i32, i32, i32
  }
  func.func @transform_3(%arg0: i32) -> (i32, i32, i32) {
    %c0_i32 = arith.constant 0 : i32
    %c0_i32_0 = arith.constant 0 : i32
    %c0_i32_1 = arith.constant 0 : i32
    return %arg0, %c0_i32, %c0_i32_0 : i32, i32, i32
  }
}

module attributes {stable_mosaic.version = 11 : i64} {
  func.func @_linear_ln_kernel(%arg0: i32, %arg1: memref<32x32xf32, #tpu.memory_space<vmem>>, %arg2: memref<32x32xf32, #tpu.memory_space<vmem>>, %arg3: memref<1x32xf32, #tpu.memory_space<vmem>>, %arg4: memref<32x32xf32, #tpu.memory_space<vmem>>, %arg5: memref<1x32xf32, #tpu.memory_space<vmem>>, %arg6: memref<1x32xf32, #tpu.memory_space<vmem>>, %arg7: memref<32x32xf32, #tpu.memory_space<vmem>>) attributes {dimension_semantics = [#tpu.dimension_semantics<parallel>], iteration_bounds = array<i64: 1>, scalar_prefetch = 0 : i64, scratch_operands = 0 : i64, tpu.core_type = #tpu.core_type<tc>, window_params = [{transform_indices = @transform_0, window_bounds = array<i64: 32, 32>}, {pipeline_mode = #tpu.pipeline_mode<synchronous>, transform_indices = @transform_1, window_bounds = array<i64: 32, 32>}, {pipeline_mode = #tpu.pipeline_mode<synchronous>, transform_indices = @transform_2, window_bounds = array<i64: 1, 32>}, {transform_indices = @transform_3, window_bounds = array<i64: 32, 32>}, {pipeline_mode = #tpu.pipeline_mode<synchronous>, transform_indices = @transform_4, window_bounds = array<i64: 1, 32>}, {pipeline_mode = #tpu.pipeline_mode<synchronous>, transform_indices = @transform_5, window_bounds = array<i64: 1, 32>}, {transform_indices = @transform_6, window_bounds = array<i64: 32, 32>}]} {
    %c0 = arith.constant 0 : index
    %c0_0 = arith.constant 0 : index
    %0 = vector.load %arg1[%c0, %c0_0] : memref<32x32xf32, #tpu.memory_space<vmem>>, vector<32x32xf32>
    %c0_1 = arith.constant 0 : index
    %c0_2 = arith.constant 0 : index
    %1 = vector.load %arg2[%c0_1, %c0_2] : memref<32x32xf32, #tpu.memory_space<vmem>>, vector<32x32xf32>
    %cst = arith.constant dense<0.000000e+00> : vector<32x32xf32>
    %2 = tpu.matmul %0, %1, %cst {dimension_numbers = #tpu.dot_dimension_numbers<[1], [0], [0], [1], [0, 0, 1, 1], [], []>} : vector<32x32xf32>, vector<32x32xf32>, vector<32x32xf32> -> vector<32x32xf32>
    %c0_3 = arith.constant 0 : index
    %c0_4 = arith.constant 0 : index
    %3 = vector.load %arg3[%c0_3, %c0_4] : memref<1x32xf32, #tpu.memory_space<vmem>>, vector<1x32xf32>
    %4 = vector.broadcast %3 : vector<1x32xf32> to vector<32x32xf32>
    %5 = arith.addf %2, %4 : vector<32x32xf32>
    %c0_5 = arith.constant 0 : index
    %c0_6 = arith.constant 0 : index
    %6 = vector.load %arg4[%c0_5, %c0_6] : memref<32x32xf32, #tpu.memory_space<vmem>>, vector<32x32xf32>
    %7 = arith.addf %5, %6 : vector<32x32xf32>
    %cst_7 = arith.constant dense<0.000000e+00> : vector<32xf32>
    %8 = vector.multi_reduction <add>, %7, %cst_7 [1] : vector<32x32xf32> to vector<32xf32>
    %9 = vector.shape_cast %8 : vector<32xf32> to vector<32x1xf32>
    %cst_8 = arith.constant 3.200000e+01 : f32
    %10 = vector.broadcast %cst_8 : f32 to vector<32x1xf32>
    %11 = arith.divf %9, %10 : vector<32x1xf32>
    %12 = vector.broadcast %11 : vector<32x1xf32> to vector<32x32xf32>
    %13 = arith.subf %7, %12 : vector<32x32xf32>
    %14 = arith.mulf %13, %13 : vector<32x32xf32>
    %cst_9 = arith.constant dense<0.000000e+00> : vector<32xf32>
    %15 = vector.multi_reduction <add>, %14, %cst_9 [1] : vector<32x32xf32> to vector<32xf32>
    %16 = vector.shape_cast %15 : vector<32xf32> to vector<32x1xf32>
    %cst_10 = arith.constant 3.200000e+01 : f32
    %17 = vector.broadcast %cst_10 : f32 to vector<32x1xf32>
    %18 = arith.divf %16, %17 : vector<32x1xf32>
    %19 = vector.broadcast %11 : vector<32x1xf32> to vector<32x32xf32>
    %20 = arith.subf %7, %19 : vector<32x32xf32>
    %cst_11 = arith.constant 9.99999974E-6 : f32
    %21 = vector.broadcast %cst_11 : f32 to vector<32x1xf32>
    %22 = arith.addf %18, %21 : vector<32x1xf32>
    %23 = math.rsqrt %22 : vector<32x1xf32>
    %24 = vector.broadcast %23 : vector<32x1xf32> to vector<32x32xf32>
    %25 = arith.mulf %20, %24 : vector<32x32xf32>
    %c0_12 = arith.constant 0 : index
    %c0_13 = arith.constant 0 : index
    %26 = vector.load %arg5[%c0_12, %c0_13] : memref<1x32xf32, #tpu.memory_space<vmem>>, vector<1x32xf32>
    %27 = vector.broadcast %26 : vector<1x32xf32> to vector<32x32xf32>
    %28 = arith.mulf %25, %27 : vector<32x32xf32>
    %c0_14 = arith.constant 0 : index
    %c0_15 = arith.constant 0 : index
    %29 = vector.load %arg6[%c0_14, %c0_15] : memref<1x32xf32, #tpu.memory_space<vmem>>, vector<1x32xf32>
    %30 = vector.broadcast %29 : vector<1x32xf32> to vector<32x32xf32>
    %31 = arith.addf %28, %30 : vector<32x32xf32>
    %c0_16 = arith.constant 0 : index
    %c0_17 = arith.constant 0 : index
    %32 = vector.load %arg7[%c0_16, %c0_17] : memref<32x32xf32, #tpu.memory_space<vmem>>, vector<32x32xf32>
    tpu.vector_store %arg7[%c0_16, %c0_17], %31 {strides = array<i32>} : memref<32x32xf32, #tpu.memory_space<vmem>>, vector<32x32xf32>,
    return
  }
  func.func @transform_0(%arg0: i32) -> (i32, i32) {
    %c0_i32 = arith.constant 0 : i32
    %c0_i32_0 = arith.constant 0 : i32
    return %arg0, %c0_i32 : i32, i32
  }
  func.func @transform_1(%arg0: i32) -> (i32, i32) {
    %c0_i32 = arith.constant 0 : i32
    %c0_i32_0 = arith.constant 0 : i32
    %c0_i32_1 = arith.constant 0 : i32
    return %c0_i32, %c0_i32_0 : i32, i32
  }
  func.func @transform_2(%arg0: i32) -> (i32, i32) {
    %c0_i32 = arith.constant 0 : i32
    %c0_i32_0 = arith.constant 0 : i32
    %c0_i32_1 = arith.constant 0 : i32
    return %c0_i32, %c0_i32_0 : i32, i32
  }
  func.func @transform_3(%arg0: i32) -> (i32, i32) {
    %c0_i32 = arith.constant 0 : i32
    %c0_i32_0 = arith.constant 0 : i32
    return %arg0, %c0_i32 : i32, i32
  }
  func.func @transform_4(%arg0: i32) -> (i32, i32) {
    %c0_i32 = arith.constant 0 : i32
    %c0_i32_0 = arith.constant 0 : i32
    %c0_i32_1 = arith.constant 0 : i32
    return %c0_i32, %c0_i32_0 : i32, i32
  }
  func.func @transform_5(%arg0: i32) -> (i32, i32) {
    %c0_i32 = arith.constant 0 : i32
    %c0_i32_0 = arith.constant 0 : i32
    %c0_i32_1 = arith.constant 0 : i32
    return %c0_i32, %c0_i32_0 : i32, i32
  }
  func.func @transform_6(%arg0: i32) -> (i32, i32) {
    %c0_i32 = arith.constant 0 : i32
    %c0_i32_0 = arith.constant 0 : i32
    return %arg0, %c0_i32 : i32, i32
  }
}

module attributes {stable_mosaic.version = 11 : i64} {
  func.func @_linear_kernel(%arg0: i32, %arg1: memref<32x64xf32, #tpu.memory_space<vmem>>, %arg2: memref<64x64xf32, #tpu.memory_space<vmem>>, %arg3: memref<1x64xf32, #tpu.memory_space<vmem>>, %arg4: memref<32x64xf32, #tpu.memory_space<vmem>>) attributes {dimension_semantics = [#tpu.dimension_semantics<parallel>], iteration_bounds = array<i64: 1>, scalar_prefetch = 0 : i64, scratch_operands = 0 : i64, tpu.core_type = #tpu.core_type<tc>, window_params = [{transform_indices = @transform_0, window_bounds = array<i64: 32, 64>}, {pipeline_mode = #tpu.pipeline_mode<synchronous>, transform_indices = @transform_1, window_bounds = array<i64: 64, 64>}, {pipeline_mode = #tpu.pipeline_mode<synchronous>, transform_indices = @transform_2, window_bounds = array<i64: 1, 64>}, {transform_indices = @transform_3, window_bounds = array<i64: 32, 64>}]} {
    %c0 = arith.constant 0 : index
    %c0_0 = arith.constant 0 : index
    %0 = vector.load %arg1[%c0, %c0_0] : memref<32x64xf32, #tpu.memory_space<vmem>>, vector<32x64xf32>
    %c0_1 = arith.constant 0 : index
    %c0_2 = arith.constant 0 : index
    %1 = vector.load %arg2[%c0_1, %c0_2] : memref<64x64xf32, #tpu.memory_space<vmem>>, vector<64x64xf32>
    %cst = arith.constant dense<0.000000e+00> : vector<32x64xf32>
    %2 = tpu.matmul %0, %1, %cst {dimension_numbers = #tpu.dot_dimension_numbers<[1], [0], [0], [1], [0, 0, 1, 1], [], []>} : vector<32x64xf32>, vector<64x64xf32>, vector<32x64xf32> -> vector<32x64xf32>
    %c0_3 = arith.constant 0 : index
    %c0_4 = arith.constant 0 : index
    %3 = vector.load %arg3[%c0_3, %c0_4] : memref<1x64xf32, #tpu.memory_space<vmem>>, vector<1x64xf32>
    %4 = vector.broadcast %3 : vector<1x64xf32> to vector<32x64xf32>
    %5 = arith.addf %2, %4 : vector<32x64xf32>
    %cst_5 = arith.constant 5.000000e-01 : f32
    %6 = vector.broadcast %cst_5 : f32 to vector<32x64xf32>
    %7 = arith.mulf %6, %5 : vector<32x64xf32>
    %cst_6 = arith.constant 4.471500e-02 : f32
    %8 = vector.broadcast %cst_6 : f32 to vector<32x64xf32>
    %9 = arith.mulf %8, %5 : vector<32x64xf32>
    %10 = arith.mulf %9, %5 : vector<32x64xf32>
    %11 = arith.mulf %10, %5 : vector<32x64xf32>
    %12 = arith.addf %5, %11 : vector<32x64xf32>
    %cst_7 = arith.constant 0.797884583 : f32
    %13 = vector.broadcast %cst_7 : f32 to vector<32x64xf32>
    %14 = arith.mulf %13, %12 : vector<32x64xf32>
    %15 = math.tanh %14 : vector<32x64xf32>
    %cst_8 = arith.constant 1.000000e+00 : f32
    %16 = vector.broadcast %cst_8 : f32 to vector<32x64xf32>
    %17 = arith.addf %16, %15 : vector<32x64xf32>
    %18 = arith.mulf %7, %17 : vector<32x64xf32>
    %c0_9 = arith.constant 0 : index
    %c0_10 = arith.constant 0 : index
    %19 = vector.load %arg4[%c0_9, %c0_10] : memref<32x64xf32, #tpu.memory_space<vmem>>, vector<32x64xf32>
    tpu.vector_store %arg4[%c0_9, %c0_10], %18 {strides = array<i32>} : memref<32x64xf32, #tpu.memory_space<vmem>>, vector<32x64xf32>,
    return
  }
  func.func @transform_0(%arg0: i32) -> (i32, i32) {
    %c0_i32 = arith.constant 0 : i32
    %c0_i32_0 = arith.constant 0 : i32
    return %arg0, %c0_i32 : i32, i32
  }
  func.func @transform_1(%arg0: i32) -> (i32, i32) {
    %c0_i32 = arith.constant 0 : i32
    %c0_i32_0 = arith.constant 0 : i32
    %c0_i32_1 = arith.constant 0 : i32
    return %c0_i32, %c0_i32_0 : i32, i32
  }
  func.func @transform_2(%arg0: i32) -> (i32, i32) {
    %c0_i32 = arith.constant 0 : i32
    %c0_i32_0 = arith.constant 0 : i32
    %c0_i32_1 = arith.constant 0 : i32
    return %c0_i32, %c0_i32_0 : i32, i32
  }
  func.func @transform_3(%arg0: i32) -> (i32, i32) {
    %c0_i32 = arith.constant 0 : i32
    %c0_i32_0 = arith.constant 0 : i32
    return %arg0, %c0_i32 : i32, i32
  }
}

module attributes {stable_mosaic.version = 11 : i64} {
  func.func @_ln_kernel(%arg0: i32, %arg1: memref<32x64xf32, #tpu.memory_space<vmem>>, %arg2: memref<1x64xf32, #tpu.memory_space<vmem>>, %arg3: memref<1x64xf32, #tpu.memory_space<vmem>>, %arg4: memref<32x64xf32, #tpu.memory_space<vmem>>) attributes {dimension_semantics = [#tpu.dimension_semantics<parallel>], iteration_bounds = array<i64: 1>, scalar_prefetch = 0 : i64, scratch_operands = 0 : i64, tpu.core_type = #tpu.core_type<tc>, window_params = [{transform_indices = @transform_0, window_bounds = array<i64: 32, 64>}, {pipeline_mode = #tpu.pipeline_mode<synchronous>, transform_indices = @transform_1, window_bounds = array<i64: 1, 64>}, {pipeline_mode = #tpu.pipeline_mode<synchronous>, transform_indices = @transform_2, window_bounds = array<i64: 1, 64>}, {transform_indices = @transform_3, window_bounds = array<i64: 32, 64>}]} {
    %c0 = arith.constant 0 : index
    %c0_0 = arith.constant 0 : index
    %0 = vector.load %arg1[%c0, %c0_0] : memref<32x64xf32, #tpu.memory_space<vmem>>, vector<32x64xf32>
    %cst = arith.constant dense<0.000000e+00> : vector<32xf32>
    %1 = vector.multi_reduction <add>, %0, %cst [1] : vector<32x64xf32> to vector<32xf32>
    %2 = vector.shape_cast %1 : vector<32xf32> to vector<32x1xf32>
    %cst_1 = arith.constant 6.400000e+01 : f32
    %3 = vector.broadcast %cst_1 : f32 to vector<32x1xf32>
    %4 = arith.divf %2, %3 : vector<32x1xf32>
    %5 = vector.broadcast %4 : vector<32x1xf32> to vector<32x64xf32>
    %6 = arith.subf %0, %5 : vector<32x64xf32>
    %7 = arith.mulf %6, %6 : vector<32x64xf32>
    %cst_2 = arith.constant dense<0.000000e+00> : vector<32xf32>
    %8 = vector.multi_reduction <add>, %7, %cst_2 [1] : vector<32x64xf32> to vector<32xf32>
    %9 = vector.shape_cast %8 : vector<32xf32> to vector<32x1xf32>
    %cst_3 = arith.constant 6.400000e+01 : f32
    %10 = vector.broadcast %cst_3 : f32 to vector<32x1xf32>
    %11 = arith.divf %9, %10 : vector<32x1xf32>
    %12 = vector.broadcast %4 : vector<32x1xf32> to vector<32x64xf32>
    %13 = arith.subf %0, %12 : vector<32x64xf32>
    %cst_4 = arith.constant 9.99999974E-6 : f32
    %14 = vector.broadcast %cst_4 : f32 to vector<32x1xf32>
    %15 = arith.addf %11, %14 : vector<32x1xf32>
    %16 = math.rsqrt %15 : vector<32x1xf32>
    %17 = vector.broadcast %16 : vector<32x1xf32> to vector<32x64xf32>
    %18 = arith.mulf %13, %17 : vector<32x64xf32>
    %c0_5 = arith.constant 0 : index
    %c0_6 = arith.constant 0 : index
    %19 = vector.load %arg2[%c0_5, %c0_6] : memref<1x64xf32, #tpu.memory_space<vmem>>, vector<1x64xf32>
    %20 = vector.broadcast %19 : vector<1x64xf32> to vector<32x64xf32>
    %21 = arith.mulf %18, %20 : vector<32x64xf32>
    %c0_7 = arith.constant 0 : index
    %c0_8 = arith.constant 0 : index
    %22 = vector.load %arg3[%c0_7, %c0_8] : memref<1x64xf32, #tpu.memory_space<vmem>>, vector<1x64xf32>
    %23 = vector.broadcast %22 : vector<1x64xf32> to vector<32x64xf32>
    %24 = arith.addf %21, %23 : vector<32x64xf32>
    %c0_9 = arith.constant 0 : index
    %c0_10 = arith.constant 0 : index
    %25 = vector.load %arg4[%c0_9, %c0_10] : memref<32x64xf32, #tpu.memory_space<vmem>>, vector<32x64xf32>
    tpu.vector_store %arg4[%c0_9, %c0_10], %24 {strides = array<i32>} : memref<32x64xf32, #tpu.memory_space<vmem>>, vector<32x64xf32>,
    return
  }
  func.func @transform_0(%arg0: i32) -> (i32, i32) {
    %c0_i32 = arith.constant 0 : i32
    %c0_i32_0 = arith.constant 0 : i32
    return %arg0, %c0_i32 : i32, i32
  }
  func.func @transform_1(%arg0: i32) -> (i32, i32) {
    %c0_i32 = arith.constant 0 : i32
    %c0_i32_0 = arith.constant 0 : i32
    %c0_i32_1 = arith.constant 0 : i32
    return %c0_i32, %c0_i32_0 : i32, i32
  }
  func.func @transform_2(%arg0: i32) -> (i32, i32) {
    %c0_i32 = arith.constant 0 : i32
    %c0_i32_0 = arith.constant 0 : i32
    %c0_i32_1 = arith.constant 0 : i32
    return %c0_i32, %c0_i32_0 : i32, i32
  }
  func.func @transform_3(%arg0: i32) -> (i32, i32) {
    %c0_i32 = arith.constant 0 : i32
    %c0_i32_0 = arith.constant 0 : i32
    return %arg0, %c0_i32 : i32, i32
  }
}

module attributes {stable_mosaic.version = 11 : i64} {
  func.func @_linear_ln_kernel(%arg0: i32, %arg1: memref<32x64xf32, #tpu.memory_space<vmem>>, %arg2: memref<64x32xf32, #tpu.memory_space<vmem>>, %arg3: memref<1x32xf32, #tpu.memory_space<vmem>>, %arg4: memref<1x32xf32, #tpu.memory_space<vmem>>, %arg5: memref<1x32xf32, #tpu.memory_space<vmem>>, %arg6: memref<32x32xf32, #tpu.memory_space<vmem>>) attributes {dimension_semantics = [#tpu.dimension_semantics<parallel>], iteration_bounds = array<i64: 1>, scalar_prefetch = 0 : i64, scratch_operands = 0 : i64, tpu.core_type = #tpu.core_type<tc>, window_params = [{transform_indices = @transform_0, window_bounds = array<i64: 32, 64>}, {pipeline_mode = #tpu.pipeline_mode<synchronous>, transform_indices = @transform_1, window_bounds = array<i64: 64, 32>}, {pipeline_mode = #tpu.pipeline_mode<synchronous>, transform_indices = @transform_2, window_bounds = array<i64: 1, 32>}, {pipeline_mode = #tpu.pipeline_mode<synchronous>, transform_indices = @transform_3, window_bounds = array<i64: 1, 32>}, {pipeline_mode = #tpu.pipeline_mode<synchronous>, transform_indices = @transform_4, window_bounds = array<i64: 1, 32>}, {transform_indices = @transform_5, window_bounds = array<i64: 32, 32>}]} {
    %c0 = arith.constant 0 : index
    %c0_0 = arith.constant 0 : index
    %0 = vector.load %arg1[%c0, %c0_0] : memref<32x64xf32, #tpu.memory_space<vmem>>, vector<32x64xf32>
    %c0_1 = arith.constant 0 : index
    %c0_2 = arith.constant 0 : index
    %1 = vector.load %arg2[%c0_1, %c0_2] : memref<64x32xf32, #tpu.memory_space<vmem>>, vector<64x32xf32>
    %cst = arith.constant dense<0.000000e+00> : vector<32x32xf32>
    %2 = tpu.matmul %0, %1, %cst {dimension_numbers = #tpu.dot_dimension_numbers<[1], [0], [0], [1], [0, 0, 1, 1], [], []>} : vector<32x64xf32>, vector<64x32xf32>, vector<32x32xf32> -> vector<32x32xf32>
    %c0_3 = arith.constant 0 : index
    %c0_4 = arith.constant 0 : index
    %3 = vector.load %arg3[%c0_3, %c0_4] : memref<1x32xf32, #tpu.memory_space<vmem>>, vector<1x32xf32>
    %4 = vector.broadcast %3 : vector<1x32xf32> to vector<32x32xf32>
    %5 = arith.addf %2, %4 : vector<32x32xf32>
    %cst_5 = arith.constant dense<0.000000e+00> : vector<32xf32>
    %6 = vector.multi_reduction <add>, %5, %cst_5 [1] : vector<32x32xf32> to vector<32xf32>
    %7 = vector.shape_cast %6 : vector<32xf32> to vector<32x1xf32>
    %cst_6 = arith.constant 3.200000e+01 : f32
    %8 = vector.broadcast %cst_6 : f32 to vector<32x1xf32>
    %9 = arith.divf %7, %8 : vector<32x1xf32>
    %10 = vector.broadcast %9 : vector<32x1xf32> to vector<32x32xf32>
    %11 = arith.subf %5, %10 : vector<32x32xf32>
    %12 = arith.mulf %11, %11 : vector<32x32xf32>
    %cst_7 = arith.constant dense<0.000000e+00> : vector<32xf32>
    %13 = vector.multi_reduction <add>, %12, %cst_7 [1] : vector<32x32xf32> to vector<32xf32>
    %14 = vector.shape_cast %13 : vector<32xf32> to vector<32x1xf32>
    %cst_8 = arith.constant 3.200000e+01 : f32
    %15 = vector.broadcast %cst_8 : f32 to vector<32x1xf32>
    %16 = arith.divf %14, %15 : vector<32x1xf32>
    %17 = vector.broadcast %9 : vector<32x1xf32> to vector<32x32xf32>
    %18 = arith.subf %5, %17 : vector<32x32xf32>
    %cst_9 = arith.constant 9.99999974E-6 : f32
    %19 = vector.broadcast %cst_9 : f32 to vector<32x1xf32>
    %20 = arith.addf %16, %19 : vector<32x1xf32>
    %21 = math.rsqrt %20 : vector<32x1xf32>
    %22 = vector.broadcast %21 : vector<32x1xf32> to vector<32x32xf32>
    %23 = arith.mulf %18, %22 : vector<32x32xf32>
    %c0_10 = arith.constant 0 : index
    %c0_11 = arith.constant 0 : index
    %24 = vector.load %arg4[%c0_10, %c0_11] : memref<1x32xf32, #tpu.memory_space<vmem>>, vector<1x32xf32>
    %25 = vector.broadcast %24 : vector<1x32xf32> to vector<32x32xf32>
    %26 = arith.mulf %23, %25 : vector<32x32xf32>
    %c0_12 = arith.constant 0 : index
    %c0_13 = arith.constant 0 : index
    %27 = vector.load %arg5[%c0_12, %c0_13] : memref<1x32xf32, #tpu.memory_space<vmem>>, vector<1x32xf32>
    %28 = vector.broadcast %27 : vector<1x32xf32> to vector<32x32xf32>
    %29 = arith.addf %26, %28 : vector<32x32xf32>
    %c0_14 = arith.constant 0 : index
    %c0_15 = arith.constant 0 : index
    %30 = vector.load %arg6[%c0_14, %c0_15] : memref<32x32xf32, #tpu.memory_space<vmem>>, vector<32x32xf32>
    tpu.vector_store %arg6[%c0_14, %c0_15], %29 {strides = array<i32>} : memref<32x32xf32, #tpu.memory_space<vmem>>, vector<32x32xf32>,
    return
  }
  func.func @transform_0(%arg0: i32) -> (i32, i32) {
    %c0_i32 = arith.constant 0 : i32
    %c0_i32_0 = arith.constant 0 : i32
    return %arg0, %c0_i32 : i32, i32
  }
  func.func @transform_1(%arg0: i32) -> (i32, i32) {
    %c0_i32 = arith.constant 0 : i32
    %c0_i32_0 = arith.constant 0 : i32
    %c0_i32_1 = arith.constant 0 : i32
    return %c0_i32, %c0_i32_0 : i32, i32
  }
  func.func @transform_2(%arg0: i32) -> (i32, i32) {
    %c0_i32 = arith.constant 0 : i32
    %c0_i32_0 = arith.constant 0 : i32
    %c0_i32_1 = arith.constant 0 : i32
    return %c0_i32, %c0_i32_0 : i32, i32
  }
  func.func @transform_3(%arg0: i32) -> (i32, i32) {
    %c0_i32 = arith.constant 0 : i32
    %c0_i32_0 = arith.constant 0 : i32
    %c0_i32_1 = arith.constant 0 : i32
    return %c0_i32, %c0_i32_0 : i32, i32
  }
  func.func @transform_4(%arg0: i32) -> (i32, i32) {
    %c0_i32 = arith.constant 0 : i32
    %c0_i32_0 = arith.constant 0 : i32
    %c0_i32_1 = arith.constant 0 : i32
    return %c0_i32, %c0_i32_0 : i32, i32
  }
  func.func @transform_5(%arg0: i32) -> (i32, i32) {
    %c0_i32 = arith.constant 0 : i32
    %c0_i32_0 = arith.constant 0 : i32
    return %arg0, %c0_i32 : i32, i32
  }
}

module attributes {stable_mosaic.version = 11 : i64} {
  func.func @_linear_kernel(%arg0: i32, %arg1: memref<32x32xf32, #tpu.memory_space<vmem>>, %arg2: memref<32x4xf32, #tpu.memory_space<vmem>>, %arg3: memref<1x4xf32, #tpu.memory_space<vmem>>, %arg4: memref<32x4xf32, #tpu.memory_space<vmem>>) attributes {dimension_semantics = [#tpu.dimension_semantics<parallel>], iteration_bounds = array<i64: 1>, scalar_prefetch = 0 : i64, scratch_operands = 0 : i64, tpu.core_type = #tpu.core_type<tc>, window_params = [{transform_indices = @transform_0, window_bounds = array<i64: 32, 32>}, {pipeline_mode = #tpu.pipeline_mode<synchronous>, transform_indices = @transform_1, window_bounds = array<i64: 32, 4>}, {pipeline_mode = #tpu.pipeline_mode<synchronous>, transform_indices = @transform_2, window_bounds = array<i64: 1, 4>}, {transform_indices = @transform_3, window_bounds = array<i64: 32, 4>}]} {
    %c0 = arith.constant 0 : index
    %c0_0 = arith.constant 0 : index
    %0 = vector.load %arg1[%c0, %c0_0] : memref<32x32xf32, #tpu.memory_space<vmem>>, vector<32x32xf32>
    %c0_1 = arith.constant 0 : index
    %c0_2 = arith.constant 0 : index
    %1 = vector.load %arg2[%c0_1, %c0_2] : memref<32x4xf32, #tpu.memory_space<vmem>>, vector<32x4xf32>
    %cst = arith.constant dense<0.000000e+00> : vector<32x4xf32>
    %2 = tpu.matmul %0, %1, %cst {dimension_numbers = #tpu.dot_dimension_numbers<[1], [0], [0], [1], [0, 0, 1, 1], [], []>} : vector<32x32xf32>, vector<32x4xf32>, vector<32x4xf32> -> vector<32x4xf32>
    %c0_3 = arith.constant 0 : index
    %c0_4 = arith.constant 0 : index
    %3 = vector.load %arg3[%c0_3, %c0_4] : memref<1x4xf32, #tpu.memory_space<vmem>>, vector<1x4xf32>
    %4 = vector.broadcast %3 : vector<1x4xf32> to vector<32x4xf32>
    %5 = arith.addf %2, %4 : vector<32x4xf32>
    %c0_5 = arith.constant 0 : index
    %c0_6 = arith.constant 0 : index
    %6 = vector.load %arg4[%c0_5, %c0_6] : memref<32x4xf32, #tpu.memory_space<vmem>>, vector<32x4xf32>
    tpu.vector_store %arg4[%c0_5, %c0_6], %5 {strides = array<i32>} : memref<32x4xf32, #tpu.memory_space<vmem>>, vector<32x4xf32>,
    return
  }
  func.func @transform_0(%arg0: i32) -> (i32, i32) {
    %c0_i32 = arith.constant 0 : i32
    %c0_i32_0 = arith.constant 0 : i32
    return %arg0, %c0_i32 : i32, i32
  }
  func.func @transform_1(%arg0: i32) -> (i32, i32) {
    %c0_i32 = arith.constant 0 : i32
    %c0_i32_0 = arith.constant 0 : i32
    %c0_i32_1 = arith.constant 0 : i32
    return %c0_i32, %c0_i32_0 : i32, i32
  }
  func.func @transform_2(%arg0: i32) -> (i32, i32) {
    %c0_i32 = arith.constant 0 : i32
    %c0_i32_0 = arith.constant 0 : i32
    %c0_i32_1 = arith.constant 0 : i32
    return %c0_i32, %c0_i32_0 : i32, i32
  }
  func.func @transform_3(%arg0: i32) -> (i32, i32) {
    %c0_i32 = arith.constant 0 : i32
    %c0_i32_0 = arith.constant 0 : i32
    return %arg0, %c0_i32 : i32, i32
  }
}

</mosaic_0001>

<bundles_post_ra>
// kernel: reconstruction_forward.32
= control target key start
LH: loop header
LB: loop body
LE: loop exit
PB: predicated region body
PF: predicated region fallthrough
CT: control target
= control target key end

     0   :  { %vm16_vm0 = vcmask 261120   ;;  %s118_s0 = inlined_call_operand.vmem [shape: f32[16,32], index: 0, kind: input, shape index: {}]   ;;  %s119_s1 = inlined_call_operand.vmem [shape: f32[1,32], index: 1, kind: input, shape index: {}]   ;;  %s120_s2 = inlined_call_operand.vmem [shape: f32[1,32], index: 2, kind: input, shape index: {}]   ;;  %s121_s3 = inlined_call_operand.vmem [shape: f32[16,32], index: 3, kind: output, shape index: {}]  }
   0x1   :  { %v14_v0 = vld [vmem:[%s118_s0] sm:$0xff]  ;;  %v15_v1 = vld [vmem:[%s118_s0 + $0x8] sm:$0xff] }
   0x2   :  { %v17_v2 = vsel %vm16_vm0, %v14_v0, 0.0  ;;  %v20_v3 = vsel %vm16_vm0, %v15_v1, 0.0  ;;  %v68_v21 = vld [vmem:[%s119_s1] ss:$0 sm:$0xff] }
   0x3   :  { %18 = vadd.xlane.f32.xlu0 %v17_v2  ;;  %v69_v23 = vld [vmem:[%s120_s2] ss:$0 sm:$0xff] }
   0x7   :  { %21 = vadd.xlane.f32.xlu0 %v20_v3 }
  0x8c   :  { %v19_v4 = vpop.xlane.xlu0 %18 }
  0x8d   :  { %v24_v5 = vmul.f32 0.03125, %v19_v4 }
  0x8f   :  { %v26_v6 = vsub.f32 %v14_v0, %v24_v5 }
  0x90   :  { %v22_v7 = vpop.xlane.xlu0 %21 }
  0x91   :  { %v25_v8 = vmul.f32 0.03125, %v22_v7  ;;  %v28_v9 = vmul.f32 %v26_v6, %v26_v6 }
  0x93   :  { %v27_v10 = vsub.f32 %v15_v1, %v25_v8  ;;  %v30_v11 = vsel %vm16_vm0, %v28_v9, 0.0 }
  0x94   :  { %31 = vadd.xlane.f32.xlu1 %v30_v11 }
  0x95   :  { %v29_v12 = vmul.f32 %v27_v10, %v27_v10 }
  0x97   :  { %v33_v13 = vsel %vm16_vm0, %v29_v12, 0.0 }
  0x98   :  { %34 = vadd.xlane.f32.xlu1 %v33_v13 }
 0x11d   :  { %v32_v14 = vpop.xlane.xlu1 %31 }
 0x11e   :  { %v36_v15 = vmul.f32 0.03125, %v32_v14 }
 0x120   :  { %v38_v16 = vadd.f32 1e-05, %v36_v15 }
 0x121   :  { %v35_v17 = vpop.xlane.xlu1 %34 }
 0x122   :  { %70 = vrsqrt.f32 %v38_v16  ;;  %v37_v18 = vmul.f32 0.03125, %v35_v17 }
 0x124   :  { %v39_v19 = vadd.f32 1e-05, %v37_v18 }
 0x126   :  { %72 = vrsqrt.f32 %v39_v19 }
 0x12f   :  { %v71_v20 = vpop.eup %70 }
 0x130   :  { %v42_v22 = vmul.f32 %v71_v20, %v26_v6 }
 0x132   :  { %v51_v24 = vmul.f32 %v68_v21, %v42_v22 }
 0x133   :  { %v73_v25 = vpop.eup %72 }
 0x134   :  { %v60_v26 = vadd.f32 %v69_v23, %v51_v24  ;;  %v43_v27 = vmul.f32 %v73_v25, %v27_v10 }
 0x136   :  { %62 = vst.msk [vmem:[%s121_s3] sm:$0xff] %vm16_vm0, %v60_v26  ;;  %v52_v28 = vmul.f32 %v68_v21, %v43_v27 }
 0x138   :  { %v61_v29 = vadd.f32 %v69_v23, %v52_v28 }
 0x13a   :  { %63 = vst.msk [vmem:[%s121_s3 + $0x8] sm:$0xff] %vm16_vm0, %v61_v29 }

// kernel: reconstruction_forward.31
= control target key start
LH: loop header
LB: loop body
LE: loop exit
PB: predicated region body
PF: predicated region fallthrough
CT: control target
= control target key end

     0   :  { %vm45_vm0 = vcmask 1043456   ;;  %vm32_vm1 = vcmask 31744   ;;  %vm134_vm2 = vcmask 261120   ;;  %s327_s1 = inlined_call_operand.vmem [shape: f32[4,32], index: 1, kind: input, shape index: {}]   ;;  %s328_s0 = inlined_call_operand.vmem [shape: f32[32,4], index: 0, kind: input, shape index: {}]   ;;  %s329_s2 = inlined_call_operand.vmem [shape: f32[1,32], index: 2, kind: input, shape index: {}]   ;;  %s330_s3 = inlined_call_operand.vmem [shape: f32[1,32], index: 3, kind: input, shape index: {}]   ;;  %s331_s4 = inlined_call_operand.vmem [shape: f32[1,32], index: 4, kind: input, shape index: {}]   ;;  %s332_s5 = inlined_call_operand.vmem [shape: f32[32,32], index: 5, kind: output, shape index: {}]  }
   0x1   :  { %v24_v0 = vld [vmem:[%s327_s1] sm:$0xf]  ;;  %v22_v2 = vld [vmem:[%s328_s0 + $0x10] sm:$0xff]  ;;  %v21_v3 = vld [vmem:[%s328_s0 + $0x8] sm:$0xff] }
   0x2   :  { %v20_v1 = vld [vmem:[%s328_s0] sm:$0xff]  ;;  %231 = vmatprep.subr.msk.mxu0 %vm45_vm0, %v24_v0  ;;  %239 = vmatprep.subr.msk.mxu1 %vm45_vm0, %v24_v0  ;;  %v23_v4 = vld [vmem:[%s328_s0 + $0x18] sm:$0xff] }
   0x3   :  { %232 = vmatpush3.msk.msra.mxu0 %vm45_vm0, %v24_v0  ;;  %240 = vmatpush3.msk.msra.mxu1 %vm45_vm0, %v24_v0  ;;  %v218_v7 = vld [vmem:[%s329_s2] ss:$0 sm:$0xff] }
   0x4   :  { %233 = vmatprep.mubr.msk.f32.mxu0 %vm32_vm1, %v20_v1  ;;  %236 = vmatprep.mubr.msk.f32.mxu1 %vm32_vm1, %v22_v2  ;;  %v224_v51 = vld [vmem:[%s330_s3] ss:$0 sm:$0xff] }
   0x5   :  { %234 = vmatmul.mubr.msk.f32.vlgmr.msra.gmra.mxu0 %vm32_vm1, %v21_v3  ;;  %237 = vmatmul.mubr.msk.f32.vlgmr.msra.gmra.mxu1 %vm32_vm1, %v23_v4  ;;  %v225_v53 = vld [vmem:[%s331_s4] ss:$0 sm:$0xff] }
  0xc5   :  { %v235_v5 = vpop.f32.mrf.mxu0  ;;  %v238_v6 = vpop.f32.mrf.mxu1 }
  0xc6   :  { %v121_v12 = vadd.f32 %v235_v5, %v218_v7  ;;  %v131_v13 = vadd.f32 %v238_v6, %v218_v7 }
  0xc7   :  { %v115_v8 = vpop.f32.mrf.mxu0  ;;  %v125_v9 = vpop.f32.mrf.mxu1 }
  0xc8   :  { %v116_v10 = vadd.f32 %v218_v7, %v115_v8  ;;  %v126_v11 = vadd.f32 %v218_v7, %v125_v9  ;;  %v144_v16 = vsel %vm134_vm2, %v131_v13, 0.0  ;;  %v138_v17 = vsel %vm134_vm2, %v121_v12, 0.0 }
  0xca   :  { %v141_v14 = vsel %vm134_vm2, %v126_v11, 0.0  ;;  %v135_v15 = vsel %vm134_vm2, %v116_v10, 0.0 }
  0xcb   :  { %142 = vadd.xlane.f32.xlu1 %v141_v14  ;;  %136 = vadd.xlane.f32.xlu0 %v135_v15 }
  0xcf   :  { %145 = vadd.xlane.f32.xlu1 %v144_v16  ;;  %139 = vadd.xlane.f32.xlu0 %v138_v17 }
 0x154   :  { %v143_v18 = vpop.xlane.xlu1 %142  ;;  %v137_v19 = vpop.xlane.xlu0 %136 }
 0x155   :  { %v150_v20 = vmul.f32 0.03125, %v143_v18  ;;  %v148_v21 = vmul.f32 0.03125, %v137_v19 }
 0x157   :  { %v154_v22 = vsub.f32 %v126_v11, %v150_v20  ;;  %v152_v23 = vsub.f32 %v116_v10, %v148_v21 }
 0x158   :  { %v146_v24 = vpop.xlane.xlu1 %145  ;;  %v140_v25 = vpop.xlane.xlu0 %139 }
 0x159   :  { %v151_v26 = vmul.f32 0.03125, %v146_v24  ;;  %v149_v27 = vmul.f32 0.03125, %v140_v25  ;;  %v156_v28 = vmul.f32 %v152_v23, %v152_v23  ;;  %v158_v32 = vmul.f32 %v154_v22, %v154_v22 }
 0x15b   :  { %v155_v29 = vsub.f32 %v131_v13, %v151_v26  ;;  %v153_v30 = vsub.f32 %v121_v12, %v149_v27  ;;  %v160_v31 = vsel %vm134_vm2, %v156_v28, 0.0  ;;  %v166_v34 = vsel %vm134_vm2, %v158_v32, 0.0 }
 0x15c   :  { %161 = vadd.xlane.f32.xlu0 %v160_v31 }
 0x15d   :  { %v157_v33 = vmul.f32 %v153_v30, %v153_v30  ;;  %v159_v36 = vmul.f32 %v155_v29, %v155_v29 }
 0x15f   :  { %v163_v35 = vsel %vm134_vm2, %v157_v33, 0.0  ;;  %v169_v37 = vsel %vm134_vm2, %v159_v36, 0.0 }
 0x160   :  { %167 = vadd.xlane.f32.xlu0 %v166_v34  ;;  %164 = vadd.xlane.f32.xlu1 %v163_v35 }
 0x164   :  { %170 = vadd.xlane.f32.xlu1 %v169_v37 }
 0x1e5   :  { %v162_v38 = vpop.xlane.xlu0 %161 }
 0x1e6   :  { %v172_v39 = vmul.f32 0.03125, %v162_v38 }
 0x1e8   :  { %v176_v40 = vadd.f32 1e-05, %v172_v39 }
 0x1e9   :  { %v165_v41 = vpop.xlane.xlu1 %164  ;;  %v168_v42 = vpop.xlane.xlu0 %167 }
 0x1ea   :  { %241 = vrsqrt.f32 %v176_v40  ;;  %v173_v43 = vmul.f32 0.03125, %v165_v41  ;;  %v174_v44 = vmul.f32 0.03125, %v168_v42 }
 0x1ec   :  { %v177_v45 = vadd.f32 1e-05, %v173_v43  ;;  %v178_v46 = vadd.f32 1e-05, %v174_v44 }
 0x1ed   :  { %v171_v47 = vpop.xlane.xlu1 %170 }
 0x1ee   :  { %243 = vrsqrt.f32 %v177_v45  ;;  %v175_v48 = vmul.f32 0.03125, %v171_v47 }
 0x1ef   :  { %245 = vrsqrt.f32 %v178_v46 }
 0x1f0   :  { %v179_v49 = vadd.f32 1e-05, %v175_v48 }
 0x1f2   :  { %247 = vrsqrt.f32 %v179_v49 }
 0x1f7   :  { %v242_v50 = vpop.eup %241 }
 0x1f8   :  { %v184_v52 = vmul.f32 %v242_v50, %v152_v23 }
 0x1fa   :  { %v195_v54 = vmul.f32 %v224_v51, %v184_v52 }
 0x1fb   :  { %v244_v55 = vpop.eup %243 }
 0x1fc   :  { %v246_v56 = vpop.eup %245  ;;  %v206_v57 = vadd.f32 %v225_v53, %v195_v54  ;;  %v185_v58 = vmul.f32 %v244_v55, %v153_v30 }
 0x1fd   :  { %v186_v59 = vmul.f32 %v246_v56, %v154_v22 }
 0x1fe   :  { %210 = vst.msk [vmem:[%s332_s5] sm:$0xff] %vm134_vm2, %v206_v57  ;;  %v196_v60 = vmul.f32 %v224_v51, %v185_v58 }
 0x1ff   :  { %v248_v61 = vpop.eup %247  ;;  %v197_v62 = vmul.f32 %v224_v51, %v186_v59 }
 0x200   :  { %v207_v63 = vadd.f32 %v225_v53, %v196_v60  ;;  %v187_v0 = vmul.f32 %v248_v61, %v155_v29 }
 0x201   :  { %v208_v1 = vadd.f32 %v225_v53, %v197_v62 }
 0x202   :  { %211 = vst.msk [vmem:[%s332_s5 + $0x8] sm:$0xff] %vm134_vm2, %v207_v63  ;;  %v198_v2 = vmul.f32 %v224_v51, %v187_v0 }
 0x203   :  { %212 = vst.msk [vmem:[%s332_s5 + $0x10] sm:$0xff] %vm134_vm2, %v208_v1 }
 0x204   :  { %v209_v3 = vadd.f32 %v225_v53, %v198_v2 }
 0x206   :  { %213 = vst.msk [vmem:[%s332_s5 + $0x18] sm:$0xff] %vm134_vm2, %v209_v3 }

// kernel: reconstruction_forward.30
= control target key start
LH: loop header
LB: loop body
LE: loop exit
PB: predicated region body
PF: predicated region fallthrough
CT: control target
= control target key end

     0   :  { %vm55_vm0 = vcmask 1043456   ;;  %vm30_vm1 = vcmask 31744   ;;  %vm164_vm2 = vcmask 261120   ;;  %s302_s1 = inlined_call_operand.vmem [shape: f32[4,32], index: 1, kind: input, shape index: {}]   ;;  %s303_s0 = inlined_call_operand.vmem [shape: f32[64,4], index: 0, kind: input, shape index: {}]   ;;  %s304_s2 = inlined_call_operand.vmem [shape: f32[1,32], index: 2, kind: input, shape index: {}]   ;;  %s305_s3 = inlined_call_operand.vmem [shape: f32[64,32], index: 3, kind: output, shape index: {}]  }
   0x1   :  { %v22_v0 = vld [vmem:[%s302_s1] sm:$0xf]  ;;  %v15_v3 = vld [vmem:[%s303_s0 + $0x8] sm:$0xff]  ;;  %v16_v5 = vld [vmem:[%s303_s0 + $0x10] sm:$0xff] }
   0x2   :  { %v14_v1 = vld [vmem:[%s303_s0] sm:$0xff]  ;;  %196 = vmatprep.subr.msk.mxu0 %vm55_vm0, %v22_v0  ;;  %210 = vmatprep.subr.msk.mxu1 %vm55_vm0, %v22_v0  ;;  %v19_v4 = vld [vmem:[%s303_s0 + $0x28] sm:$0xff]  ;;  %v20_v6 = vld [vmem:[%s303_s0 + $0x30] sm:$0xff] }
   0x3   :  { %v18_v2 = vld [vmem:[%s303_s0 + $0x20] sm:$0xff]  ;;  %197 = vmatpush3.msk.msra.mxu0 %vm55_vm0, %v22_v0  ;;  %211 = vmatpush3.msk.msra.mxu1 %vm55_vm0, %v22_v0  ;;  %v17_v7 = vld [vmem:[%s303_s0 + $0x18] sm:$0xff] }
   0x4   :  { %198 = vmatprep.mubr.msk.f32.mxu0 %vm30_vm1, %v14_v1  ;;  %204 = vmatprep.mubr.msk.f32.mxu1 %vm30_vm1, %v18_v2  ;;  %v21_v8 = vld [vmem:[%s303_s0 + $0x38] sm:$0xff]  ;;  %v177_v9 = vld [vmem:[%s304_s2] ss:$0 sm:$0xff] }
   0x5   :  { %199 = vmatmul.mubr.msk.f32.vlgmr.msra.gmra.mxu0 %vm30_vm1, %v15_v3  ;;  %205 = vmatmul.mubr.msk.f32.vlgmr.msra.gmra.mxu1 %vm30_vm1, %v19_v4 }
   0x6   :  { %201 = vmatprep.mubr.msk.f32.mxu0 %vm30_vm1, %v16_v5  ;;  %207 = vmatprep.mubr.msk.f32.mxu1 %vm30_vm1, %v20_v6 }
   0x9   :  { %202 = vmatmul.mubr.msk.f32.gmra.mxu0 %vm30_vm1, %v17_v7  ;;  %208 = vmatmul.mubr.msk.f32.gmra.mxu1 %vm30_vm1, %v21_v8 }
  0xc5   :  { %v200_v10 = vpop.f32.mrf.mxu0  ;;  %v206_v11 = vpop.f32.mrf.mxu1 }
  0xc6   :  { %v131_v12 = vadd.f32 %v200_v10, %v177_v9  ;;  %v151_v13 = vadd.f32 %v206_v11, %v177_v9 }
  0xc7   :  { %v125_v14 = vpop.f32.mrf.mxu0  ;;  %v145_v15 = vpop.f32.mrf.mxu1 }
  0xc8   :  { %166 = vst.msk [vmem:[%s305_s3 + $0x8] sm:$0xff] %vm164_vm2, %v131_v12  ;;  %170 = vst.msk [vmem:[%s305_s3 + $0x28] sm:$0xff] %vm164_vm2, %v151_v13  ;;  %v126_v16 = vadd.f32 %v177_v9, %v125_v14  ;;  %v146_v17 = vadd.f32 %v177_v9, %v145_v15 }
  0xc9   :  { %v203_v18 = vpop.f32.mrf.mxu0  ;;  %v209_v19 = vpop.f32.mrf.mxu1 }
  0xca   :  { %165 = vst.msk [vmem:[%s305_s3] sm:$0xff] %vm164_vm2, %v126_v16  ;;  %169 = vst.msk [vmem:[%s305_s3 + $0x20] sm:$0xff] %vm164_vm2, %v146_v17  ;;  %v141_v20 = vadd.f32 %v203_v18, %v177_v9  ;;  %v161_v21 = vadd.f32 %v209_v19, %v177_v9 }
  0xcb   :  { %v135_v22 = vpop.f32.mrf.mxu0  ;;  %v155_v23 = vpop.f32.mrf.mxu1 }
  0xcc   :  { %168 = vst.msk [vmem:[%s305_s3 + $0x18] sm:$0xff] %vm164_vm2, %v141_v20  ;;  %172 = vst.msk [vmem:[%s305_s3 + $0x38] sm:$0xff] %vm164_vm2, %v161_v21  ;;  %v136_v24 = vadd.f32 %v177_v9, %v135_v22  ;;  %v156_v25 = vadd.f32 %v177_v9, %v155_v23 }
  0xce   :  { %167 = vst.msk [vmem:[%s305_s3 + $0x10] sm:$0xff] %vm164_vm2, %v136_v24  ;;  %171 = vst.msk [vmem:[%s305_s3 + $0x30] sm:$0xff] %vm164_vm2, %v156_v25 }

// kernel: reconstruction_forward.38
= control target key start
LH: loop header
LB: loop body
LE: loop exit
PB: predicated region body
PF: predicated region fallthrough
CT: control target
= control target key end

     0   :  { %vm31_vm0 = vcmask 130048   ;;  %vm161_vm1 = vcmask 785408   ;;  %s306_s1 = inlined_call_operand.vmem [shape: f32[16,96], index: 1, kind: input, shape index: {}]   ;;  %s307_s0 = inlined_call_operand.vmem [shape: f32[64,16], index: 0, kind: input, shape index: {}]   ;;  %s308_s2 = inlined_call_operand.vmem [shape: f32[1,96], index: 2, kind: input, shape index: {}]   ;;  %s309_s3 = inlined_call_operand.vmem [shape: f32[64,96], index: 3, kind: output, shape index: {}]  }
   0x1   :  { %v23_v0 = vld [vmem:[%s306_s1 + $0x8] sm:$0xff]  ;;  %v22_v1 = vld [vmem:[%s306_s1] sm:$0xff]  ;;  %v16_v6 = vld [vmem:[%s307_s0 + $0x10] sm:$0xff] }
   0x2   :  { %193 = vmatprep.subr.mxu0 %v23_v0  ;;  %209 = vmatprep.subr.mxu1 %v23_v0  ;;  %v14_v2 = vld [vmem:[%s307_s0] sm:$0xff]  ;;  %v15_v4 = vld [vmem:[%s307_s0 + $0x8] sm:$0xff]  ;;  %v20_v7 = vld [vmem:[%s307_s0 + $0x30] sm:$0xff] }
   0x3   :  { %194 = vmatpush3.msra.mxu0 %v23_v0  ;;  %211 = vmatpush3.msra.mxu1 %v23_v0  ;;  %v18_v3 = vld [vmem:[%s307_s0 + $0x20] sm:$0xff]  ;;  %v19_v5 = vld [vmem:[%s307_s0 + $0x28] sm:$0xff]  ;;  %v17_v8 = vld [vmem:[%s307_s0 + $0x18] sm:$0xff] }
   0x4   :  { %195 = vmatprep.subr.mxu0 %v22_v1  ;;  %210 = vmatprep.subr.mxu1 %v22_v1  ;;  %v21_v9 = vld [vmem:[%s307_s0 + $0x38] sm:$0xff]  ;;  %v174_v10 = vld [vmem:[%s308_s2] ss:$0 sm:$0xff] }
   0x5   :  { %196 = vmatpush3.msra.mxu0 %v22_v1  ;;  %212 = vmatpush3.msra.mxu1 %v22_v1 }
   0x6   :  { %197 = vmatprep.mubr.msk.f32.mxu0 %vm31_vm0, %v14_v2  ;;  %203 = vmatprep.mubr.msk.f32.mxu1 %vm31_vm0, %v18_v3 }
   0x7   :  { %198 = vmatmul.mubr.msk.f32.vlgmr.msra.gmra.mxu0 %vm31_vm0, %v15_v4  ;;  %204 = vmatmul.mubr.msk.f32.vlgmr.msra.gmra.mxu1 %vm31_vm0, %v19_v5 }
   0x8   :  { %200 = vmatprep.mubr.msk.f32.mxu0 %vm31_vm0, %v16_v6  ;;  %206 = vmatprep.mubr.msk.f32.mxu1 %vm31_vm0, %v20_v7 }
   0xb   :  { %201 = vmatmul.mubr.msk.f32.gmra.mxu0 %vm31_vm0, %v17_v8  ;;  %207 = vmatmul.mubr.msk.f32.gmra.mxu1 %vm31_vm0, %v21_v9 }
  0xc7   :  { %v199_v11 = vpop.f32.mrf.mxu0  ;;  %v205_v12 = vpop.f32.mrf.mxu1 }
  0xc8   :  { %v128_v13 = vadd.f32 %v199_v11, %v174_v10  ;;  %v148_v14 = vadd.f32 %v205_v12, %v174_v10 }
  0xc9   :  { %v122_v15 = vpop.f32.mrf.mxu0  ;;  %v142_v16 = vpop.f32.mrf.mxu1 }
  0xca   :  { %163 = vst.msk [vmem:[%s309_s3 + $0x8] sm:$0xff] %vm161_vm1, %v128_v13  ;;  %167 = vst.msk [vmem:[%s309_s3 + $0x28] sm:$0xff] %vm161_vm1, %v148_v14  ;;  %v123_v17 = vadd.f32 %v174_v10, %v122_v15  ;;  %v143_v18 = vadd.f32 %v174_v10, %v142_v16 }
  0xcb   :  { %v202_v19 = vpop.f32.mrf.mxu0  ;;  %v208_v20 = vpop.f32.mrf.mxu1 }
  0xcc   :  { %162 = vst.msk [vmem:[%s309_s3] sm:$0xff] %vm161_vm1, %v123_v17  ;;  %166 = vst.msk [vmem:[%s309_s3 + $0x20] sm:$0xff] %vm161_vm1, %v143_v18  ;;  %v138_v21 = vadd.f32 %v202_v19, %v174_v10  ;;  %v158_v22 = vadd.f32 %v208_v20, %v174_v10 }
  0xcd   :  { %v132_v23 = vpop.f32.mrf.mxu0  ;;  %v152_v24 = vpop.f32.mrf.mxu1 }
  0xce   :  { %165 = vst.msk [vmem:[%s309_s3 + $0x18] sm:$0xff] %vm161_vm1, %v138_v21  ;;  %169 = vst.msk [vmem:[%s309_s3 + $0x38] sm:$0xff] %vm161_vm1, %v158_v22  ;;  %v133_v25 = vadd.f32 %v174_v10, %v132_v23  ;;  %v153_v26 = vadd.f32 %v174_v10, %v152_v24 }
  0xd0   :  { %164 = vst.msk [vmem:[%s309_s3 + $0x10] sm:$0xff] %vm161_vm1, %v133_v25  ;;  %168 = vst.msk [vmem:[%s309_s3 + $0x30] sm:$0xff] %vm161_vm1, %v153_v26 }

// kernel: reconstruction_forward.41
= control target key start
LH: loop header
LB: loop body
LE: loop exit
PB: predicated region body
PF: predicated region fallthrough
CT: control target
= control target key end

     0   :  { %vm29_vm0 = vcmask 261120   ;;  %vm163_vm1 = vcmask 523264   ;;  %s278_s1 = inlined_call_operand.vmem [shape: f32[32,64], index: 1, kind: input, shape index: {}]   ;;  %s279_s0 = inlined_call_operand.vmem [shape: f32[32,32], index: 0, kind: input, shape index: {}]   ;;  %s280_s2 = inlined_call_operand.vmem [shape: f32[1,64], index: 2, kind: input, shape index: {}]   ;;  %s281_s3 = inlined_call_operand.vmem [shape: f32[32,64], index: 3, kind: output, shape index: {}]  }
   0x1   :  { %v21_v0 = vld [vmem:[%s278_s1 + $0x18] sm:$0xff]  ;;  %v20_v1 = vld [vmem:[%s278_s1 + $0x10] sm:$0xff]  ;;  %v19_v2 = vld [vmem:[%s278_s1 + $0x8] sm:$0xff] }
   0x2   :  { %185 = vmatprep.subr.mxu0 %v21_v0  ;;  %199 = vmatprep.subr.mxu1 %v21_v0  ;;  %v18_v3 = vld [vmem:[%s278_s1] sm:$0xff]  ;;  %v16_v5 = vld [vmem:[%s279_s0 + $0x10] sm:$0xff]  ;;  %v15_v6 = vld [vmem:[%s279_s0 + $0x8] sm:$0xff] }
   0x3   :  { %186 = vmatpush3.msra.mxu0 %v21_v0  ;;  %203 = vmatpush3.msra.mxu1 %v21_v0  ;;  %v14_v4 = vld [vmem:[%s279_s0] sm:$0xff]  ;;  %v17_v7 = vld [vmem:[%s279_s0 + $0x18] sm:$0xff] }
   0x4   :  { %187 = vmatprep.subr.mxu0 %v20_v1  ;;  %200 = vmatprep.subr.mxu1 %v20_v1  ;;  %v172_v8 = vld [vmem:[%s280_s2] ss:$0 sm:$0xff] }
   0x5   :  { %188 = vmatpush3.msra.mxu0 %v20_v1  ;;  %204 = vmatpush3.msra.mxu1 %v20_v1 }
   0x6   :  { %189 = vmatprep.subr.mxu0 %v19_v2  ;;  %201 = vmatprep.subr.mxu1 %v19_v2 }
   0x7   :  { %190 = vmatpush3.msra.mxu0 %v19_v2  ;;  %205 = vmatpush3.msra.mxu1 %v19_v2 }
   0x8   :  { %191 = vmatprep.subr.mxu0 %v18_v3  ;;  %202 = vmatprep.subr.mxu1 %v18_v3 }
   0x9   :  { %192 = vmatpush3.msra.mxu0 %v18_v3  ;;  %206 = vmatpush3.msra.mxu1 %v18_v3 }
   0xa   :  { %193 = vmatprep.mubr.msk.f32.mxu0 %vm29_vm0, %v14_v4  ;;  %196 = vmatprep.mubr.msk.f32.mxu1 %vm29_vm0, %v16_v5 }
   0xb   :  { %194 = vmatmul.mubr.msk.f32.vlgmr.msra.gmra.mxu0 %vm29_vm0, %v15_v6  ;;  %197 = vmatmul.mubr.msk.f32.vlgmr.msra.gmra.mxu1 %vm29_vm0, %v17_v7 }
  0xcb   :  { %v195_v9 = vpop.f32.mrf.mxu0  ;;  %v198_v10 = vpop.f32.mrf.mxu1 }
  0xcc   :  { %v114_v11 = vadd.f32 %v195_v9, %v172_v8  ;;  %v124_v12 = vadd.f32 %v198_v10, %v172_v8 }
  0xcd   :  { %v108_v13 = vpop.f32.mrf.mxu0  ;;  %v118_v14 = vpop.f32.mrf.mxu1 }
  0xce   :  { %v132_v15 = vmul.f32 0.044715, %v114_v11  ;;  %v134_v16 = vmul.f32 0.044715, %v124_v12  ;;  %v109_v17 = vadd.f32 %v172_v8, %v108_v13  ;;  %v119_v18 = vadd.f32 %v172_v8, %v118_v14 }
  0xcf   :  { %v128_v39 = vmul.f32 0.5, %v114_v11  ;;  %v130_v41 = vmul.f32 0.5, %v124_v12 }
  0xd0   :  { %v136_v19 = vmul.f32 %v132_v15, %v114_v11  ;;  %v138_v20 = vmul.f32 %v134_v16, %v124_v12  ;;  %v131_v21 = vmul.f32 0.044715, %v109_v17  ;;  %v133_v22 = vmul.f32 0.044715, %v119_v18 }
  0xd1   :  { %v127_v47 = vmul.f32 0.5, %v109_v17  ;;  %v129_v49 = vmul.f32 0.5, %v119_v18 }
  0xd2   :  { %v140_v23 = vmul.f32 %v136_v19, %v114_v11  ;;  %v142_v24 = vmul.f32 %v138_v20, %v124_v12  ;;  %v135_v25 = vmul.f32 %v131_v21, %v109_v17  ;;  %v137_v26 = vmul.f32 %v133_v22, %v119_v18 }
  0xd4   :  { %v144_v27 = vadd.f32 %v140_v23, %v114_v11  ;;  %v146_v28 = vadd.f32 %v142_v24, %v124_v12  ;;  %v139_v29 = vmul.f32 %v135_v25, %v109_v17  ;;  %v141_v30 = vmul.f32 %v137_v26, %v119_v18 }
  0xd6   :  { %v148_v31 = vmul.f32 0.7978846, %v144_v27  ;;  %v150_v32 = vmul.f32 0.7978846, %v146_v28  ;;  %v143_v33 = vadd.f32 %v139_v29, %v109_v17  ;;  %v145_v34 = vadd.f32 %v141_v30, %v119_v18 }
  0xd8   :  { %207 = vtanh.f32 %v148_v31  ;;  %v147_v35 = vmul.f32 0.7978846, %v143_v33  ;;  %v149_v36 = vmul.f32 0.7978846, %v145_v34 }
  0xd9   :  { %209 = vtanh.f32 %v150_v32 }
  0xda   :  { %211 = vtanh.f32 %v147_v35 }
  0xdb   :  { %213 = vtanh.f32 %v149_v36 }
  0xe5   :  { %v208_v37 = vpop.eup %207 }
  0xe6   :  { %v210_v38 = vpop.eup %209  ;;  %v156_v40 = vadd.f32 1.0, %v208_v37 }
  0xe7   :  { %v158_v42 = vadd.f32 1.0, %v210_v38  ;;  %v212_v43 = vpop.eup %211 }
  0xe8   :  { %v160_v44 = vmul.f32 %v156_v40, %v128_v39  ;;  %v214_v45 = vpop.eup %213  ;;  %v155_v48 = vadd.f32 1.0, %v212_v43 }
  0xe9   :  { %v162_v46 = vmul.f32 %v158_v42, %v130_v41  ;;  %v157_v50 = vadd.f32 1.0, %v214_v45 }
  0xea   :  { %165 = vst.msk [vmem:[%s281_s3 + $0x8] sm:$0xff] %vm163_vm1, %v160_v44  ;;  %v159_v51 = vmul.f32 %v155_v48, %v127_v47 }
  0xeb   :  { %167 = vst.msk [vmem:[%s281_s3 + $0x18] sm:$0xff] %vm163_vm1, %v162_v46  ;;  %v161_v52 = vmul.f32 %v157_v50, %v129_v49 }
  0xec   :  { %164 = vst.msk [vmem:[%s281_s3] sm:$0xff] %vm163_vm1, %v159_v51 }
  0xed   :  { %166 = vst.msk [vmem:[%s281_s3 + $0x10] sm:$0xff] %vm163_vm1, %v161_v52 }

// kernel: reconstruction_forward.40
= control target key start
LH: loop header
LB: loop body
LE: loop exit
PB: predicated region body
PF: predicated region fallthrough
CT: control target
= control target key end

     0   :  { %vm42_vm0 = vcmask 261120   ;;  %vm188_vm1 = vcmask 130048   ;;  %s603_s1 = inlined_call_operand.vmem [shape: f32[32,16], index: 1, kind: input, shape index: {}]   ;;  %s604_s0 = inlined_call_operand.vmem [shape: f32[64,32], index: 0, kind: input, shape index: {}]   ;;  %s605_s2 = inlined_call_operand.vmem [shape: f32[1,16], index: 2, kind: input, shape index: {}]   ;;  %s606_s3 = inlined_call_operand.vmem [shape: f32[64,16], index: 3, kind: input, shape index: {}]   ;;  %s607_s4 = inlined_call_operand.vmem [shape: f32[1,16], index: 4, kind: input, shape index: {}]   ;;  %s608_s5 = inlined_call_operand.vmem [shape: f32[1,16], index: 5, kind: input, shape index: {}]   ;;  %s609_s6 = inlined_call_operand.vmem [shape: f32[64,16], index: 6, kind: output, shape index: {}]  }
   0x1   :  { %v34_v0 = vld [vmem:[%s603_s1 + $0x18] sm:$0xff]  ;;  %v33_v1 = vld [vmem:[%s603_s1 + $0x10] sm:$0xff]  ;;  %v32_v2 = vld [vmem:[%s603_s1 + $0x8] sm:$0xff] }
   0x2   :  { %359 = vmatprep.subr.mxu0 %v34_v0  ;;  %379 = vmatprep.subr.mxu1 %v34_v0  ;;  %v31_v3 = vld [vmem:[%s603_s1] sm:$0xff]  ;;  %v24_v6 = vld [vmem:[%s604_s0 + $0x8] sm:$0xff]  ;;  %v25_v8 = vld [vmem:[%s604_s0 + $0x10] sm:$0xff] }
   0x3   :  { %360 = vmatpush3.msra.mxu0 %v34_v0  ;;  %383 = vmatpush3.msra.mxu1 %v34_v0  ;;  %v23_v4 = vld [vmem:[%s604_s0] sm:$0xff]  ;;  %v28_v7 = vld [vmem:[%s604_s0 + $0x28] sm:$0xff]  ;;  %v29_v9 = vld [vmem:[%s604_s0 + $0x30] sm:$0xff] }
   0x4   :  { %361 = vmatprep.subr.mxu0 %v33_v1  ;;  %380 = vmatprep.subr.mxu1 %v33_v1  ;;  %v27_v5 = vld [vmem:[%s604_s0 + $0x20] sm:$0xff]  ;;  %v26_v10 = vld [vmem:[%s604_s0 + $0x18] sm:$0xff]  ;;  %v177_v15 = vld [vmem:[%s606_s3 + $0x28] sm:$0xff] }
   0x5   :  { %362 = vmatpush3.msra.mxu0 %v33_v1  ;;  %384 = vmatpush3.msra.mxu1 %v33_v1  ;;  %v30_v11 = vld [vmem:[%s604_s0 + $0x38] sm:$0xff]  ;;  %v336_v12 = vld [vmem:[%s605_s2] ss:$0 sm:$0xff]  ;;  %v173_v16 = vld [vmem:[%s606_s3 + $0x8] sm:$0xff] }
   0x6   :  { %363 = vmatprep.subr.mxu0 %v32_v2  ;;  %381 = vmatprep.subr.mxu1 %v32_v2  ;;  %v172_v24 = vld [vmem:[%s606_s3] sm:$0xff]  ;;  %v175_v27 = vld [vmem:[%s606_s3 + $0x18] sm:$0xff]  ;;  %v174_v35 = vld [vmem:[%s606_s3 + $0x10] sm:$0xff] }
   0x7   :  { %364 = vmatpush3.msra.mxu0 %v32_v2  ;;  %385 = vmatpush3.msra.mxu1 %v32_v2  ;;  %v176_v36 = vld [vmem:[%s606_s3 + $0x20] sm:$0xff]  ;;  %v179_v41 = vld [vmem:[%s606_s3 + $0x38] sm:$0xff]  ;;  %v178_v42 = vld [vmem:[%s606_s3 + $0x30] sm:$0xff] }
   0x8   :  { %365 = vmatprep.subr.mxu0 %v31_v3  ;;  %382 = vmatprep.subr.mxu1 %v31_v3 }
   0x9   :  { %366 = vmatpush3.msra.mxu0 %v31_v3  ;;  %386 = vmatpush3.msra.mxu1 %v31_v3 }
   0xa   :  { %367 = vmatprep.mubr.msk.f32.mxu0 %vm42_vm0, %v23_v4  ;;  %373 = vmatprep.mubr.msk.f32.mxu1 %vm42_vm0, %v27_v5 }
   0xb   :  { %368 = vmatmul.mubr.msk.f32.vlgmr.msra.gmra.mxu0 %vm42_vm0, %v24_v6  ;;  %374 = vmatmul.mubr.msk.f32.vlgmr.msra.gmra.mxu1 %vm42_vm0, %v28_v7 }
   0xc   :  { %370 = vmatprep.mubr.msk.f32.mxu0 %vm42_vm0, %v25_v8  ;;  %376 = vmatprep.mubr.msk.f32.mxu1 %vm42_vm0, %v29_v9 }
   0xf   :  { %371 = vmatmul.mubr.msk.f32.gmra.mxu0 %vm42_vm0, %v26_v10  ;;  %377 = vmatmul.mubr.msk.f32.gmra.mxu1 %vm42_vm0, %v30_v11 }
  0xcb   :  { %v369_v13 = vpop.f32.mrf.mxu0  ;;  %v375_v14 = vpop.f32.mrf.mxu1 }
  0xcc   :  { %v139_v17 = vadd.f32 %v369_v13, %v336_v12  ;;  %v159_v18 = vadd.f32 %v375_v14, %v336_v12 }
  0xcd   :  { %v133_v19 = vpop.f32.mrf.mxu0  ;;  %v153_v20 = vpop.f32.mrf.mxu1 }
  0xce   :  { %v134_v21 = vadd.f32 %v336_v12, %v133_v19  ;;  %v185_v22 = vadd.f32 %v177_v15, %v159_v18  ;;  %v181_v23 = vadd.f32 %v173_v16, %v139_v17  ;;  %v154_v29 = vadd.f32 %v336_v12, %v153_v20 }
  0xcf   :  { %v372_v25 = vpop.f32.mrf.mxu0  ;;  %v378_v26 = vpop.f32.mrf.mxu1 }
  0xd0   :  { %v149_v28 = vadd.f32 %v372_v25, %v336_v12  ;;  %v204_v30 = vsel %vm188_vm1, %v185_v22, 0.0  ;;  %v192_v31 = vsel %vm188_vm1, %v181_v23, 0.0  ;;  %v180_v33 = vadd.f32 %v172_v24, %v134_v21 }
  0xd1   :  { %205 = vadd.xlane.f32.xlu1 %v204_v30  ;;  %193 = vadd.xlane.f32.xlu0 %v192_v31  ;;  %v143_v32 = vpop.f32.mrf.mxu0  ;;  %v163_v34 = vpop.f32.mrf.mxu1  ;;  %v169_v38 = vadd.f32 %v378_v26, %v336_v12  ;;  %v184_v46 = vadd.f32 %v176_v36, %v154_v29 }
  0xd2   :  { %v144_v37 = vadd.f32 %v336_v12, %v143_v32  ;;  %v183_v39 = vadd.f32 %v175_v27, %v149_v28  ;;  %v164_v40 = vadd.f32 %v336_v12, %v163_v34  ;;  %v189_v44 = vsel %vm188_vm1, %v180_v33, 0.0 }
  0xd3   :  { %v187_v48 = vadd.f32 %v179_v41, %v169_v38  ;;  %v201_v50 = vsel %vm188_vm1, %v184_v46, 0.0 }
  0xd4   :  { %v198_v43 = vsel %vm188_vm1, %v183_v39, 0.0  ;;  %v182_v45 = vadd.f32 %v174_v35, %v144_v37  ;;  %v186_v49 = vadd.f32 %v178_v42, %v164_v40 }
  0xd5   :  { %199 = vadd.xlane.f32.xlu1 %v198_v43  ;;  %190 = vadd.xlane.f32.xlu0 %v189_v44  ;;  %v210_v51 = vsel %vm188_vm1, %v187_v48, 0.0 }
  0xd6   :  { %v195_v47 = vsel %vm188_vm1, %v182_v45, 0.0  ;;  %v207_v52 = vsel %vm188_vm1, %v186_v49, 0.0 }
  0xd9   :  { %196 = vadd.xlane.f32.xlu1 %v195_v47  ;;  %202 = vadd.xlane.f32.xlu0 %v201_v50 }
  0xdd   :  { %211 = vadd.xlane.f32.xlu1 %v210_v51  ;;  %208 = vadd.xlane.f32.xlu0 %v207_v52 }
 0x15a   :  { %v206_v53 = vpop.xlane.xlu1 %205  ;;  %v194_v54 = vpop.xlane.xlu0 %193 }
 0x15b   :  { %v219_v55 = vmul.f32 0.0625, %v206_v53  ;;  %v215_v56 = vmul.f32 0.0625, %v194_v54  ;;  %v345_v53 = vld [vmem:[%s607_s4] ss:$0 sm:$0xff] }
 0x15d   :  { %v517_v57 = vsub.f32 %v185_v22, %v219_v55  ;;  %v519_v58 = vsub.f32 %v181_v23, %v215_v56  ;;  %v346_v56 = vld [vmem:[%s608_s5] ss:$0 sm:$0xff] }
 0x15e   :  { %v200_v59 = vpop.xlane.xlu1 %199  ;;  %v191_v60 = vpop.xlane.xlu0 %190 }
 0x15f   :  { %v217_v61 = vmul.f32 0.0625, %v200_v59  ;;  %v214_v62 = vmul.f32 0.0625, %v191_v60  ;;  %v231_v63 = vmul.f32 %v519_v58, %v519_v58  ;;  %v235_v3 = vmul.f32 %v517_v57, %v517_v57 }
 0x161   :  { %v523_v0 = vsub.f32 %v183_v39, %v217_v61  ;;  %v525_v1 = vsub.f32 %v180_v33, %v214_v62  ;;  %v241_v2 = vsel %vm188_vm1, %v231_v63, 0.0  ;;  %v253_v12 = vsel %vm188_vm1, %v235_v3, 0.0 }
 0x162   :  { %242 = vadd.xlane.f32.xlu1 %v241_v2  ;;  %v197_v4 = vpop.xlane.xlu1 %196  ;;  %v203_v5 = vpop.xlane.xlu0 %202 }
 0x163   :  { %v216_v6 = vmul.f32 0.0625, %v197_v4  ;;  %v218_v7 = vmul.f32 0.0625, %v203_v5  ;;  %v230_v8 = vmul.f32 %v525_v1, %v525_v1  ;;  %v233_v9 = vmul.f32 %v523_v0, %v523_v0 }
 0x165   :  { %v534_v10 = vsub.f32 %v182_v45, %v216_v6  ;;  %v536_v11 = vsub.f32 %v184_v46, %v218_v7  ;;  %v238_v13 = vsel %vm188_vm1, %v230_v8, 0.0  ;;  %v247_v19 = vsel %vm188_vm1, %v233_v9, 0.0 }
 0x166   :  { %254 = vadd.xlane.f32.xlu1 %v253_v12  ;;  %v212_v14 = vpop.xlane.xlu1 %211  ;;  %239 = vadd.xlane.f32.xlu0 %v238_v13  ;;  %v209_v15 = vpop.xlane.xlu0 %208 }
 0x167   :  { %v221_v16 = vmul.f32 0.0625, %v212_v14  ;;  %v220_v17 = vmul.f32 0.0625, %v209_v15  ;;  %v234_v18 = vmul.f32 %v536_v11, %v536_v11  ;;  %v232_v23 = vmul.f32 %v534_v10, %v534_v10 }
 0x169   :  { %v543_v20 = vsub.f32 %v187_v48, %v221_v16  ;;  %v545_v21 = vsub.f32 %v186_v49, %v220_v17  ;;  %v250_v22 = vsel %vm188_vm1, %v234_v18, 0.0  ;;  %v244_v26 = vsel %vm188_vm1, %v232_v23, 0.0 }
 0x16a   :  { %248 = vadd.xlane.f32.xlu1 %v247_v19  ;;  %251 = vadd.xlane.f32.xlu0 %v250_v22 }
 0x16b   :  { %v237_v24 = vmul.f32 %v543_v20, %v543_v20  ;;  %v236_v27 = vmul.f32 %v545_v21, %v545_v21 }
 0x16d   :  { %v259_v25 = vsel %vm188_vm1, %v237_v24, 0.0  ;;  %v256_v28 = vsel %vm188_vm1, %v236_v27, 0.0 }
 0x16e   :  { %260 = vadd.xlane.f32.xlu1 %v259_v25  ;;  %245 = vadd.xlane.f32.xlu0 %v244_v26 }
 0x172   :  { %257 = vadd.xlane.f32.xlu0 %v256_v28 }
 0x1eb   :  { %v243_v29 = vpop.xlane.xlu1 %242 }
 0x1ec   :  { %v263_v30 = vmul.f32 0.0625, %v243_v29 }
 0x1ee   :  { %v271_v31 = vadd.f32 1e-05, %v263_v30 }
 0x1ef   :  { %v255_v32 = vpop.xlane.xlu1 %254  ;;  %v240_v33 = vpop.xlane.xlu0 %239 }
 0x1f0   :  { %387 = vrsqrt.f32 %v271_v31  ;;  %v267_v34 = vmul.f32 0.0625, %v255_v32  ;;  %v262_v35 = vmul.f32 0.0625, %v240_v33 }
 0x1f2   :  { %v275_v36 = vadd.f32 1e-05, %v267_v34  ;;  %v270_v37 = vadd.f32 1e-05, %v262_v35 }
 0x1f3   :  { %v249_v38 = vpop.xlane.xlu1 %248  ;;  %v252_v39 = vpop.xlane.xlu0 %251 }
 0x1f4   :  { %389 = vrsqrt.f32 %v275_v36  ;;  %v265_v40 = vmul.f32 0.0625, %v249_v38  ;;  %v266_v41 = vmul.f32 0.0625, %v252_v39 }
 0x1f5   :  { %391 = vrsqrt.f32 %v270_v37 }
 0x1f6   :  { %v273_v42 = vadd.f32 1e-05, %v265_v40  ;;  %v274_v43 = vadd.f32 1e-05, %v266_v41 }
 0x1f7   :  { %v261_v44 = vpop.xlane.xlu1 %260  ;;  %v246_v45 = vpop.xlane.xlu0 %245 }
 0x1f8   :  { %393 = vrsqrt.f32 %v273_v42  ;;  %v269_v46 = vmul.f32 0.0625, %v261_v44  ;;  %v264_v47 = vmul.f32 0.0625, %v246_v45 }
 0x1f9   :  { %395 = vrsqrt.f32 %v274_v43 }
 0x1fa   :  { %v277_v48 = vadd.f32 1e-05, %v269_v46  ;;  %v272_v49 = vadd.f32 1e-05, %v264_v47 }
 0x1fb   :  { %v258_v50 = vpop.xlane.xlu0 %257 }
 0x1fc   :  { %397 = vrsqrt.f32 %v277_v48  ;;  %v268_v51 = vmul.f32 0.0625, %v258_v50 }
 0x1fd   :  { %v388_v52 = vpop.eup %387  ;;  %399 = vrsqrt.f32 %v272_v49 }
 0x1fe   :  { %v287_v54 = vmul.f32 %v388_v52, %v519_v58  ;;  %v276_v55 = vadd.f32 1e-05, %v268_v51 }
 0x200   :  { %v302_v59 = vmul.f32 %v345_v53, %v287_v54  ;;  %401 = vrsqrt.f32 %v276_v55 }
 0x201   :  { %v390_v60 = vpop.eup %389 }
 0x202   :  { %v392_v61 = vpop.eup %391  ;;  %v317_v62 = vadd.f32 %v346_v56, %v302_v59  ;;  %v291_v63 = vmul.f32 %v390_v60, %v517_v57 }
 0x203   :  { %v286_v2 = vmul.f32 %v392_v61, %v525_v1 }
 0x204   :  { %325 = vst.msk [vmem:[%s609_s6 + $0x8] sm:$0xff] %vm188_vm1, %v317_v62  ;;  %v306_v58 = vmul.f32 %v345_v53, %v291_v63 }
 0x205   :  { %v394_v3 = vpop.eup %393  ;;  %v301_v4 = vmul.f32 %v345_v53, %v286_v2 }
 0x206   :  { %v396_v5 = vpop.eup %395  ;;  %v321_v6 = vadd.f32 %v346_v56, %v306_v58  ;;  %v289_v7 = vmul.f32 %v394_v3, %v523_v0 }
 0x207   :  { %v316_v8 = vadd.f32 %v346_v56, %v301_v4  ;;  %v290_v9 = vmul.f32 %v396_v5, %v536_v11 }
 0x208   :  { %329 = vst.msk [vmem:[%s609_s6 + $0x28] sm:$0xff] %vm188_vm1, %v321_v6  ;;  %v304_v57 = vmul.f32 %v345_v53, %v289_v7 }
 0x209   :  { %v398_v1 = vpop.eup %397  ;;  %324 = vst.msk [vmem:[%s609_s6] sm:$0xff] %vm188_vm1, %v316_v8  ;;  %v305_v12 = vmul.f32 %v345_v53, %v290_v9 }
 0x20a   :  { %v400_v13 = vpop.eup %399  ;;  %v319_v14 = vadd.f32 %v346_v56, %v304_v57  ;;  %v293_v0 = vmul.f32 %v398_v1, %v543_v20 }
 0x20b   :  { %v320_v15 = vadd.f32 %v346_v56, %v305_v12  ;;  %v288_v11 = vmul.f32 %v400_v13, %v534_v10 }
 0x20c   :  { %327 = vst.msk [vmem:[%s609_s6 + $0x18] sm:$0xff] %vm188_vm1, %v319_v14  ;;  %v308_v16 = vmul.f32 %v345_v53, %v293_v0 }
 0x20d   :  { %v402_v17 = vpop.eup %401  ;;  %328 = vst.msk [vmem:[%s609_s6 + $0x20] sm:$0xff] %vm188_vm1, %v320_v15  ;;  %v303_v18 = vmul.f32 %v345_v53, %v288_v11 }
 0x20e   :  { %v323_v19 = vadd.f32 %v346_v56, %v308_v16  ;;  %v292_v22 = vmul.f32 %v402_v17, %v545_v21 }
 0x20f   :  { %v318_v20 = vadd.f32 %v346_v56, %v303_v18 }
 0x210   :  { %331 = vst.msk [vmem:[%s609_s6 + $0x38] sm:$0xff] %vm188_vm1, %v323_v19  ;;  %v307_v10 = vmul.f32 %v345_v53, %v292_v22 }
 0x211   :  { %326 = vst.msk [vmem:[%s609_s6 + $0x10] sm:$0xff] %vm188_vm1, %v318_v20 }
 0x212   :  { %v322_v23 = vadd.f32 %v346_v56, %v307_v10 }
 0x214   :  { %330 = vst.msk [vmem:[%s609_s6 + $0x30] sm:$0xff] %vm188_vm1, %v322_v23 }

// kernel: reconstruction_forward.39
= control target key start
LH: loop header
LB: loop body
LE: loop exit
PB: predicated region body
PF: predicated region fallthrough
CT: control target
= control target key end

     0   :  { %vm62_vm0 = vcmask 130048   ;;  %vm499_vm1 = vcmask 261120   ;;  %s1804_s1 = inlined_call_operand.vmem [shape: f32[4,32,16], index: 1, kind: input, shape index: {}]   ;;  %s1805_s0 = inlined_call_operand.vmem [shape: f32[4,32,16], index: 0, kind: input, shape index: {}]   ;;  %s1806_s2 = inlined_call_operand.vmem [shape: f32[4,32,16], index: 2, kind: input, shape index: {}]   ;;  %s1807_s3 = inlined_call_operand.vmem [shape: f32[4,32,16], index: 3, kind: output, shape index: {}]  }
   0x1   :  { %v49_v0 = vld [vmem:[%s1804_s1 + $0x18] sm:$0xff]  ;;  %v48_v2 = vld [vmem:[%s1804_s1 + $0x10] sm:$0xff]  ;;  %v14_v4 = vld [vmem:[%s1805_s0] sm:$0xff] }
   0x2   :  { %v53_v1 = vld [vmem:[%s1804_s1 + $0x38] sm:$0xff]  ;;  %1212 = vmatprep.subr.msk.mxu0 %vm62_vm0, %v49_v0  ;;  %v52_v3 = vld [vmem:[%s1804_s1 + $0x30] sm:$0xff]  ;;  %v30_v5 = vmul.f32 0.25, %v14_v4  ;;  %v18_v6 = vld [vmem:[%s1805_s0 + $0x20] sm:$0xff] }
   0x3   :  { %1226 = vmatprep.subr.msk.mxu1 %vm62_vm0, %v53_v1  ;;  %1213 = vmatpush3.xpose.msk.msra.mxu0 %vm62_vm0, %v49_v0  ;;  %v47_v7 = vld [vmem:[%s1804_s1 + $0x8] sm:$0xff]  ;;  %v34_v9 = vmul.f32 0.25, %v18_v6  ;;  %v46_v10 = vld [vmem:[%s1804_s1] sm:$0xff]  ;;  %v61_v14 = vld [vmem:[%s1804_s1 + $0x78] sm:$0xff] }
   0x4   :  { %1227 = vmatpush3.xpose.msk.msra.mxu1 %vm62_vm0, %v53_v1  ;;  %1214 = vmatprep.subr.msk.mxu0 %vm62_vm0, %v48_v2  ;;  %v51_v8 = vld [vmem:[%s1804_s1 + $0x28] sm:$0xff]  ;;  %v50_v11 = vld [vmem:[%s1804_s1 + $0x20] sm:$0xff]  ;;  %v57_v15 = vld [vmem:[%s1804_s1 + $0x58] sm:$0xff] }
   0x5   :  { %1228 = vmatprep.subr.msk.mxu1 %vm62_vm0, %v52_v3  ;;  %1220 = vmatprep.mubr.msk.f32.mxu0 %vm62_vm0, %v30_v5  ;;  %v15_v12 = vld [vmem:[%s1805_s0 + $0x8] sm:$0xff]  ;;  %v20_v18 = vld [vmem:[%s1805_s0 + $0x30] sm:$0xff]  ;;  %v21_v20 = vld [vmem:[%s1805_s0 + $0x38] sm:$0xff] }
   0x6   :  { %1234 = vmatprep.mubr.msk.f32.mxu1 %vm62_vm0, %v34_v9  ;;  %v19_v13 = vld [vmem:[%s1805_s0 + $0x28] sm:$0xff]  ;;  %v31_v16 = vmul.f32 0.25, %v15_v12  ;;  %v16_v19 = vld [vmem:[%s1805_s0 + $0x10] sm:$0xff]  ;;  %v17_v21 = vld [vmem:[%s1805_s0 + $0x18] sm:$0xff]  ;;  %v36_v24 = vmul.f32 0.25, %v20_v18  ;;  %v37_v26 = vmul.f32 0.25, %v21_v20 }
   0x7   :  { %1215 = vmatpush3.xpose.msk.msra.mxu0 %vm62_vm0, %v48_v2  ;;  %v35_v17 = vmul.f32 0.25, %v19_v13  ;;  %v60_v22 = vld [vmem:[%s1804_s1 + $0x70] sm:$0xff]  ;;  %v32_v25 = vmul.f32 0.25, %v16_v19  ;;  %v33_v27 = vmul.f32 0.25, %v17_v21  ;;  %v26_v28 = vld [vmem:[%s1805_s0 + $0x60] sm:$0xff]  ;;  %v59_v30 = vld [vmem:[%s1804_s1 + $0x68] sm:$0xff] }
   0x8   :  { %1229 = vmatpush3.xpose.msk.msra.mxu1 %vm62_vm0, %v52_v3  ;;  %1216 = vmatprep.subr.msk.mxu0 %vm62_vm0, %v47_v7  ;;  %v56_v23 = vld [vmem:[%s1804_s1 + $0x50] sm:$0xff]  ;;  %v22_v29 = vld [vmem:[%s1805_s0 + $0x40] sm:$0xff]  ;;  %v55_v31 = vld [vmem:[%s1804_s1 + $0x48] sm:$0xff]  ;;  %v42_v32 = vmul.f32 0.25, %v26_v28 }
   0x9   :  { %1230 = vmatprep.subr.msk.mxu1 %vm62_vm0, %v51_v8  ;;  %v38_v33 = vmul.f32 0.25, %v22_v29  ;;  %v58_v34 = vld [vmem:[%s1804_s1 + $0x60] sm:$0xff]  ;;  %v27_v36 = vld [vmem:[%s1805_s0 + $0x68] sm:$0xff]  ;;  %v28_v38 = vld [vmem:[%s1805_s0 + $0x70] sm:$0xff] }
   0xa   :  { %v54_v35 = vld [vmem:[%s1804_s1 + $0x40] sm:$0xff]  ;;  %v23_v37 = vld [vmem:[%s1805_s0 + $0x48] sm:$0xff]  ;;  %v24_v39 = vld [vmem:[%s1805_s0 + $0x50] sm:$0xff]  ;;  %v43_v40 = vmul.f32 0.25, %v27_v36  ;;  %v44_v42 = vmul.f32 0.25, %v28_v38 }
   0xb   :  { %1217 = vmatpush3.xpose.msk.msra.mxu0 %vm62_vm0, %v47_v7  ;;  %v39_v41 = vmul.f32 0.25, %v23_v37  ;;  %v29_v43 = vld [vmem:[%s1805_s0 + $0x78] sm:$0xff]  ;;  %v40_v44 = vmul.f32 0.25, %v24_v39 }
   0xc   :  { %1231 = vmatpush3.xpose.msk.msra.mxu1 %vm62_vm0, %v51_v8  ;;  %1218 = vmatprep.subr.msk.mxu0 %vm62_vm0, %v46_v10  ;;  %v25_v45 = vld [vmem:[%s1805_s0 + $0x58] sm:$0xff]  ;;  %v45_v46 = vmul.f32 0.25, %v29_v43 }
   0xd   :  { %1232 = vmatprep.subr.msk.mxu1 %vm62_vm0, %v50_v11  ;;  %v41_v47 = vmul.f32 0.25, %v25_v45 }
   0xf   :  { %1219 = vmatpush3.xpose.msk.msra.mxu0 %vm62_vm0, %v46_v10 }
  0x10   :  { %1233 = vmatpush3.xpose.msk.msra.mxu1 %vm62_vm0, %v50_v11  ;;  %1240 = vmatprep.subr.msk.mxu0 %vm62_vm0, %v57_v15 }
  0x11   :  { %1254 = vmatprep.subr.msk.mxu1 %vm62_vm0, %v61_v14 }
  0x12   :  { %1221 = vmatmul.mubr.msk.f32.vlgmr.msra.gmra.mxu0 %vm62_vm0, %v31_v16 }
  0x13   :  { %1235 = vmatmul.mubr.msk.f32.vlgmr.msra.gmra.mxu1 %vm62_vm0, %v35_v17  ;;  %1241 = vmatpush3.xpose.msk.msra.mxu0 %vm62_vm0, %v57_v15 }
  0x14   :  { %1255 = vmatpush3.xpose.msk.msra.mxu1 %vm62_vm0, %v61_v14  ;;  %1242 = vmatprep.subr.msk.mxu0 %vm62_vm0, %v56_v23 }
  0x15   :  { %1256 = vmatprep.subr.msk.mxu1 %vm62_vm0, %v60_v22  ;;  %1237 = vmatprep.mubr.msk.f32.mxu1 %vm62_vm0, %v36_v24 }
  0x16   :  { %1223 = vmatprep.mubr.msk.f32.mxu0 %vm62_vm0, %v32_v25 }
  0x17   :  { %1238 = vmatmul.mubr.msk.f32.gmra.mxu1 %vm62_vm0, %v37_v26  ;;  %1224 = vmatmul.mubr.msk.f32.gmra.mxu0 %vm62_vm0, %v33_v27 }
  0x18   :  { %1257 = vmatpush3.xpose.msk.msra.mxu1 %vm62_vm0, %v60_v22  ;;  %1243 = vmatpush3.xpose.msk.msra.mxu0 %vm62_vm0, %v56_v23 }
  0x19   :  { %1258 = vmatprep.subr.msk.mxu1 %vm62_vm0, %v59_v30  ;;  %1244 = vmatprep.subr.msk.mxu0 %vm62_vm0, %v55_v31 }
  0x1a   :  { %1262 = vmatprep.mubr.msk.f32.mxu1 %vm62_vm0, %v42_v32  ;;  %1248 = vmatprep.mubr.msk.f32.mxu0 %vm62_vm0, %v38_v33 }
  0x1c   :  { %1259 = vmatpush3.xpose.msk.msra.mxu1 %vm62_vm0, %v59_v30  ;;  %1245 = vmatpush3.xpose.msk.msra.mxu0 %vm62_vm0, %v55_v31 }
  0x1d   :  { %1260 = vmatprep.subr.msk.mxu1 %vm62_vm0, %v58_v34  ;;  %1246 = vmatprep.subr.msk.mxu0 %vm62_vm0, %v54_v35 }
  0x20   :  { %1261 = vmatpush3.xpose.msk.msra.mxu1 %vm62_vm0, %v58_v34  ;;  %1247 = vmatpush3.xpose.msk.msra.mxu0 %vm62_vm0, %v54_v35 }
  0x23   :  { %1263 = vmatmul.mubr.msk.f32.vlgmr.msra.gmra.mxu1 %vm62_vm0, %v43_v40  ;;  %1249 = vmatmul.mubr.msk.f32.vlgmr.msra.gmra.mxu0 %vm62_vm0, %v39_v41 }
  0x24   :  { %1265 = vmatprep.mubr.msk.f32.mxu1 %vm62_vm0, %v44_v42  ;;  %1251 = vmatprep.mubr.msk.f32.mxu0 %vm62_vm0, %v40_v44 }
  0x27   :  { %1266 = vmatmul.mubr.msk.f32.gmra.mxu1 %vm62_vm0, %v45_v46  ;;  %1252 = vmatmul.mubr.msk.f32.gmra.mxu0 %vm62_vm0, %v41_v47 }
  0xd2   :  { %v1222_v48 = vpop.f32.mrf.mxu0 }
  0xd3   :  { %v1236_v49 = vpop.f32.mrf.mxu1  ;;  %v503_v50 = vsel %vm499_vm1, %v1222_v48, -inf }
  0xd4   :  { %504 = vmax.xlane.f32.xlu1 %v503_v50  ;;  %v153_v51 = vpop.f32.mrf.mxu0  ;;  %v515_v54 = vsel %vm499_vm1, %v1236_v49, -inf }
  0xd5   :  { %v262_v52 = vpop.f32.mrf.mxu1  ;;  %v500_v53 = vsel %vm499_vm1, %v153_v51, -inf }
  0xd6   :  { %501 = vmax.xlane.f32.xlu0 %v500_v53  ;;  %v512_v57 = vsel %vm499_vm1, %v262_v52, -inf }
  0xd7   :  { %v1239_v55 = vpop.f32.mrf.mxu1  ;;  %v1225_v56 = vpop.f32.mrf.mxu0 }
  0xd8   :  { %516 = vmax.xlane.f32.xlu1 %v515_v54  ;;  %v521_v58 = vsel %vm499_vm1, %v1239_v55, -inf  ;;  %v509_v60 = vsel %vm499_vm1, %v1225_v56, -inf }
  0xd9   :  { %v272_v59 = vpop.f32.mrf.mxu1  ;;  %v163_v62 = vpop.f32.mrf.mxu0 }
  0xda   :  { %513 = vmax.xlane.f32.xlu0 %v512_v57  ;;  %v518_v61 = vsel %vm499_vm1, %v272_v59, -inf  ;;  %v506_v63 = vsel %vm499_vm1, %v163_v62, -inf }
  0xdc   :  { %522 = vmax.xlane.f32.xlu1 %v521_v58 }
  0xde   :  { %510 = vmax.xlane.f32.xlu0 %v509_v60 }
  0xe0   :  { %519 = vmax.xlane.f32.xlu1 %v518_v61 }
  0xe2   :  { %507 = vmax.xlane.f32.xlu0 %v506_v63 }
  0xe3   :  { %v1264_v0 = vpop.f32.mrf.mxu1  ;;  %v1560_v1 = vpop.f32.mrf.mxu0 }
  0xe4   :  { %v539_v2 = vsel %vm499_vm1, %v1264_v0, -inf  ;;  %v527_v3 = vsel %vm499_vm1, %v1560_v1, -inf }
  0xe5   :  { %540 = vmax.xlane.f32.xlu1 %v539_v2  ;;  %v1565_v4 = vpop.f32.mrf.mxu1  ;;  %v1567_v5 = vpop.f32.mrf.mxu0 }
  0xe6   :  { %v536_v6 = vsel %vm499_vm1, %v1565_v4, -inf  ;;  %528 = vmax.xlane.f32.xlu0 %v527_v3  ;;  %v524_v11 = vsel %vm499_vm1, %v1567_v5, -inf }
  0xe7   :  { %v1571_v7 = vpop.f32.mrf.mxu1  ;;  %v1573_v8 = vpop.f32.mrf.mxu0 }
  0xe8   :  { %v545_v14 = vsel %vm499_vm1, %v1571_v7, -inf  ;;  %v533_v15 = vsel %vm499_vm1, %v1573_v8, -inf }
  0xe9   :  { %537 = vmax.xlane.f32.xlu1 %v536_v6  ;;  %v1575_v9 = vpop.f32.mrf.mxu1  ;;  %v1577_v10 = vpop.f32.mrf.mxu0 }
  0xea   :  { %v542_v12 = vsel %vm499_vm1, %v1575_v9, -inf  ;;  %525 = vmax.xlane.f32.xlu0 %v524_v11  ;;  %v530_v13 = vsel %vm499_vm1, %v1577_v10, -inf }
  0xed   :  { %543 = vmax.xlane.f32.xlu1 %v542_v12 }
  0xee   :  { %531 = vmax.xlane.f32.xlu0 %v530_v13 }
  0xf1   :  { %546 = vmax.xlane.f32.xlu1 %v545_v14 }
  0xf2   :  { %534 = vmax.xlane.f32.xlu0 %v533_v15 }
 0x15d   :  { %v505_v16 = vpop.xlane.xlu1 %504 }
 0x15e   :  { %v549_v17 = vsub.f32 %v1222_v48, %v505_v16 }
 0x15f   :  { %v502_v18 = vpop.xlane.xlu0 %501 }
 0x160   :  { %v566_v19 = vmul.f32 1.442695, %v549_v17  ;;  %v548_v20 = vsub.f32 %v153_v51, %v502_v18 }
 0x161   :  { %v517_v21 = vpop.xlane.xlu1 %516 }
 0x162   :  { %1324 = vpow2.f32 %v566_v19  ;;  %v564_v22 = vmul.f32 1.442695, %v548_v20  ;;  %v553_v23 = vsub.f32 %v1236_v49, %v517_v21 }
 0x163   :  { %v514_v24 = vpop.xlane.xlu0 %513 }
 0x164   :  { %1326 = vpow2.f32 %v564_v22  ;;  %v574_v25 = vmul.f32 1.442695, %v553_v23  ;;  %v552_v26 = vsub.f32 %v262_v52, %v514_v24 }
 0x165   :  { %v523_v27 = vpop.xlane.xlu1 %522 }
 0x166   :  { %1328 = vpow2.f32 %v574_v25  ;;  %v572_v28 = vmul.f32 1.442695, %v552_v26  ;;  %v555_v29 = vsub.f32 %v1239_v55, %v523_v27  ;;  %v679_v25 = vld [vmem:[%s1806_s2 + $0x18] sm:$0xff] }
 0x167   :  { %v511_v30 = vpop.xlane.xlu0 %510  ;;  %1268 = vmatprep.subr.mxu0 %v679_v25 }
 0x168   :  { %1330 = vpow2.f32 %v572_v28  ;;  %v578_v31 = vmul.f32 1.442695, %v555_v29  ;;  %v551_v32 = vsub.f32 %v1225_v56, %v511_v30  ;;  %1269 = vmatpush3.msra.mxu0 %v679_v25  ;;  %v678_v28 = vld [vmem:[%s1806_s2 + $0x10] sm:$0xff] }
 0x169   :  { %v520_v33 = vpop.xlane.xlu1 %519  ;;  %1270 = vmatprep.subr.mxu0 %v678_v28 }
 0x16a   :  { %v570_v34 = vmul.f32 1.442695, %v551_v32  ;;  %v554_v35 = vsub.f32 %v272_v59, %v520_v33  ;;  %1332 = vpow2.f32 %v578_v31  ;;  %1271 = vmatpush3.msra.mxu0 %v678_v28  ;;  %v677_v31 = vld [vmem:[%s1806_s2 + $0x8] sm:$0xff]  ;;  %v683_v32 = vld [vmem:[%s1806_s2 + $0x38] sm:$0xff] }
 0x16b   :  { %v508_v36 = vpop.xlane.xlu0 %507  ;;  %1272 = vmatprep.subr.mxu0 %v677_v31  ;;  %1282 = vmatprep.subr.mxu1 %v683_v32 }
 0x16c   :  { %1334 = vpow2.f32 %v570_v34  ;;  %v576_v37 = vmul.f32 1.442695, %v554_v35  ;;  %v550_v38 = vsub.f32 %v163_v62, %v508_v36  ;;  %1273 = vmatpush3.msra.mxu0 %v677_v31  ;;  %v676_v35 = vld [vmem:[%s1806_s2] sm:$0xff]  ;;  %v682_v36 = vld [vmem:[%s1806_s2 + $0x30] sm:$0xff]  ;;  %1283 = vmatpush3.msra.mxu1 %v683_v32 }
 0x16d   :  { %1274 = vmatprep.subr.mxu0 %v676_v35  ;;  %1284 = vmatprep.subr.mxu1 %v682_v36 }
 0x16e   :  { %v541_v39 = vpop.xlane.xlu1 %540  ;;  %v568_v40 = vmul.f32 1.442695, %v550_v38  ;;  %1336 = vpow2.f32 %v576_v37  ;;  %v681_v38 = vld [vmem:[%s1806_s2 + $0x28] sm:$0xff]  ;;  %1275 = vmatpush3.msra.mxu0 %v676_v35  ;;  %1285 = vmatpush3.msra.mxu1 %v682_v36 }
 0x16f   :  { %v561_v41 = vsub.f32 %v1264_v0, %v541_v39  ;;  %v1589_v42 = vpop.eup %1324  ;;  %v529_v43 = vpop.xlane.xlu0 %528  ;;  %v680_v39 = vld [vmem:[%s1806_s2 + $0x20] sm:$0xff]  ;;  %1286 = vmatprep.subr.mxu1 %v681_v38 }
 0x170   :  { %1338 = vpow2.f32 %v568_v40  ;;  %v557_v45 = vsub.f32 %v1560_v1, %v529_v43  ;;  %v599_v46 = vsel %vm499_vm1, %v1589_v42, 0.0  ;;  %1287 = vmatpush3.msra.mxu1 %v681_v38  ;;  %v687_v40 = vld [vmem:[%s1806_s2 + $0x58] sm:$0xff] }
 0x171   :  { %v590_v44 = vmul.f32 1.442695, %v561_v41  ;;  %v1594_v47 = vpop.eup %1326  ;;  %600 = vadd.xlane.f32.xlu0 %v599_v46  ;;  %1288 = vmatprep.subr.mxu1 %v680_v39  ;;  %v691_v41 = vld [vmem:[%s1806_s2 + $0x78] sm:$0xff] }
 0x172   :  { %v538_v48 = vpop.xlane.xlu1 %537  ;;  %v582_v49 = vmul.f32 1.442695, %v557_v45  ;;  %v596_v53 = vsel %vm499_vm1, %v1594_v47, 0.0  ;;  %1289 = vmatpush3.msra.mxu1 %v680_v39  ;;  %1296 = vmatprep.subr.mxu0 %v687_v40 }
 0x173   :  { %v560_v50 = vsub.f32 %v1565_v4, %v538_v48  ;;  %v1597_v51 = vpop.eup %1328  ;;  %1340 = vpow2.f32 %v590_v44  ;;  %v526_v52 = vpop.xlane.xlu0 %525  ;;  %1310 = vmatprep.subr.mxu1 %v691_v41 }
 0x174   :  { %1342 = vpow2.f32 %v582_v49  ;;  %v556_v55 = vsub.f32 %v1567_v5, %v526_v52  ;;  %v611_v56 = vsel %vm499_vm1, %v1597_v51, 0.0 }
 0x175   :  { %v588_v54 = vmul.f32 1.442695, %v560_v50  ;;  %v1604_v57 = vpop.eup %1330  ;;  %612 = vadd.xlane.f32.xlu1 %v611_v56  ;;  %597 = vadd.xlane.f32.xlu0 %v596_v53 }
 0x176   :  { %v544_v58 = vpop.xlane.xlu1 %543  ;;  %v580_v59 = vmul.f32 1.442695, %v556_v55  ;;  %v608_v1 = vsel %vm499_vm1, %v1604_v57, 0.0 }
 0x177   :  { %v562_v60 = vsub.f32 %v1575_v9, %v544_v58  ;;  %1344 = vpow2.f32 %v588_v54  ;;  %v532_v61 = vpop.xlane.xlu0 %531  ;;  %v1607_v62 = vpop.eup %1332 }
 0x178   :  { %1346 = vpow2.f32 %v580_v59  ;;  %v558_v0 = vsub.f32 %v1577_v10, %v532_v61  ;;  %v617_v13 = vsel %vm499_vm1, %v1607_v62, 0.0 }
 0x179   :  { %v592_v63 = vmul.f32 1.442695, %v562_v60  ;;  %v1612_v2 = vpop.eup %1334  ;;  %609 = vadd.xlane.f32.xlu1 %v608_v1 }
 0x17a   :  { %v547_v3 = vpop.xlane.xlu1 %546  ;;  %v584_v4 = vmul.f32 1.442695, %v558_v0  ;;  %v605_v6 = vsel %vm499_vm1, %v1612_v2, 0.0  ;;  %v686_v0 = vld [vmem:[%s1806_s2 + $0x50] sm:$0xff] }
 0x17b   :  { %v563_v5 = vsub.f32 %v1571_v7, %v547_v3  ;;  %1348 = vpow2.f32 %v592_v63  ;;  %606 = vadd.xlane.f32.xlu0 %v605_v6  ;;  %v535_v9 = vpop.xlane.xlu0 %534  ;;  %v1617_v11 = vpop.eup %1336  ;;  %v689_v6 = vld [vmem:[%s1806_s2 + $0x68] sm:$0xff] }
 0x17c   :  { %1350 = vpow2.f32 %v584_v4  ;;  %v559_v12 = vsub.f32 %v1573_v8, %v535_v9  ;;  %v614_v17 = vsel %vm499_vm1, %v1617_v11, 0.0  ;;  %v690_v4 = vld [vmem:[%s1806_s2 + $0x70] sm:$0xff] }
 0x17d   :  { %v594_v10 = vmul.f32 1.442695, %v563_v5  ;;  %v1622_v14 = vpop.eup %1338  ;;  %618 = vadd.xlane.f32.xlu1 %v617_v13 }
 0x17e   :  { %v586_v15 = vmul.f32 1.442695, %v559_v12  ;;  %v602_v7 = vsel %vm499_vm1, %v1622_v14, 0.0 }
 0x17f   :  { %1352 = vpow2.f32 %v594_v10  ;;  %603 = vadd.xlane.f32.xlu0 %v602_v7 }
 0x180   :  { %v1626_v16 = vpop.eup %1340  ;;  %1354 = vpow2.f32 %v586_v15  ;;  %v688_v15 = vld [vmem:[%s1806_s2 + $0x60] sm:$0xff] }
 0x181   :  { %v1630_v18 = vpop.eup %1342  ;;  %615 = vadd.xlane.f32.xlu1 %v614_v17  ;;  %v635_v20 = vsel %vm499_vm1, %v1626_v16, 0.0 }
 0x182   :  { %v623_v8 = vsel %vm499_vm1, %v1630_v18, 0.0 }
 0x183   :  { %624 = vadd.xlane.f32.xlu0 %v623_v8 }
 0x184   :  { %v1634_v19 = vpop.eup %1344 }
 0x185   :  { %v1638_v21 = vpop.eup %1346  ;;  %636 = vadd.xlane.f32.xlu1 %v635_v20  ;;  %v632_v24 = vsel %vm499_vm1, %v1634_v19, 0.0 }
 0x186   :  { %v620_v22 = vsel %vm499_vm1, %v1638_v21, 0.0 }
 0x187   :  { %621 = vadd.xlane.f32.xlu0 %v620_v22 }
 0x188   :  { %v1642_v23 = vpop.eup %1348 }
 0x189   :  { %v1649_v26 = vpop.eup %1350  ;;  %633 = vadd.xlane.f32.xlu1 %v632_v24  ;;  %v638_v30 = vsel %vm499_vm1, %v1642_v23, 0.0 }
 0x18a   :  { %v626_v27 = vsel %vm499_vm1, %v1649_v26, 0.0 }
 0x18b   :  { %627 = vadd.xlane.f32.xlu0 %v626_v27 }
 0x18c   :  { %v1656_v29 = vpop.eup %1352 }
 0x18d   :  { %v1666_v33 = vpop.eup %1354  ;;  %639 = vadd.xlane.f32.xlu1 %v638_v30  ;;  %v641_v37 = vsel %vm499_vm1, %v1656_v29, 0.0 }
 0x18e   :  { %v629_v34 = vsel %vm499_vm1, %v1666_v33, 0.0 }
 0x18f   :  { %630 = vadd.xlane.f32.xlu0 %v629_v34 }
 0x191   :  { %642 = vadd.xlane.f32.xlu1 %v641_v37 }
 0x1fa   :  { %v601_v43 = vpop.xlane.xlu0 %600 }
 0x1fb   :  { %1356 = vrcp.f32 %v601_v43 }
 0x1fe   :  { %v613_v44 = vpop.xlane.xlu1 %612  ;;  %v598_v45 = vpop.xlane.xlu0 %597 }
 0x1ff   :  { %1358 = vrcp.f32 %v598_v45 }
 0x200   :  { %1360 = vrcp.f32 %v613_v44 }
 0x202   :  { %v610_v46 = vpop.xlane.xlu1 %609 }
 0x203   :  { %1362 = vrcp.f32 %v610_v46 }
 0x204   :  { %v607_v48 = vpop.xlane.xlu0 %606 }
 0x205   :  { %1364 = vrcp.f32 %v607_v48 }
 0x206   :  { %v619_v49 = vpop.xlane.xlu1 %618 }
 0x208   :  { %v604_v50 = vpop.xlane.xlu0 %603  ;;  %v1357_v53 = vpop.eup %1356 }
 0x209   :  { %1366 = vrcp.f32 %v604_v50  ;;  %v661_v60 = vmul.f32 %v1357_v53, %v1589_v42  ;;  %v685_v42 = vld [vmem:[%s1806_s2 + $0x48] sm:$0xff] }
 0x20a   :  { %1368 = vrcp.f32 %v619_v49  ;;  %v616_v52 = vpop.xlane.xlu1 %615 }
 0x20b   :  { %1370 = vrcp.f32 %v616_v52 }
 0x20c   :  { %v625_v54 = vpop.xlane.xlu0 %624  ;;  %v1359_v55 = vpop.eup %1358 }
 0x20d   :  { %v660_v58 = vmul.f32 %v1359_v55, %v1594_v47  ;;  %v1361_v59 = vpop.eup %1360  ;;  %1372 = vrcp.f32 %v625_v54 }
 0x20e   :  { %v637_v56 = vpop.xlane.xlu1 %636  ;;  %v665_v3 = vmul.f32 %v1361_v59, %v1597_v51  ;;  %v684_v51 = vld [vmem:[%s1806_s2 + $0x40] sm:$0xff] }
 0x20f   :  { %1276 = vmatprep.mubr.msk.f32.mxu0 %vm499_vm1, %v660_v58 }
 0x210   :  { %v1363_v61 = vpop.eup %1362  ;;  %v622_v63 = vpop.xlane.xlu0 %621  ;;  %1277 = vmatmul.mubr.msk.f32.vlgmr.msra.gmra.mxu0 %vm499_vm1, %v661_v60 }
 0x211   :  { %1374 = vrcp.f32 %v622_v63  ;;  %v664_v1 = vmul.f32 %v1363_v61, %v1604_v57  ;;  %1297 = vmatpush3.msra.mxu0 %v687_v40 }
 0x212   :  { %1376 = vrcp.f32 %v637_v56  ;;  %v634_v47 = vpop.xlane.xlu1 %633  ;;  %1298 = vmatprep.subr.mxu0 %v686_v0  ;;  %v1365_v5 = vpop.eup %1364 }
 0x213   :  { %1378 = vrcp.f32 %v634_v47  ;;  %1290 = vmatprep.mubr.msk.f32.mxu1 %vm499_vm1, %v664_v1  ;;  %1299 = vmatpush3.msra.mxu0 %v686_v0  ;;  %v663_v8 = vmul.f32 %v1365_v5, %v1612_v2 }
 0x214   :  { %1291 = vmatmul.mubr.msk.f32.vlgmr.msra.gmra.mxu1 %vm499_vm1, %v665_v3  ;;  %v628_v57 = vpop.xlane.xlu0 %627  ;;  %1300 = vmatprep.subr.mxu0 %v685_v42 }
 0x215   :  { %1380 = vrcp.f32 %v628_v57  ;;  %1311 = vmatpush3.msra.mxu1 %v691_v41  ;;  %1301 = vmatpush3.msra.mxu0 %v685_v42 }
 0x216   :  { %v1367_v9 = vpop.eup %1366  ;;  %v640_v10 = vpop.xlane.xlu1 %639  ;;  %1312 = vmatprep.subr.mxu1 %v690_v4  ;;  %1302 = vmatprep.subr.mxu0 %v684_v51 }
 0x217   :  { %v1369_v12 = vpop.eup %1368  ;;  %1382 = vrcp.f32 %v640_v10  ;;  %v662_v13 = vmul.f32 %v1367_v9, %v1622_v14  ;;  %1313 = vmatpush3.msra.mxu1 %v690_v4  ;;  %1303 = vmatpush3.msra.mxu0 %v684_v51 }
 0x218   :  { %v1371_v7 = vpop.eup %1370  ;;  %v631_v17 = vpop.xlane.xlu0 %630  ;;  %1314 = vmatprep.subr.mxu1 %v689_v6  ;;  %v667_v14 = vmul.f32 %v1369_v12, %v1607_v62 }
 0x219   :  { %1384 = vrcp.f32 %v631_v17  ;;  %1279 = vmatprep.mubr.msk.f32.mxu0 %vm499_vm1, %v662_v13  ;;  %v666_v20 = vmul.f32 %v1371_v7, %v1617_v11  ;;  %1315 = vmatpush3.msra.mxu1 %v689_v6 }
 0x21a   :  { %v643_v22 = vpop.xlane.xlu1 %642  ;;  %1280 = vmatmul.mubr.msk.f32.gmra.mxu0 %vm499_vm1, %v663_v8  ;;  %1316 = vmatprep.subr.mxu1 %v688_v15  ;;  %v1373_v2 = vpop.eup %1372 }
 0x21b   :  { %1386 = vrcp.f32 %v643_v22  ;;  %1293 = vmatprep.mubr.msk.f32.mxu1 %vm499_vm1, %v666_v20  ;;  %1317 = vmatpush3.msra.mxu1 %v688_v15  ;;  %v669_v11 = vmul.f32 %v1373_v2, %v1630_v18 }
 0x21c   :  { %1294 = vmatmul.mubr.msk.f32.gmra.mxu1 %vm499_vm1, %v667_v14 }
 0x21e   :  { %v1375_v24 = vpop.eup %1374 }
 0x21f   :  { %v1377_v25 = vpop.eup %1376  ;;  %v668_v27 = vmul.f32 %v1375_v24, %v1638_v21 }
 0x220   :  { %v1379_v28 = vpop.eup %1378  ;;  %v673_v31 = vmul.f32 %v1377_v25, %v1626_v16 }
 0x221   :  { %1304 = vmatprep.mubr.msk.f32.mxu0 %vm499_vm1, %v668_v27  ;;  %v672_v30 = vmul.f32 %v1379_v28, %v1634_v19 }
 0x222   :  { %v1381_v62 = vpop.eup %1380  ;;  %1305 = vmatmul.mubr.msk.f32.vlgmr.msra.gmra.mxu0 %vm499_vm1, %v669_v11 }
 0x223   :  { %1318 = vmatprep.mubr.msk.f32.mxu1 %vm499_vm1, %v672_v30  ;;  %v670_v32 = vmul.f32 %v1381_v62, %v1649_v26 }
 0x224   :  { %v1383_v34 = vpop.eup %1382  ;;  %1319 = vmatmul.mubr.msk.f32.vlgmr.msra.gmra.mxu1 %vm499_vm1, %v673_v31 }
 0x225   :  { %1307 = vmatprep.mubr.msk.f32.mxu0 %vm499_vm1, %v670_v32  ;;  %v674_v18 = vmul.f32 %v1383_v34, %v1642_v23 }
 0x226   :  { %v1385_v21 = vpop.eup %1384 }
 0x227   :  { %1321 = vmatprep.mubr.msk.f32.mxu1 %vm499_vm1, %v674_v18  ;;  %v671_v19 = vmul.f32 %v1385_v21, %v1666_v33 }
 0x228   :  { %v1387_v35 = vpop.eup %1386 }
 0x229   :  { %1308 = vmatmul.mubr.msk.f32.gmra.mxu0 %vm499_vm1, %v671_v19  ;;  %v675_v16 = vmul.f32 %v1387_v35, %v1656_v29 }
 0x22b   :  { %1322 = vmatmul.mubr.msk.f32.gmra.mxu1 %vm499_vm1, %v675_v16 }
 0x2d0   :  { %v1278_v26 = vpop.f32.mrf.mxu0 }
 0x2d1   :  { %1081 = vst.msk [vmem:[%s1807_s3 + $0x8] sm:$0xff] %vm62_vm0, %v1278_v26 }
 0x2d2   :  { %v770_v36 = vpop.f32.mrf.mxu0 }
 0x2d3   :  { %1080 = vst.msk [vmem:[%s1807_s3] sm:$0xff] %vm62_vm0, %v770_v36 }
 0x2d4   :  { %v1292_v23 = vpop.f32.mrf.mxu1 }
 0x2d5   :  { %1085 = vst.msk [vmem:[%s1807_s3 + $0x28] sm:$0xff] %vm62_vm0, %v1292_v23 }
 0x2d6   :  { %v867_v29 = vpop.f32.mrf.mxu1 }
 0x2d7   :  { %1084 = vst.msk [vmem:[%s1807_s3 + $0x20] sm:$0xff] %vm62_vm0, %v867_v29 }
 0x2da   :  { %v1281_v33 = vpop.f32.mrf.mxu0 }
 0x2db   :  { %1083 = vst.msk [vmem:[%s1807_s3 + $0x18] sm:$0xff] %vm62_vm0, %v1281_v33 }
 0x2dc   :  { %v780_v37 = vpop.f32.mrf.mxu0  ;;  %v1295_v38 = vpop.f32.mrf.mxu1 }
 0x2dd   :  { %1082 = vst.msk [vmem:[%s1807_s3 + $0x10] sm:$0xff] %vm62_vm0, %v780_v37  ;;  %1087 = vst.msk [vmem:[%s1807_s3 + $0x38] sm:$0xff] %vm62_vm0, %v1295_v38 }
 0x2de   :  { %v877_v39 = vpop.f32.mrf.mxu1 }
 0x2df   :  { %1086 = vst.msk [vmem:[%s1807_s3 + $0x30] sm:$0xff] %vm62_vm0, %v877_v39 }
 0x2e2   :  { %v1306_v40 = vpop.f32.mrf.mxu0 }
 0x2e3   :  { %1089 = vst.msk [vmem:[%s1807_s3 + $0x48] sm:$0xff] %vm62_vm0, %v1306_v40 }
 0x2e4   :  { %v964_v41 = vpop.f32.mrf.mxu0  ;;  %v1320_v43 = vpop.f32.mrf.mxu1 }
 0x2e5   :  { %1088 = vst.msk [vmem:[%s1807_s3 + $0x40] sm:$0xff] %vm62_vm0, %v964_v41  ;;  %1093 = vst.msk [vmem:[%s1807_s3 + $0x68] sm:$0xff] %vm62_vm0, %v1320_v43 }
 0x2e6   :  { %v1061_v44 = vpop.f32.mrf.mxu1 }
 0x2e7   :  { %1092 = vst.msk [vmem:[%s1807_s3 + $0x60] sm:$0xff] %vm62_vm0, %v1061_v44 }
 0x2e9   :  { %v1309_v45 = vpop.f32.mrf.mxu0 }
 0x2ea   :  { %1091 = vst.msk [vmem:[%s1807_s3 + $0x58] sm:$0xff] %vm62_vm0, %v1309_v45 }
 0x2eb   :  { %v974_v46 = vpop.f32.mrf.mxu0  ;;  %v1323_v48 = vpop.f32.mrf.mxu1 }
 0x2ec   :  { %1090 = vst.msk [vmem:[%s1807_s3 + $0x50] sm:$0xff] %vm62_vm0, %v974_v46  ;;  %1095 = vst.msk [vmem:[%s1807_s3 + $0x78] sm:$0xff] %vm62_vm0, %v1323_v48 }
 0x2ed   :  { %v1071_v49 = vpop.f32.mrf.mxu1 }
 0x2ee   :  { %1094 = vst.msk [vmem:[%s1807_s3 + $0x70] sm:$0xff] %vm62_vm0, %v1071_v49 }

// kernel: reconstruction_forward.42
= control target key start
LH: loop header
LB: loop body
LE: loop exit
PB: predicated region body
PF: predicated region fallthrough
CT: control target
= control target key end

     0   :  { %vm42_vm0 = vcmask 523264   ;;  %vm148_vm1 = vcmask 261120   ;;  %s413_s1 = inlined_call_operand.vmem [shape: f32[64,32], index: 1, kind: input, shape index: {}]   ;;  %s414_s0 = inlined_call_operand.vmem [shape: f32[32,64], index: 0, kind: input, shape index: {}]   ;;  %s415_s2 = inlined_call_operand.vmem [shape: f32[1,32], index: 2, kind: input, shape index: {}]   ;;  %s416_s3 = inlined_call_operand.vmem [shape: f32[32,32], index: 3, kind: input, shape index: {}]   ;;  %s417_s4 = inlined_call_operand.vmem [shape: f32[1,32], index: 4, kind: input, shape index: {}]   ;;  %s418_s5 = inlined_call_operand.vmem [shape: f32[1,32], index: 5, kind: input, shape index: {}]   ;;  %s419_s6 = inlined_call_operand.vmem [shape: f32[32,32], index: 6, kind: output, shape index: {}]  }
   0x1   :  { %v34_v0 = vld [vmem:[%s413_s1 + $0x38] sm:$0xff]  ;;  %v33_v1 = vld [vmem:[%s413_s1 + $0x30] sm:$0xff]  ;;  %v32_v2 = vld [vmem:[%s413_s1 + $0x28] sm:$0xff] }
   0x2   :  { %251 = vmatprep.subr.mxu0 %v34_v0  ;;  %273 = vmatprep.subr.mxu1 %v34_v0  ;;  %v31_v3 = vld [vmem:[%s413_s1 + $0x20] sm:$0xff]  ;;  %v30_v4 = vld [vmem:[%s413_s1 + $0x18] sm:$0xff]  ;;  %v29_v5 = vld [vmem:[%s413_s1 + $0x10] sm:$0xff] }
   0x3   :  { %252 = vmatpush3.msra.mxu0 %v34_v0  ;;  %281 = vmatpush3.msra.mxu1 %v34_v0  ;;  %v28_v6 = vld [vmem:[%s413_s1 + $0x8] sm:$0xff]  ;;  %v27_v7 = vld [vmem:[%s413_s1] sm:$0xff]  ;;  %v25_v9 = vld [vmem:[%s414_s0 + $0x10] sm:$0xff] }
   0x4   :  { %253 = vmatprep.subr.mxu0 %v33_v1  ;;  %274 = vmatprep.subr.mxu1 %v33_v1  ;;  %v23_v8 = vld [vmem:[%s414_s0] sm:$0xff]  ;;  %v24_v10 = vld [vmem:[%s414_s0 + $0x8] sm:$0xff]  ;;  %v26_v11 = vld [vmem:[%s414_s0 + $0x18] sm:$0xff] }
   0x5   :  { %254 = vmatpush3.msra.mxu0 %v33_v1  ;;  %282 = vmatpush3.msra.mxu1 %v33_v1  ;;  %v232_v13 = vld [vmem:[%s415_s2] ss:$0 sm:$0xff]  ;;  %v142_v17 = vld [vmem:[%s416_s3 + $0x10] sm:$0xff]  ;;  %v143_v23 = vld [vmem:[%s416_s3 + $0x18] sm:$0xff] }
   0x6   :  { %255 = vmatprep.subr.mxu0 %v32_v2  ;;  %275 = vmatprep.subr.mxu1 %v32_v2  ;;  %v140_v18 = vld [vmem:[%s416_s3] sm:$0xff]  ;;  %v141_v24 = vld [vmem:[%s416_s3 + $0x8] sm:$0xff] }
   0x7   :  { %256 = vmatpush3.msra.mxu0 %v32_v2  ;;  %283 = vmatpush3.msra.mxu1 %v32_v2  ;;  %v237_v2 = vld [vmem:[%s417_s4] ss:$0 sm:$0xff] }
   0x8   :  { %257 = vmatprep.subr.mxu0 %v31_v3  ;;  %276 = vmatprep.subr.mxu1 %v31_v3 }
   0x9   :  { %258 = vmatpush3.msra.mxu0 %v31_v3  ;;  %284 = vmatpush3.msra.mxu1 %v31_v3 }
   0xa   :  { %259 = vmatprep.subr.mxu0 %v30_v4  ;;  %277 = vmatprep.subr.mxu1 %v30_v4 }
   0xb   :  { %260 = vmatpush3.msra.mxu0 %v30_v4  ;;  %285 = vmatpush3.msra.mxu1 %v30_v4  ;;  %v238_v4 = vld [vmem:[%s418_s5] ss:$0 sm:$0xff] }
   0xc   :  { %261 = vmatprep.subr.mxu0 %v29_v5  ;;  %278 = vmatprep.subr.mxu1 %v29_v5 }
   0xd   :  { %262 = vmatpush3.msra.mxu0 %v29_v5  ;;  %286 = vmatpush3.msra.mxu1 %v29_v5 }
   0xe   :  { %263 = vmatprep.subr.mxu0 %v28_v6  ;;  %279 = vmatprep.subr.mxu1 %v28_v6 }
   0xf   :  { %264 = vmatpush3.msra.mxu0 %v28_v6  ;;  %287 = vmatpush3.msra.mxu1 %v28_v6 }
  0x10   :  { %265 = vmatprep.subr.mxu0 %v27_v7  ;;  %280 = vmatprep.subr.mxu1 %v27_v7 }
  0x11   :  { %266 = vmatpush3.msra.mxu0 %v27_v7  ;;  %288 = vmatpush3.msra.mxu1 %v27_v7 }
  0x12   :  { %267 = vmatprep.mubr.msk.f32.mxu0 %vm42_vm0, %v23_v8  ;;  %270 = vmatprep.mubr.msk.f32.mxu1 %vm42_vm0, %v25_v9 }
  0x13   :  { %268 = vmatmul.mubr.msk.f32.vlgmr.msra.gmra.mxu0 %vm42_vm0, %v24_v10  ;;  %271 = vmatmul.mubr.msk.f32.vlgmr.msra.gmra.mxu1 %vm42_vm0, %v26_v11 }
  0xd3   :  { %v269_v12 = vpop.f32.mrf.mxu0  ;;  %v272_v14 = vpop.f32.mrf.mxu1 }
  0xd4   :  { %v127_v19 = vadd.f32 %v269_v12, %v232_v13  ;;  %v137_v20 = vadd.f32 %v272_v14, %v232_v13 }
  0xd5   :  { %v121_v15 = vpop.f32.mrf.mxu0  ;;  %v131_v16 = vpop.f32.mrf.mxu1 }
  0xd6   :  { %v122_v21 = vadd.f32 %v232_v13, %v121_v15  ;;  %v132_v22 = vadd.f32 %v232_v13, %v131_v16  ;;  %v147_v29 = vadd.f32 %v143_v23, %v137_v20  ;;  %v145_v30 = vadd.f32 %v141_v24, %v127_v19 }
  0xd8   :  { %v146_v25 = vadd.f32 %v142_v17, %v132_v22  ;;  %v144_v26 = vadd.f32 %v140_v18, %v122_v21  ;;  %v158_v31 = vsel %vm148_vm1, %v147_v29, 0.0  ;;  %v152_v32 = vsel %vm148_vm1, %v145_v30, 0.0 }
  0xda   :  { %v155_v27 = vsel %vm148_vm1, %v146_v25, 0.0  ;;  %v149_v28 = vsel %vm148_vm1, %v144_v26, 0.0 }
  0xdb   :  { %156 = vadd.xlane.f32.xlu1 %v155_v27  ;;  %150 = vadd.xlane.f32.xlu0 %v149_v28 }
  0xdf   :  { %159 = vadd.xlane.f32.xlu1 %v158_v31  ;;  %153 = vadd.xlane.f32.xlu0 %v152_v32 }
 0x164   :  { %v157_v33 = vpop.xlane.xlu1 %156  ;;  %v151_v34 = vpop.xlane.xlu0 %150 }
 0x165   :  { %v164_v35 = vmul.f32 0.03125, %v157_v33  ;;  %v162_v36 = vmul.f32 0.03125, %v151_v34 }
 0x167   :  { %v168_v37 = vsub.f32 %v146_v25, %v164_v35  ;;  %v166_v38 = vsub.f32 %v144_v26, %v162_v36 }
 0x168   :  { %v160_v39 = vpop.xlane.xlu1 %159  ;;  %v154_v40 = vpop.xlane.xlu0 %153 }
 0x169   :  { %v165_v41 = vmul.f32 0.03125, %v160_v39  ;;  %v163_v42 = vmul.f32 0.03125, %v154_v40  ;;  %v170_v43 = vmul.f32 %v166_v38, %v166_v38  ;;  %v172_v47 = vmul.f32 %v168_v37, %v168_v37 }
 0x16b   :  { %v169_v44 = vsub.f32 %v147_v29, %v165_v41  ;;  %v167_v45 = vsub.f32 %v145_v30, %v163_v42  ;;  %v174_v46 = vsel %vm148_vm1, %v170_v43, 0.0  ;;  %v180_v49 = vsel %vm148_vm1, %v172_v47, 0.0 }
 0x16c   :  { %175 = vadd.xlane.f32.xlu0 %v174_v46 }
 0x16d   :  { %v171_v48 = vmul.f32 %v167_v45, %v167_v45  ;;  %v173_v51 = vmul.f32 %v169_v44, %v169_v44 }
 0x16f   :  { %v177_v50 = vsel %vm148_vm1, %v171_v48, 0.0  ;;  %v183_v52 = vsel %vm148_vm1, %v173_v51, 0.0 }
 0x170   :  { %181 = vadd.xlane.f32.xlu0 %v180_v49  ;;  %178 = vadd.xlane.f32.xlu1 %v177_v50 }
 0x174   :  { %184 = vadd.xlane.f32.xlu1 %v183_v52 }
 0x1f5   :  { %v176_v53 = vpop.xlane.xlu0 %175 }
 0x1f6   :  { %v186_v54 = vmul.f32 0.03125, %v176_v53 }
 0x1f8   :  { %v190_v55 = vadd.f32 1e-05, %v186_v54 }
 0x1f9   :  { %v179_v56 = vpop.xlane.xlu1 %178  ;;  %v182_v57 = vpop.xlane.xlu0 %181 }
 0x1fa   :  { %289 = vrsqrt.f32 %v190_v55  ;;  %v187_v58 = vmul.f32 0.03125, %v179_v56  ;;  %v188_v59 = vmul.f32 0.03125, %v182_v57 }
 0x1fc   :  { %v191_v60 = vadd.f32 1e-05, %v187_v58  ;;  %v192_v61 = vadd.f32 1e-05, %v188_v59 }
 0x1fd   :  { %v185_v62 = vpop.xlane.xlu1 %184 }
 0x1fe   :  { %291 = vrsqrt.f32 %v191_v60  ;;  %v189_v63 = vmul.f32 0.03125, %v185_v62 }
 0x1ff   :  { %293 = vrsqrt.f32 %v192_v61 }
 0x200   :  { %v193_v0 = vadd.f32 1e-05, %v189_v63 }
 0x202   :  { %295 = vrsqrt.f32 %v193_v0 }
 0x207   :  { %v290_v1 = vpop.eup %289 }
 0x208   :  { %v198_v3 = vmul.f32 %v290_v1, %v166_v38 }
 0x20a   :  { %v209_v5 = vmul.f32 %v237_v2, %v198_v3 }
 0x20b   :  { %v292_v6 = vpop.eup %291 }
 0x20c   :  { %v294_v7 = vpop.eup %293  ;;  %v220_v8 = vadd.f32 %v238_v4, %v209_v5  ;;  %v199_v9 = vmul.f32 %v292_v6, %v167_v45 }
 0x20d   :  { %v200_v10 = vmul.f32 %v294_v7, %v168_v37 }
 0x20e   :  { %224 = vst.msk [vmem:[%s419_s6] sm:$0xff] %vm148_vm1, %v220_v8  ;;  %v210_v11 = vmul.f32 %v237_v2, %v199_v9 }
 0x20f   :  { %v296_v12 = vpop.eup %295  ;;  %v211_v13 = vmul.f32 %v237_v2, %v200_v10 }
 0x210   :  { %v221_v14 = vadd.f32 %v238_v4, %v210_v11  ;;  %v201_v15 = vmul.f32 %v296_v12, %v169_v44 }
 0x211   :  { %v222_v16 = vadd.f32 %v238_v4, %v211_v13 }
 0x212   :  { %225 = vst.msk [vmem:[%s419_s6 + $0x8] sm:$0xff] %vm148_vm1, %v221_v14  ;;  %v212_v17 = vmul.f32 %v237_v2, %v201_v15 }
 0x213   :  { %226 = vst.msk [vmem:[%s419_s6 + $0x10] sm:$0xff] %vm148_vm1, %v222_v16 }
 0x214   :  { %v223_v18 = vadd.f32 %v238_v4, %v212_v17 }
 0x216   :  { %227 = vst.msk [vmem:[%s419_s6 + $0x18] sm:$0xff] %vm148_vm1, %v223_v18 }

// kernel: reconstruction_forward.33
= control target key start
LH: loop header
LB: loop body
LE: loop exit
PB: predicated region body
PF: predicated region fallthrough
CT: control target
= control target key end

     0   :  { %vm29_vm0 = vcmask 261120   ;;  %vm127_vm1 = vcmask 785408   ;;  %s230_s1 = inlined_call_operand.vmem [shape: f32[32,96], index: 1, kind: input, shape index: {}]   ;;  %s231_s0 = inlined_call_operand.vmem [shape: f32[32,32], index: 0, kind: input, shape index: {}]   ;;  %s232_s2 = inlined_call_operand.vmem [shape: f32[1,96], index: 2, kind: input, shape index: {}]   ;;  %s233_s3 = inlined_call_operand.vmem [shape: f32[32,96], index: 3, kind: output, shape index: {}]  }
   0x1   :  { %v21_v0 = vld [vmem:[%s230_s1 + $0x18] sm:$0xff]  ;;  %v20_v1 = vld [vmem:[%s230_s1 + $0x10] sm:$0xff]  ;;  %v19_v2 = vld [vmem:[%s230_s1 + $0x8] sm:$0xff] }
   0x2   :  { %149 = vmatprep.subr.mxu0 %v21_v0  ;;  %163 = vmatprep.subr.mxu1 %v21_v0  ;;  %v18_v3 = vld [vmem:[%s230_s1] sm:$0xff]  ;;  %v16_v5 = vld [vmem:[%s231_s0 + $0x10] sm:$0xff]  ;;  %v15_v6 = vld [vmem:[%s231_s0 + $0x8] sm:$0xff] }
   0x3   :  { %150 = vmatpush3.msra.mxu0 %v21_v0  ;;  %167 = vmatpush3.msra.mxu1 %v21_v0  ;;  %v14_v4 = vld [vmem:[%s231_s0] sm:$0xff]  ;;  %v17_v7 = vld [vmem:[%s231_s0 + $0x18] sm:$0xff] }
   0x4   :  { %151 = vmatprep.subr.mxu0 %v20_v1  ;;  %164 = vmatprep.subr.mxu1 %v20_v1  ;;  %v136_v8 = vld [vmem:[%s232_s2] ss:$0 sm:$0xff] }
   0x5   :  { %152 = vmatpush3.msra.mxu0 %v20_v1  ;;  %168 = vmatpush3.msra.mxu1 %v20_v1 }
   0x6   :  { %153 = vmatprep.subr.mxu0 %v19_v2  ;;  %165 = vmatprep.subr.mxu1 %v19_v2 }
   0x7   :  { %154 = vmatpush3.msra.mxu0 %v19_v2  ;;  %169 = vmatpush3.msra.mxu1 %v19_v2 }
   0x8   :  { %155 = vmatprep.subr.mxu0 %v18_v3  ;;  %166 = vmatprep.subr.mxu1 %v18_v3 }
   0x9   :  { %156 = vmatpush3.msra.mxu0 %v18_v3  ;;  %170 = vmatpush3.msra.mxu1 %v18_v3 }
   0xa   :  { %157 = vmatprep.mubr.msk.f32.mxu0 %vm29_vm0, %v14_v4  ;;  %160 = vmatprep.mubr.msk.f32.mxu1 %vm29_vm0, %v16_v5 }
   0xb   :  { %158 = vmatmul.mubr.msk.f32.vlgmr.msra.gmra.mxu0 %vm29_vm0, %v15_v6  ;;  %161 = vmatmul.mubr.msk.f32.vlgmr.msra.gmra.mxu1 %vm29_vm0, %v17_v7 }
  0xcb   :  { %v159_v9 = vpop.f32.mrf.mxu0  ;;  %v162_v10 = vpop.f32.mrf.mxu1 }
  0xcc   :  { %v114_v11 = vadd.f32 %v159_v9, %v136_v8  ;;  %v124_v12 = vadd.f32 %v162_v10, %v136_v8 }
  0xcd   :  { %v108_v13 = vpop.f32.mrf.mxu0  ;;  %v118_v14 = vpop.f32.mrf.mxu1 }
  0xce   :  { %129 = vst.msk [vmem:[%s233_s3 + $0x8] sm:$0xff] %vm127_vm1, %v114_v11  ;;  %131 = vst.msk [vmem:[%s233_s3 + $0x18] sm:$0xff] %vm127_vm1, %v124_v12  ;;  %v109_v15 = vadd.f32 %v136_v8, %v108_v13  ;;  %v119_v16 = vadd.f32 %v136_v8, %v118_v14 }
  0xd0   :  { %128 = vst.msk [vmem:[%s233_s3] sm:$0xff] %vm127_vm1, %v109_v15  ;;  %130 = vst.msk [vmem:[%s233_s3 + $0x10] sm:$0xff] %vm127_vm1, %v119_v16 }

// kernel: reconstruction_forward.35
= control target key start
LH: loop header
LB: loop body
LE: loop exit
PB: predicated region body
PF: predicated region fallthrough
CT: control target
= control target key end

     0   :  { %vm38_vm0 = vcmask 261120   ;;  %s380_s1 = inlined_call_operand.vmem [shape: f32[32,32], index: 1, kind: input, shape index: {}]   ;;  %s381_s0 = inlined_call_operand.vmem [shape: f32[32,32], index: 0, kind: input, shape index: {}]   ;;  %s382_s2 = inlined_call_operand.vmem [shape: f32[1,32], index: 2, kind: input, shape index: {}]   ;;  %s383_s3 = inlined_call_operand.vmem [shape: f32[32,32], index: 3, kind: input, shape index: {}]   ;;  %s384_s4 = inlined_call_operand.vmem [shape: f32[1,32], index: 4, kind: input, shape index: {}]   ;;  %s385_s5 = inlined_call_operand.vmem [shape: f32[1,32], index: 5, kind: input, shape index: {}]   ;;  %s386_s6 = inlined_call_operand.vmem [shape: f32[32,32], index: 6, kind: output, shape index: {}]  }
   0x1   :  { %v30_v0 = vld [vmem:[%s380_s1 + $0x18] sm:$0xff]  ;;  %v29_v1 = vld [vmem:[%s380_s1 + $0x10] sm:$0xff]  ;;  %v28_v2 = vld [vmem:[%s380_s1 + $0x8] sm:$0xff] }
   0x2   :  { %242 = vmatprep.subr.mxu0 %v30_v0  ;;  %256 = vmatprep.subr.mxu1 %v30_v0  ;;  %v27_v3 = vld [vmem:[%s380_s1] sm:$0xff]  ;;  %v25_v5 = vld [vmem:[%s381_s0 + $0x10] sm:$0xff]  ;;  %v24_v6 = vld [vmem:[%s381_s0 + $0x8] sm:$0xff] }
   0x3   :  { %243 = vmatpush3.msra.mxu0 %v30_v0  ;;  %260 = vmatpush3.msra.mxu1 %v30_v0  ;;  %v23_v4 = vld [vmem:[%s381_s0] sm:$0xff]  ;;  %v26_v7 = vld [vmem:[%s381_s0 + $0x18] sm:$0xff]  ;;  %v138_v13 = vld [vmem:[%s383_s3 + $0x10] sm:$0xff] }
   0x4   :  { %244 = vmatprep.subr.mxu0 %v29_v1  ;;  %257 = vmatprep.subr.mxu1 %v29_v1  ;;  %v227_v9 = vld [vmem:[%s382_s2] ss:$0 sm:$0xff]  ;;  %v139_v19 = vld [vmem:[%s383_s3 + $0x18] sm:$0xff]  ;;  %v137_v20 = vld [vmem:[%s383_s3 + $0x8] sm:$0xff] }
   0x5   :  { %245 = vmatpush3.msra.mxu0 %v29_v1  ;;  %261 = vmatpush3.msra.mxu1 %v29_v1  ;;  %v136_v14 = vld [vmem:[%s383_s3] sm:$0xff] }
   0x6   :  { %246 = vmatprep.subr.mxu0 %v28_v2  ;;  %258 = vmatprep.subr.mxu1 %v28_v2  ;;  %v232_v62 = vld [vmem:[%s384_s4] ss:$0 sm:$0xff] }
   0x7   :  { %247 = vmatpush3.msra.mxu0 %v28_v2  ;;  %262 = vmatpush3.msra.mxu1 %v28_v2  ;;  %v233_v0 = vld [vmem:[%s385_s5] ss:$0 sm:$0xff] }
   0x8   :  { %248 = vmatprep.subr.mxu0 %v27_v3  ;;  %259 = vmatprep.subr.mxu1 %v27_v3 }
   0x9   :  { %249 = vmatpush3.msra.mxu0 %v27_v3  ;;  %263 = vmatpush3.msra.mxu1 %v27_v3 }
   0xa   :  { %250 = vmatprep.mubr.msk.f32.mxu0 %vm38_vm0, %v23_v4  ;;  %253 = vmatprep.mubr.msk.f32.mxu1 %vm38_vm0, %v25_v5 }
   0xb   :  { %251 = vmatmul.mubr.msk.f32.vlgmr.msra.gmra.mxu0 %vm38_vm0, %v24_v6  ;;  %254 = vmatmul.mubr.msk.f32.vlgmr.msra.gmra.mxu1 %vm38_vm0, %v26_v7 }
  0xcb   :  { %v252_v8 = vpop.f32.mrf.mxu0  ;;  %v255_v10 = vpop.f32.mrf.mxu1 }
  0xcc   :  { %v123_v15 = vadd.f32 %v252_v8, %v227_v9  ;;  %v133_v16 = vadd.f32 %v255_v10, %v227_v9 }
  0xcd   :  { %v117_v11 = vpop.f32.mrf.mxu0  ;;  %v127_v12 = vpop.f32.mrf.mxu1 }
  0xce   :  { %v118_v17 = vadd.f32 %v227_v9, %v117_v11  ;;  %v128_v18 = vadd.f32 %v227_v9, %v127_v12  ;;  %v143_v25 = vadd.f32 %v139_v19, %v133_v16  ;;  %v141_v26 = vadd.f32 %v137_v20, %v123_v15 }
  0xd0   :  { %v142_v21 = vadd.f32 %v138_v13, %v128_v18  ;;  %v140_v22 = vadd.f32 %v136_v14, %v118_v17  ;;  %v153_v27 = vsel %vm38_vm0, %v143_v25, 0.0  ;;  %v147_v28 = vsel %vm38_vm0, %v141_v26, 0.0 }
  0xd2   :  { %v150_v23 = vsel %vm38_vm0, %v142_v21, 0.0  ;;  %v144_v24 = vsel %vm38_vm0, %v140_v22, 0.0 }
  0xd3   :  { %151 = vadd.xlane.f32.xlu1 %v150_v23  ;;  %145 = vadd.xlane.f32.xlu0 %v144_v24 }
  0xd7   :  { %154 = vadd.xlane.f32.xlu1 %v153_v27  ;;  %148 = vadd.xlane.f32.xlu0 %v147_v28 }
 0x15c   :  { %v152_v29 = vpop.xlane.xlu1 %151  ;;  %v146_v30 = vpop.xlane.xlu0 %145 }
 0x15d   :  { %v159_v31 = vmul.f32 0.03125, %v152_v29  ;;  %v157_v32 = vmul.f32 0.03125, %v146_v30 }
 0x15f   :  { %v163_v33 = vsub.f32 %v142_v21, %v159_v31  ;;  %v161_v34 = vsub.f32 %v140_v22, %v157_v32 }
 0x160   :  { %v155_v35 = vpop.xlane.xlu1 %154  ;;  %v149_v36 = vpop.xlane.xlu0 %148 }
 0x161   :  { %v160_v37 = vmul.f32 0.03125, %v155_v35  ;;  %v158_v38 = vmul.f32 0.03125, %v149_v36  ;;  %v165_v39 = vmul.f32 %v161_v34, %v161_v34  ;;  %v167_v43 = vmul.f32 %v163_v33, %v163_v33 }
 0x163   :  { %v164_v40 = vsub.f32 %v143_v25, %v160_v37  ;;  %v162_v41 = vsub.f32 %v141_v26, %v158_v38  ;;  %v169_v42 = vsel %vm38_vm0, %v165_v39, 0.0  ;;  %v175_v45 = vsel %vm38_vm0, %v167_v43, 0.0 }
 0x164   :  { %170 = vadd.xlane.f32.xlu0 %v169_v42 }
 0x165   :  { %v166_v44 = vmul.f32 %v162_v41, %v162_v41  ;;  %v168_v47 = vmul.f32 %v164_v40, %v164_v40 }
 0x167   :  { %v172_v46 = vsel %vm38_vm0, %v166_v44, 0.0  ;;  %v178_v48 = vsel %vm38_vm0, %v168_v47, 0.0 }
 0x168   :  { %176 = vadd.xlane.f32.xlu0 %v175_v45  ;;  %173 = vadd.xlane.f32.xlu1 %v172_v46 }
 0x16c   :  { %179 = vadd.xlane.f32.xlu1 %v178_v48 }
 0x1ed   :  { %v171_v49 = vpop.xlane.xlu0 %170 }
 0x1ee   :  { %v181_v50 = vmul.f32 0.03125, %v171_v49 }
 0x1f0   :  { %v185_v51 = vadd.f32 1e-05, %v181_v50 }
 0x1f1   :  { %v174_v52 = vpop.xlane.xlu1 %173  ;;  %v177_v53 = vpop.xlane.xlu0 %176 }
 0x1f2   :  { %264 = vrsqrt.f32 %v185_v51  ;;  %v182_v54 = vmul.f32 0.03125, %v174_v52  ;;  %v183_v55 = vmul.f32 0.03125, %v177_v53 }
 0x1f4   :  { %v186_v56 = vadd.f32 1e-05, %v182_v54  ;;  %v187_v57 = vadd.f32 1e-05, %v183_v55 }
 0x1f5   :  { %v180_v58 = vpop.xlane.xlu1 %179 }
 0x1f6   :  { %266 = vrsqrt.f32 %v186_v56  ;;  %v184_v59 = vmul.f32 0.03125, %v180_v58 }
 0x1f7   :  { %268 = vrsqrt.f32 %v187_v57 }
 0x1f8   :  { %v188_v60 = vadd.f32 1e-05, %v184_v59 }
 0x1fa   :  { %270 = vrsqrt.f32 %v188_v60 }
 0x1ff   :  { %v265_v61 = vpop.eup %264 }
 0x200   :  { %v193_v63 = vmul.f32 %v265_v61, %v161_v34 }
 0x202   :  { %v204_v1 = vmul.f32 %v232_v62, %v193_v63 }
 0x203   :  { %v267_v2 = vpop.eup %266 }
 0x204   :  { %v269_v3 = vpop.eup %268  ;;  %v215_v4 = vadd.f32 %v233_v0, %v204_v1  ;;  %v194_v5 = vmul.f32 %v267_v2, %v162_v41 }
 0x205   :  { %v195_v6 = vmul.f32 %v269_v3, %v163_v33 }
 0x206   :  { %219 = vst.msk [vmem:[%s386_s6] sm:$0xff] %vm38_vm0, %v215_v4  ;;  %v205_v7 = vmul.f32 %v232_v62, %v194_v5 }
 0x207   :  { %v271_v8 = vpop.eup %270  ;;  %v206_v9 = vmul.f32 %v232_v62, %v195_v6 }
 0x208   :  { %v216_v10 = vadd.f32 %v233_v0, %v205_v7  ;;  %v196_v11 = vmul.f32 %v271_v8, %v164_v40 }
 0x209   :  { %v217_v12 = vadd.f32 %v233_v0, %v206_v9 }
 0x20a   :  { %220 = vst.msk [vmem:[%s386_s6 + $0x8] sm:$0xff] %vm38_vm0, %v216_v10  ;;  %v207_v13 = vmul.f32 %v232_v62, %v196_v11 }
 0x20b   :  { %221 = vst.msk [vmem:[%s386_s6 + $0x10] sm:$0xff] %vm38_vm0, %v217_v12 }
 0x20c   :  { %v218_v14 = vadd.f32 %v233_v0, %v207_v13 }
 0x20e   :  { %222 = vst.msk [vmem:[%s386_s6 + $0x18] sm:$0xff] %vm38_vm0, %v218_v14 }

// kernel: reconstruction_forward.43
= control target key start
LH: loop header
LB: loop body
LE: loop exit
PB: predicated region body
PF: predicated region fallthrough
CT: control target
= control target key end

     0   :  { %vm18_vm0 = vcmask 523264   ;;  %s174_s0 = inlined_call_operand.vmem [shape: f32[32,64], index: 0, kind: input, shape index: {}]   ;;  %s175_s1 = inlined_call_operand.vmem [shape: f32[1,64], index: 1, kind: input, shape index: {}]   ;;  %s176_s2 = inlined_call_operand.vmem [shape: f32[1,64], index: 2, kind: input, shape index: {}]   ;;  %s177_s3 = inlined_call_operand.vmem [shape: f32[32,64], index: 3, kind: output, shape index: {}]  }
   0x1   :  { %v14_v0 = vld [vmem:[%s174_s0] sm:$0xff]  ;;  %v16_v1 = vld [vmem:[%s174_s0 + $0x10] sm:$0xff]  ;;  %v15_v2 = vld [vmem:[%s174_s0 + $0x8] sm:$0xff] }
   0x2   :  { %v19_v3 = vsel %vm18_vm0, %v14_v0, 0.0  ;;  %v25_v4 = vsel %vm18_vm0, %v16_v1, 0.0  ;;  %v17_v5 = vld [vmem:[%s174_s0 + $0x18] sm:$0xff]  ;;  %v22_v6 = vsel %vm18_vm0, %v15_v2, 0.0  ;;  %v102_v41 = vld [vmem:[%s175_s1] ss:$0 sm:$0xff] }
   0x3   :  { %20 = vadd.xlane.f32.xlu0 %v19_v3  ;;  %26 = vadd.xlane.f32.xlu1 %v25_v4  ;;  %v28_v7 = vsel %vm18_vm0, %v17_v5, 0.0  ;;  %v103_v43 = vld [vmem:[%s176_s2] ss:$0 sm:$0xff] }
   0x7   :  { %23 = vadd.xlane.f32.xlu0 %v22_v6  ;;  %29 = vadd.xlane.f32.xlu1 %v28_v7 }
  0x8c   :  { %v21_v8 = vpop.xlane.xlu0 %20  ;;  %v27_v9 = vpop.xlane.xlu1 %26 }
  0x8d   :  { %v32_v10 = vmul.f32 0.015625, %v21_v8  ;;  %v34_v11 = vmul.f32 0.015625, %v27_v9 }
  0x8f   :  { %v36_v12 = vsub.f32 %v14_v0, %v32_v10  ;;  %v38_v13 = vsub.f32 %v16_v1, %v34_v11 }
  0x90   :  { %v24_v14 = vpop.xlane.xlu0 %23  ;;  %v30_v15 = vpop.xlane.xlu1 %29 }
  0x91   :  { %v33_v16 = vmul.f32 0.015625, %v24_v14  ;;  %v35_v17 = vmul.f32 0.015625, %v30_v15  ;;  %v40_v18 = vmul.f32 %v36_v12, %v36_v12  ;;  %v42_v19 = vmul.f32 %v38_v13, %v38_v13 }
  0x93   :  { %v37_v20 = vsub.f32 %v15_v2, %v33_v16  ;;  %v39_v21 = vsub.f32 %v17_v5, %v35_v17  ;;  %v44_v22 = vsel %vm18_vm0, %v40_v18, 0.0  ;;  %v50_v23 = vsel %vm18_vm0, %v42_v19, 0.0 }
  0x94   :  { %45 = vadd.xlane.f32.xlu0 %v44_v22 }
  0x95   :  { %v41_v24 = vmul.f32 %v37_v20, %v37_v20  ;;  %v43_v25 = vmul.f32 %v39_v21, %v39_v21 }
  0x97   :  { %v47_v26 = vsel %vm18_vm0, %v41_v24, 0.0  ;;  %v53_v27 = vsel %vm18_vm0, %v43_v25, 0.0 }
  0x98   :  { %51 = vadd.xlane.f32.xlu0 %v50_v23  ;;  %48 = vadd.xlane.f32.xlu1 %v47_v26 }
  0x9c   :  { %54 = vadd.xlane.f32.xlu1 %v53_v27 }
 0x11d   :  { %v46_v28 = vpop.xlane.xlu0 %45 }
 0x11e   :  { %v56_v29 = vmul.f32 0.015625, %v46_v28 }
 0x120   :  { %v60_v30 = vadd.f32 1e-05, %v56_v29 }
 0x121   :  { %v49_v31 = vpop.xlane.xlu1 %48  ;;  %v52_v32 = vpop.xlane.xlu0 %51 }
 0x122   :  { %104 = vrsqrt.f32 %v60_v30  ;;  %v57_v33 = vmul.f32 0.015625, %v49_v31  ;;  %v58_v34 = vmul.f32 0.015625, %v52_v32 }
 0x124   :  { %v61_v35 = vadd.f32 1e-05, %v57_v33  ;;  %v62_v36 = vadd.f32 1e-05, %v58_v34 }
 0x125   :  { %v55_v37 = vpop.xlane.xlu1 %54 }
 0x126   :  { %106 = vrsqrt.f32 %v61_v35  ;;  %v59_v38 = vmul.f32 0.015625, %v55_v37 }
 0x127   :  { %108 = vrsqrt.f32 %v62_v36 }
 0x128   :  { %v63_v39 = vadd.f32 1e-05, %v59_v38 }
 0x12a   :  { %110 = vrsqrt.f32 %v63_v39 }
 0x12f   :  { %v105_v40 = vpop.eup %104 }
 0x130   :  { %v68_v42 = vmul.f32 %v105_v40, %v36_v12 }
 0x132   :  { %v79_v44 = vmul.f32 %v102_v41, %v68_v42 }
 0x133   :  { %v107_v45 = vpop.eup %106 }
 0x134   :  { %v109_v46 = vpop.eup %108  ;;  %v90_v47 = vadd.f32 %v103_v43, %v79_v44  ;;  %v69_v48 = vmul.f32 %v107_v45, %v37_v20 }
 0x135   :  { %v70_v49 = vmul.f32 %v109_v46, %v38_v13 }
 0x136   :  { %94 = vst.msk [vmem:[%s177_s3] sm:$0xff] %vm18_vm0, %v90_v47  ;;  %v80_v50 = vmul.f32 %v102_v41, %v69_v48 }
 0x137   :  { %v111_v51 = vpop.eup %110  ;;  %v81_v52 = vmul.f32 %v102_v41, %v70_v49 }
 0x138   :  { %v91_v53 = vadd.f32 %v103_v43, %v80_v50  ;;  %v71_v54 = vmul.f32 %v111_v51, %v39_v21 }
 0x139   :  { %v92_v55 = vadd.f32 %v103_v43, %v81_v52 }
 0x13a   :  { %95 = vst.msk [vmem:[%s177_s3 + $0x8] sm:$0xff] %vm18_vm0, %v91_v53  ;;  %v82_v56 = vmul.f32 %v102_v41, %v71_v54 }
 0x13b   :  { %96 = vst.msk [vmem:[%s177_s3 + $0x10] sm:$0xff] %vm18_vm0, %v92_v55 }
 0x13c   :  { %v93_v57 = vadd.f32 %v103_v43, %v82_v56 }
 0x13e   :  { %97 = vst.msk [vmem:[%s177_s3 + $0x18] sm:$0xff] %vm18_vm0, %v93_v57 }

// kernel: reconstruction_forward.44
= control target key start
LH: loop header
LB: loop body
LE: loop exit
PB: predicated region body
PF: predicated region fallthrough
CT: control target
= control target key end

     0   :  { %vm33_vm0 = vcmask 523264   ;;  %s317_s1 = inlined_call_operand.vmem [shape: f32[64,64], index: 1, kind: input, shape index: {}]   ;;  %s318_s0 = inlined_call_operand.vmem [shape: f32[32,64], index: 0, kind: input, shape index: {}]   ;;  %s319_s2 = inlined_call_operand.vmem [shape: f32[1,64], index: 2, kind: input, shape index: {}]   ;;  %s320_s3 = inlined_call_operand.vmem [shape: f32[32,64], index: 3, kind: output, shape index: {}]  }
   0x1   :  { %v25_v0 = vld [vmem:[%s317_s1 + $0x38] sm:$0xff]  ;;  %v24_v1 = vld [vmem:[%s317_s1 + $0x30] sm:$0xff]  ;;  %v23_v2 = vld [vmem:[%s317_s1 + $0x28] sm:$0xff] }
   0x2   :  { %192 = vmatprep.subr.mxu0 %v25_v0  ;;  %214 = vmatprep.subr.mxu1 %v25_v0  ;;  %v22_v3 = vld [vmem:[%s317_s1 + $0x20] sm:$0xff]  ;;  %v21_v4 = vld [vmem:[%s317_s1 + $0x18] sm:$0xff]  ;;  %v20_v5 = vld [vmem:[%s317_s1 + $0x10] sm:$0xff] }
   0x3   :  { %193 = vmatpush3.msra.mxu0 %v25_v0  ;;  %222 = vmatpush3.msra.mxu1 %v25_v0  ;;  %v19_v6 = vld [vmem:[%s317_s1 + $0x8] sm:$0xff]  ;;  %v18_v7 = vld [vmem:[%s317_s1] sm:$0xff]  ;;  %v16_v9 = vld [vmem:[%s318_s0 + $0x10] sm:$0xff] }
   0x4   :  { %194 = vmatprep.subr.mxu0 %v24_v1  ;;  %215 = vmatprep.subr.mxu1 %v24_v1  ;;  %v14_v8 = vld [vmem:[%s318_s0] sm:$0xff]  ;;  %v15_v10 = vld [vmem:[%s318_s0 + $0x8] sm:$0xff]  ;;  %v17_v11 = vld [vmem:[%s318_s0 + $0x18] sm:$0xff] }
   0x5   :  { %195 = vmatpush3.msra.mxu0 %v24_v1  ;;  %223 = vmatpush3.msra.mxu1 %v24_v1  ;;  %v175_v12 = vld [vmem:[%s319_s2] ss:$0 sm:$0xff] }
   0x6   :  { %196 = vmatprep.subr.mxu0 %v23_v2  ;;  %216 = vmatprep.subr.mxu1 %v23_v2 }
   0x7   :  { %197 = vmatpush3.msra.mxu0 %v23_v2  ;;  %224 = vmatpush3.msra.mxu1 %v23_v2 }
   0x8   :  { %198 = vmatprep.subr.mxu0 %v22_v3  ;;  %217 = vmatprep.subr.mxu1 %v22_v3 }
   0x9   :  { %199 = vmatpush3.msra.mxu0 %v22_v3  ;;  %225 = vmatpush3.msra.mxu1 %v22_v3 }
   0xa   :  { %200 = vmatprep.subr.mxu0 %v21_v4  ;;  %218 = vmatprep.subr.mxu1 %v21_v4 }
   0xb   :  { %201 = vmatpush3.msra.mxu0 %v21_v4  ;;  %226 = vmatpush3.msra.mxu1 %v21_v4 }
   0xc   :  { %202 = vmatprep.subr.mxu0 %v20_v5  ;;  %219 = vmatprep.subr.mxu1 %v20_v5 }
   0xd   :  { %203 = vmatpush3.msra.mxu0 %v20_v5  ;;  %227 = vmatpush3.msra.mxu1 %v20_v5 }
   0xe   :  { %204 = vmatprep.subr.mxu0 %v19_v6  ;;  %220 = vmatprep.subr.mxu1 %v19_v6 }
   0xf   :  { %205 = vmatpush3.msra.mxu0 %v19_v6  ;;  %228 = vmatpush3.msra.mxu1 %v19_v6 }
  0x10   :  { %206 = vmatprep.subr.mxu0 %v18_v7  ;;  %221 = vmatprep.subr.mxu1 %v18_v7 }
  0x11   :  { %207 = vmatpush3.msra.mxu0 %v18_v7  ;;  %229 = vmatpush3.msra.mxu1 %v18_v7 }
  0x12   :  { %208 = vmatprep.mubr.msk.f32.mxu0 %vm33_vm0, %v14_v8  ;;  %211 = vmatprep.mubr.msk.f32.mxu1 %vm33_vm0, %v16_v9 }
  0x13   :  { %209 = vmatmul.mubr.msk.f32.vlgmr.msra.gmra.mxu0 %vm33_vm0, %v15_v10  ;;  %212 = vmatmul.mubr.msk.f32.vlgmr.msra.gmra.mxu1 %vm33_vm0, %v17_v11 }
  0xd3   :  { %v210_v13 = vpop.f32.mrf.mxu0  ;;  %v213_v14 = vpop.f32.mrf.mxu1 }
  0xd4   :  { %v118_v15 = vadd.f32 %v210_v13, %v175_v12  ;;  %v128_v16 = vadd.f32 %v213_v14, %v175_v12 }
  0xd5   :  { %v112_v17 = vpop.f32.mrf.mxu0  ;;  %v122_v18 = vpop.f32.mrf.mxu1 }
  0xd6   :  { %v136_v19 = vmul.f32 0.044715, %v118_v15  ;;  %v138_v20 = vmul.f32 0.044715, %v128_v16  ;;  %v113_v21 = vadd.f32 %v175_v12, %v112_v17  ;;  %v123_v22 = vadd.f32 %v175_v12, %v122_v18 }
  0xd7   :  { %v132_v43 = vmul.f32 0.5, %v118_v15  ;;  %v134_v45 = vmul.f32 0.5, %v128_v16 }
  0xd8   :  { %v140_v23 = vmul.f32 %v136_v19, %v118_v15  ;;  %v142_v24 = vmul.f32 %v138_v20, %v128_v16  ;;  %v135_v25 = vmul.f32 0.044715, %v113_v21  ;;  %v137_v26 = vmul.f32 0.044715, %v123_v22 }
  0xd9   :  { %v131_v51 = vmul.f32 0.5, %v113_v21  ;;  %v133_v53 = vmul.f32 0.5, %v123_v22 }
  0xda   :  { %v144_v27 = vmul.f32 %v140_v23, %v118_v15  ;;  %v146_v28 = vmul.f32 %v142_v24, %v128_v16  ;;  %v139_v29 = vmul.f32 %v135_v25, %v113_v21  ;;  %v141_v30 = vmul.f32 %v137_v26, %v123_v22 }
  0xdc   :  { %v148_v31 = vadd.f32 %v144_v27, %v118_v15  ;;  %v150_v32 = vadd.f32 %v146_v28, %v128_v16  ;;  %v143_v33 = vmul.f32 %v139_v29, %v113_v21  ;;  %v145_v34 = vmul.f32 %v141_v30, %v123_v22 }
  0xde   :  { %v152_v35 = vmul.f32 0.7978846, %v148_v31  ;;  %v154_v36 = vmul.f32 0.7978846, %v150_v32  ;;  %v147_v37 = vadd.f32 %v143_v33, %v113_v21  ;;  %v149_v38 = vadd.f32 %v145_v34, %v123_v22 }
  0xe0   :  { %230 = vtanh.f32 %v152_v35  ;;  %v151_v39 = vmul.f32 0.7978846, %v147_v37  ;;  %v153_v40 = vmul.f32 0.7978846, %v149_v38 }
  0xe1   :  { %232 = vtanh.f32 %v154_v36 }
  0xe2   :  { %234 = vtanh.f32 %v151_v39 }
  0xe3   :  { %236 = vtanh.f32 %v153_v40 }
  0xed   :  { %v231_v41 = vpop.eup %230 }
  0xee   :  { %v233_v42 = vpop.eup %232  ;;  %v160_v44 = vadd.f32 1.0, %v231_v41 }
  0xef   :  { %v162_v46 = vadd.f32 1.0, %v233_v42  ;;  %v235_v47 = vpop.eup %234 }
  0xf0   :  { %v164_v48 = vmul.f32 %v160_v44, %v132_v43  ;;  %v237_v49 = vpop.eup %236  ;;  %v159_v52 = vadd.f32 1.0, %v235_v47 }
  0xf1   :  { %v166_v50 = vmul.f32 %v162_v46, %v134_v45  ;;  %v161_v54 = vadd.f32 1.0, %v237_v49 }
  0xf2   :  { %168 = vst.msk [vmem:[%s320_s3 + $0x8] sm:$0xff] %vm33_vm0, %v164_v48  ;;  %v163_v55 = vmul.f32 %v159_v52, %v131_v51 }
  0xf3   :  { %170 = vst.msk [vmem:[%s320_s3 + $0x18] sm:$0xff] %vm33_vm0, %v166_v50  ;;  %v165_v56 = vmul.f32 %v161_v54, %v133_v53 }
  0xf4   :  { %167 = vst.msk [vmem:[%s320_s3] sm:$0xff] %vm33_vm0, %v163_v55 }
  0xf5   :  { %169 = vst.msk [vmem:[%s320_s3 + $0x10] sm:$0xff] %vm33_vm0, %v165_v56 }

// kernel: reconstruction_forward.34
= control target key start
LH: loop header
LB: loop body
LE: loop exit
PB: predicated region body
PF: predicated region fallthrough
CT: control target
= control target key end

     0   :  { %vm38_vm0 = vcmask 130048   ;;  %s1155_s1 = inlined_call_operand.vmem [shape: f32[4,16,16], index: 1, kind: input, shape index: {}]   ;;  %s1156_s0 = inlined_call_operand.vmem [shape: f32[4,16,16], index: 0, kind: input, shape index: {}]   ;;  %s1157_s2 = inlined_call_operand.vmem [shape: f32[4,16,16], index: 2, kind: input, shape index: {}]   ;;  %s1158_s3 = inlined_call_operand.vmem [shape: f32[4,16,16], index: 3, kind: output, shape index: {}]  }
   0x1   :  { %v31_v0 = vld [vmem:[%s1155_s1 + $0x8] sm:$0xff]  ;;  %v33_v1 = vld [vmem:[%s1155_s1 + $0x18] sm:$0xff]  ;;  %v30_v2 = vld [vmem:[%s1155_s1] sm:$0xff] }
   0x2   :  { %875 = vmatprep.subr.msk.mxu0 %vm38_vm0, %v31_v0  ;;  %882 = vmatprep.subr.msk.mxu1 %vm38_vm0, %v33_v1  ;;  %v32_v3 = vld [vmem:[%s1155_s1 + $0x10] sm:$0xff]  ;;  %v14_v4 = vld [vmem:[%s1156_s0] sm:$0xff]  ;;  %v15_v6 = vld [vmem:[%s1156_s0 + $0x8] sm:$0xff] }
   0x3   :  { %876 = vmatpush3.xpose.msk.msra.mxu0 %vm38_vm0, %v31_v0  ;;  %883 = vmatpush3.xpose.msk.msra.mxu1 %vm38_vm0, %v33_v1  ;;  %v22_v5 = vmul.f32 0.25, %v14_v4  ;;  %v16_v7 = vld [vmem:[%s1156_s0 + $0x10] sm:$0xff]  ;;  %v17_v9 = vld [vmem:[%s1156_s0 + $0x18] sm:$0xff]  ;;  %v35_v10 = vld [vmem:[%s1155_s1 + $0x28] sm:$0xff]  ;;  %v23_v12 = vmul.f32 0.25, %v15_v6 }
   0x4   :  { %877 = vmatprep.subr.msk.mxu0 %vm38_vm0, %v30_v2  ;;  %884 = vmatprep.subr.msk.mxu1 %vm38_vm0, %v32_v3  ;;  %v24_v8 = vmul.f32 0.25, %v16_v7  ;;  %v37_v11 = vld [vmem:[%s1155_s1 + $0x38] sm:$0xff]  ;;  %v25_v13 = vmul.f32 0.25, %v17_v9  ;;  %v18_v14 = vld [vmem:[%s1156_s0 + $0x20] sm:$0xff]  ;;  %v20_v15 = vld [vmem:[%s1156_s0 + $0x30] sm:$0xff] }
   0x5   :  { %879 = vmatprep.mubr.msk.f32.mxu0 %vm38_vm0, %v22_v5  ;;  %v34_v16 = vld [vmem:[%s1155_s1 + $0x20] sm:$0xff]  ;;  %v36_v17 = vld [vmem:[%s1155_s1 + $0x30] sm:$0xff]  ;;  %v26_v18 = vmul.f32 0.25, %v18_v14  ;;  %v28_v19 = vmul.f32 0.25, %v20_v15  ;;  %v19_v20 = vld [vmem:[%s1156_s0 + $0x28] sm:$0xff] }
   0x6   :  { %886 = vmatprep.mubr.msk.f32.mxu1 %vm38_vm0, %v24_v8  ;;  %v21_v21 = vld [vmem:[%s1156_s0 + $0x38] sm:$0xff]  ;;  %v27_v22 = vmul.f32 0.25, %v19_v20  ;;  %v480_v20 = vld [vmem:[%s1157_s2 + $0x28] sm:$0xff] }
   0x7   :  { %878 = vmatpush3.xpose.msk.msra.mxu0 %vm38_vm0, %v30_v2  ;;  %885 = vmatpush3.xpose.msk.msra.mxu1 %vm38_vm0, %v32_v3  ;;  %v29_v23 = vmul.f32 0.25, %v21_v21  ;;  %v482_v21 = vld [vmem:[%s1157_s2 + $0x38] sm:$0xff] }
   0x8   :  { %889 = vmatprep.subr.msk.mxu0 %vm38_vm0, %v35_v10  ;;  %896 = vmatprep.subr.msk.mxu1 %vm38_vm0, %v37_v11 }
   0xa   :  { %880 = vmatmul.mubr.msk.f32.vlgmr.msra.gmra.mxu0 %vm38_vm0, %v23_v12  ;;  %887 = vmatmul.mubr.msk.f32.vlgmr.msra.gmra.mxu1 %vm38_vm0, %v25_v13 }
   0xb   :  { %890 = vmatpush3.xpose.msk.msra.mxu0 %vm38_vm0, %v35_v10  ;;  %897 = vmatpush3.xpose.msk.msra.mxu1 %vm38_vm0, %v37_v11 }
   0xc   :  { %891 = vmatprep.subr.msk.mxu0 %vm38_vm0, %v34_v16  ;;  %898 = vmatprep.subr.msk.mxu1 %vm38_vm0, %v36_v17 }
   0xd   :  { %893 = vmatprep.mubr.msk.f32.mxu0 %vm38_vm0, %v26_v18  ;;  %900 = vmatprep.mubr.msk.f32.mxu1 %vm38_vm0, %v28_v19  ;;  %v478_v18 = vld [vmem:[%s1157_s2 + $0x18] sm:$0xff]  ;;  %v477_v19 = vld [vmem:[%s1157_s2 + $0x10] sm:$0xff] }
   0xf   :  { %892 = vmatpush3.xpose.msk.msra.mxu0 %vm38_vm0, %v34_v16  ;;  %899 = vmatpush3.xpose.msk.msra.mxu1 %vm38_vm0, %v36_v17  ;;  %v476_v16 = vld [vmem:[%s1157_s2 + $0x8] sm:$0xff]  ;;  %v475_v17 = vld [vmem:[%s1157_s2] sm:$0xff] }
  0x10   :  { %903 = vmatprep.subr.mxu0 %v476_v16  ;;  %910 = vmatprep.subr.mxu1 %v478_v18 }
  0x12   :  { %894 = vmatmul.mubr.msk.f32.vlgmr.msra.gmra.mxu0 %vm38_vm0, %v27_v22  ;;  %901 = vmatmul.mubr.msk.f32.vlgmr.msra.gmra.mxu1 %vm38_vm0, %v29_v23 }
  0x13   :  { %904 = vmatpush3.msra.mxu0 %v476_v16  ;;  %911 = vmatpush3.msra.mxu1 %v478_v18 }
  0x14   :  { %905 = vmatprep.subr.mxu0 %v475_v17  ;;  %912 = vmatprep.subr.mxu1 %v477_v19 }
  0x15   :  { %906 = vmatpush3.msra.mxu0 %v475_v17  ;;  %913 = vmatpush3.msra.mxu1 %v477_v19 }
  0x16   :  { %917 = vmatprep.subr.mxu0 %v480_v20  ;;  %924 = vmatprep.subr.mxu1 %v482_v21 }
  0xca   :  { %v881_v24 = vpop.f32.mrf.mxu0  ;;  %v888_v25 = vpop.f32.mrf.mxu1 }
  0xcb   :  { %v390_v26 = vsel %vm38_vm0, %v881_v24, -inf  ;;  %v396_v29 = vsel %vm38_vm0, %v888_v25, -inf }
  0xcc   :  { %391 = vmax.xlane.f32.xlu1 %v390_v26  ;;  %v117_v27 = vpop.f32.mrf.mxu0  ;;  %v204_v30 = vpop.f32.mrf.mxu1 }
  0xcd   :  { %v387_v28 = vsel %vm38_vm0, %v117_v27, -inf  ;;  %v393_v31 = vsel %vm38_vm0, %v204_v30, -inf }
  0xce   :  { %388 = vmax.xlane.f32.xlu0 %v387_v28 }
  0xd0   :  { %397 = vmax.xlane.f32.xlu1 %v396_v29 }
  0xd2   :  { %v902_v32 = vpop.f32.mrf.mxu1  ;;  %394 = vmax.xlane.f32.xlu0 %v393_v31  ;;  %v895_v33 = vpop.f32.mrf.mxu0 }
  0xd3   :  { %v408_v38 = vsel %vm38_vm0, %v902_v32, -inf  ;;  %v402_v39 = vsel %vm38_vm0, %v895_v33, -inf }
  0xd4   :  { %v291_v34 = vpop.f32.mrf.mxu0  ;;  %v378_v35 = vpop.f32.mrf.mxu1 }
  0xd5   :  { %v405_v36 = vsel %vm38_vm0, %v378_v35, -inf  ;;  %v399_v37 = vsel %vm38_vm0, %v291_v34, -inf }
  0xd6   :  { %406 = vmax.xlane.f32.xlu1 %v405_v36  ;;  %400 = vmax.xlane.f32.xlu0 %v399_v37  ;;  %v479_v36 = vld [vmem:[%s1157_s2 + $0x20] sm:$0xff] }
  0xda   :  { %409 = vmax.xlane.f32.xlu1 %v408_v38  ;;  %403 = vmax.xlane.f32.xlu0 %v402_v39 }
 0x155   :  { %v392_v40 = vpop.xlane.xlu1 %391 }
 0x156   :  { %v412_v41 = vsub.f32 %v881_v24, %v392_v40  ;;  %v481_v40 = vld [vmem:[%s1157_s2 + $0x30] sm:$0xff] }
 0x157   :  { %v389_v42 = vpop.xlane.xlu0 %388 }
 0x158   :  { %v421_v43 = vmul.f32 1.442695, %v412_v41  ;;  %v411_v44 = vsub.f32 %v117_v27, %v389_v42 }
 0x159   :  { %v398_v45 = vpop.xlane.xlu1 %397 }
 0x15a   :  { %931 = vpow2.f32 %v421_v43  ;;  %v419_v46 = vmul.f32 1.442695, %v411_v44  ;;  %v414_v47 = vsub.f32 %v888_v25, %v398_v45 }
 0x15b   :  { %v395_v48 = vpop.xlane.xlu0 %394 }
 0x15c   :  { %933 = vpow2.f32 %v419_v46  ;;  %v425_v49 = vmul.f32 1.442695, %v414_v47  ;;  %v413_v50 = vsub.f32 %v204_v30, %v395_v48 }
 0x15e   :  { %935 = vpow2.f32 %v425_v49  ;;  %v423_v51 = vmul.f32 1.442695, %v413_v50 }
 0x15f   :  { %v407_v52 = vpop.xlane.xlu1 %406  ;;  %v401_v53 = vpop.xlane.xlu0 %400 }
 0x160   :  { %937 = vpow2.f32 %v423_v51  ;;  %v417_v54 = vsub.f32 %v378_v35, %v407_v52  ;;  %v415_v55 = vsub.f32 %v291_v34, %v401_v53 }
 0x162   :  { %v431_v56 = vmul.f32 1.442695, %v417_v54  ;;  %v427_v57 = vmul.f32 1.442695, %v415_v55 }
 0x163   :  { %v410_v58 = vpop.xlane.xlu1 %409  ;;  %v404_v59 = vpop.xlane.xlu0 %403 }
 0x164   :  { %939 = vpow2.f32 %v431_v56  ;;  %v418_v60 = vsub.f32 %v902_v32, %v410_v58  ;;  %v416_v61 = vsub.f32 %v895_v33, %v404_v59 }
 0x165   :  { %941 = vpow2.f32 %v427_v57 }
 0x166   :  { %v433_v62 = vmul.f32 1.442695, %v418_v60  ;;  %v429_v63 = vmul.f32 1.442695, %v416_v61 }
 0x167   :  { %v1063_v0 = vpop.eup %931 }
 0x168   :  { %943 = vpow2.f32 %v433_v62  ;;  %v438_v1 = vsel %vm38_vm0, %v1063_v0, 0.0 }
 0x169   :  { %v934_v2 = vpop.eup %933  ;;  %945 = vpow2.f32 %v429_v63  ;;  %439 = vadd.xlane.f32.xlu0 %v438_v1 }
 0x16a   :  { %v435_v5 = vsel %vm38_vm0, %v934_v2, 0.0 }
 0x16b   :  { %v1067_v3 = vpop.eup %935 }
 0x16c   :  { %v444_v4 = vsel %vm38_vm0, %v1067_v3, 0.0 }
 0x16d   :  { %v938_v6 = vpop.eup %937  ;;  %445 = vadd.xlane.f32.xlu1 %v444_v4  ;;  %436 = vadd.xlane.f32.xlu0 %v435_v5 }
 0x16e   :  { %v441_v7 = vsel %vm38_vm0, %v938_v6, 0.0 }
 0x171   :  { %v1073_v8 = vpop.eup %939  ;;  %442 = vadd.xlane.f32.xlu1 %v441_v7 }
 0x172   :  { %v942_v9 = vpop.eup %941  ;;  %v453_v11 = vsel %vm38_vm0, %v1073_v8, 0.0 }
 0x173   :  { %v447_v10 = vsel %vm38_vm0, %v942_v9, 0.0 }
 0x174   :  { %448 = vadd.xlane.f32.xlu0 %v447_v10 }
 0x175   :  { %v1078_v12 = vpop.eup %943  ;;  %454 = vadd.xlane.f32.xlu1 %v453_v11 }
 0x176   :  { %v1080_v13 = vpop.eup %945  ;;  %v456_v15 = vsel %vm38_vm0, %v1078_v12, 0.0 }
 0x177   :  { %v450_v14 = vsel %vm38_vm0, %v1080_v13, 0.0 }
 0x178   :  { %451 = vadd.xlane.f32.xlu0 %v450_v14 }
 0x179   :  { %457 = vadd.xlane.f32.xlu1 %v456_v15 }
 0x1f2   :  { %v440_v22 = vpop.xlane.xlu0 %439 }
 0x1f3   :  { %947 = vrcp.f32 %v440_v22 }
 0x1f6   :  { %v446_v23 = vpop.xlane.xlu1 %445  ;;  %v437_v24 = vpop.xlane.xlu0 %436 }
 0x1f7   :  { %949 = vrcp.f32 %v437_v24 }
 0x1f8   :  { %951 = vrcp.f32 %v446_v23 }
 0x1fa   :  { %v443_v25 = vpop.xlane.xlu1 %442 }
 0x1fb   :  { %953 = vrcp.f32 %v443_v25 }
 0x1fd   :  { %v449_v26 = vpop.xlane.xlu0 %448 }
 0x1fe   :  { %955 = vrcp.f32 %v449_v26  ;;  %v455_v27 = vpop.xlane.xlu1 %454 }
 0x1ff   :  { %957 = vrcp.f32 %v455_v27 }
 0x200   :  { %v948_v30 = vpop.eup %947 }
 0x201   :  { %v452_v28 = vpop.xlane.xlu0 %451  ;;  %v468_v34 = vmul.f32 %v948_v30, %v1063_v0 }
 0x202   :  { %959 = vrcp.f32 %v452_v28  ;;  %v458_v29 = vpop.xlane.xlu1 %457 }
 0x203   :  { %961 = vrcp.f32 %v458_v29 }
 0x204   :  { %v950_v31 = vpop.eup %949 }
 0x205   :  { %v467_v32 = vmul.f32 %v950_v31, %v934_v2  ;;  %v952_v33 = vpop.eup %951 }
 0x206   :  { %v470_v38 = vmul.f32 %v952_v33, %v1067_v3 }
 0x207   :  { %907 = vmatprep.mubr.msk.f32.mxu0 %vm38_vm0, %v467_v32 }
 0x208   :  { %v954_v35 = vpop.eup %953  ;;  %908 = vmatmul.mubr.msk.f32.vlgmr.msra.gmra.mxu0 %vm38_vm0, %v468_v34 }
 0x209   :  { %v469_v37 = vmul.f32 %v954_v35, %v938_v6  ;;  %918 = vmatpush3.msra.mxu0 %v480_v20 }
 0x20a   :  { %919 = vmatprep.subr.mxu0 %v479_v36 }
 0x20b   :  { %v956_v39 = vpop.eup %955  ;;  %914 = vmatprep.mubr.msk.f32.mxu1 %vm38_vm0, %v469_v37  ;;  %920 = vmatpush3.msra.mxu0 %v479_v36 }
 0x20c   :  { %v958_v41 = vpop.eup %957  ;;  %915 = vmatmul.mubr.msk.f32.vlgmr.msra.gmra.mxu1 %vm38_vm0, %v470_v38  ;;  %v471_v42 = vmul.f32 %v956_v39, %v942_v9 }
 0x20d   :  { %925 = vmatpush3.msra.mxu1 %v482_v21  ;;  %v473_v43 = vmul.f32 %v958_v41, %v1073_v8 }
 0x20e   :  { %921 = vmatprep.mubr.msk.f32.mxu0 %vm38_vm0, %v471_v42  ;;  %926 = vmatprep.subr.mxu1 %v481_v40 }
 0x20f   :  { %v960_v44 = vpop.eup %959  ;;  %928 = vmatprep.mubr.msk.f32.mxu1 %vm38_vm0, %v473_v43  ;;  %927 = vmatpush3.msra.mxu1 %v481_v40 }
 0x210   :  { %v962_v45 = vpop.eup %961  ;;  %v472_v46 = vmul.f32 %v960_v44, %v1080_v13 }
 0x211   :  { %v474_v47 = vmul.f32 %v962_v45, %v1078_v12 }
 0x212   :  { %922 = vmatmul.mubr.msk.f32.vlgmr.msra.gmra.mxu0 %vm38_vm0, %v472_v46 }
 0x213   :  { %929 = vmatmul.mubr.msk.f32.vlgmr.msra.gmra.mxu1 %vm38_vm0, %v474_v47 }
 0x2c8   :  { %v909_v48 = vpop.f32.mrf.mxu0 }
 0x2c9   :  { %808 = vst.msk [vmem:[%s1158_s3 + $0x8] sm:$0xff] %vm38_vm0, %v909_v48 }
 0x2ca   :  { %v555_v49 = vpop.f32.mrf.mxu0 }
 0x2cb   :  { %807 = vst.msk [vmem:[%s1158_s3] sm:$0xff] %vm38_vm0, %v555_v49 }
 0x2cc   :  { %v916_v50 = vpop.f32.mrf.mxu1 }
 0x2cd   :  { %810 = vst.msk [vmem:[%s1158_s3 + $0x18] sm:$0xff] %vm38_vm0, %v916_v50 }
 0x2ce   :  { %v636_v51 = vpop.f32.mrf.mxu1 }
 0x2cf   :  { %809 = vst.msk [vmem:[%s1158_s3 + $0x10] sm:$0xff] %vm38_vm0, %v636_v51 }
 0x2d2   :  { %v923_v52 = vpop.f32.mrf.mxu0 }
 0x2d3   :  { %812 = vst.msk [vmem:[%s1158_s3 + $0x28] sm:$0xff] %vm38_vm0, %v923_v52  ;;  %v930_v53 = vpop.f32.mrf.mxu1 }
 0x2d4   :  { %v717_v54 = vpop.f32.mrf.mxu0  ;;  %814 = vst.msk [vmem:[%s1158_s3 + $0x38] sm:$0xff] %vm38_vm0, %v930_v53 }
 0x2d5   :  { %811 = vst.msk [vmem:[%s1158_s3 + $0x20] sm:$0xff] %vm38_vm0, %v717_v54  ;;  %v798_v55 = vpop.f32.mrf.mxu1 }
 0x2d6   :  { %813 = vst.msk [vmem:[%s1158_s3 + $0x30] sm:$0xff] %vm38_vm0, %v798_v55 }

// kernel: reconstruction_forward.45
= control target key start
LH: loop header
LB: loop body
LE: loop exit
PB: predicated region body
PF: predicated region fallthrough
CT: control target
= control target key end

     0   :  { %vm39_vm0 = vcmask 523264   ;;  %vm137_vm1 = vcmask 261120   ;;  %s385_s1 = inlined_call_operand.vmem [shape: f32[64,32], index: 1, kind: input, shape index: {}]   ;;  %s386_s0 = inlined_call_operand.vmem [shape: f32[32,64], index: 0, kind: input, shape index: {}]   ;;  %s387_s2 = inlined_call_operand.vmem [shape: f32[1,32], index: 2, kind: input, shape index: {}]   ;;  %s388_s3 = inlined_call_operand.vmem [shape: f32[1,32], index: 3, kind: input, shape index: {}]   ;;  %s389_s4 = inlined_call_operand.vmem [shape: f32[1,32], index: 4, kind: input, shape index: {}]   ;;  %s390_s5 = inlined_call_operand.vmem [shape: f32[32,32], index: 5, kind: output, shape index: {}]  }
   0x1   :  { %v31_v0 = vld [vmem:[%s385_s1 + $0x38] sm:$0xff]  ;;  %v30_v1 = vld [vmem:[%s385_s1 + $0x30] sm:$0xff]  ;;  %v29_v2 = vld [vmem:[%s385_s1 + $0x28] sm:$0xff] }
   0x2   :  { %240 = vmatprep.subr.mxu0 %v31_v0  ;;  %262 = vmatprep.subr.mxu1 %v31_v0  ;;  %v28_v3 = vld [vmem:[%s385_s1 + $0x20] sm:$0xff]  ;;  %v27_v4 = vld [vmem:[%s385_s1 + $0x18] sm:$0xff]  ;;  %v26_v5 = vld [vmem:[%s385_s1 + $0x10] sm:$0xff] }
   0x3   :  { %241 = vmatpush3.msra.mxu0 %v31_v0  ;;  %270 = vmatpush3.msra.mxu1 %v31_v0  ;;  %v25_v6 = vld [vmem:[%s385_s1 + $0x8] sm:$0xff]  ;;  %v24_v7 = vld [vmem:[%s385_s1] sm:$0xff]  ;;  %v22_v9 = vld [vmem:[%s386_s0 + $0x10] sm:$0xff] }
   0x4   :  { %242 = vmatprep.subr.mxu0 %v30_v1  ;;  %263 = vmatprep.subr.mxu1 %v30_v1  ;;  %v20_v8 = vld [vmem:[%s386_s0] sm:$0xff]  ;;  %v21_v10 = vld [vmem:[%s386_s0 + $0x8] sm:$0xff]  ;;  %v23_v11 = vld [vmem:[%s386_s0 + $0x18] sm:$0xff] }
   0x5   :  { %243 = vmatpush3.msra.mxu0 %v30_v1  ;;  %271 = vmatpush3.msra.mxu1 %v30_v1  ;;  %v221_v14 = vld [vmem:[%s387_s2] ss:$0 sm:$0xff] }
   0x6   :  { %244 = vmatprep.subr.mxu0 %v29_v2  ;;  %264 = vmatprep.subr.mxu1 %v29_v2  ;;  %v226_v58 = vld [vmem:[%s388_s3] ss:$0 sm:$0xff] }
   0x7   :  { %245 = vmatpush3.msra.mxu0 %v29_v2  ;;  %272 = vmatpush3.msra.mxu1 %v29_v2  ;;  %v227_v60 = vld [vmem:[%s389_s4] ss:$0 sm:$0xff] }
   0x8   :  { %246 = vmatprep.subr.mxu0 %v28_v3  ;;  %265 = vmatprep.subr.mxu1 %v28_v3 }
   0x9   :  { %247 = vmatpush3.msra.mxu0 %v28_v3  ;;  %273 = vmatpush3.msra.mxu1 %v28_v3 }
   0xa   :  { %248 = vmatprep.subr.mxu0 %v27_v4  ;;  %266 = vmatprep.subr.mxu1 %v27_v4 }
   0xb   :  { %249 = vmatpush3.msra.mxu0 %v27_v4  ;;  %274 = vmatpush3.msra.mxu1 %v27_v4 }
   0xc   :  { %250 = vmatprep.subr.mxu0 %v26_v5  ;;  %267 = vmatprep.subr.mxu1 %v26_v5 }
   0xd   :  { %251 = vmatpush3.msra.mxu0 %v26_v5  ;;  %275 = vmatpush3.msra.mxu1 %v26_v5 }
   0xe   :  { %252 = vmatprep.subr.mxu0 %v25_v6  ;;  %268 = vmatprep.subr.mxu1 %v25_v6 }
   0xf   :  { %253 = vmatpush3.msra.mxu0 %v25_v6  ;;  %276 = vmatpush3.msra.mxu1 %v25_v6 }
  0x10   :  { %254 = vmatprep.subr.mxu0 %v24_v7  ;;  %269 = vmatprep.subr.mxu1 %v24_v7 }
  0x11   :  { %255 = vmatpush3.msra.mxu0 %v24_v7  ;;  %277 = vmatpush3.msra.mxu1 %v24_v7 }
  0x12   :  { %256 = vmatprep.mubr.msk.f32.mxu0 %vm39_vm0, %v20_v8  ;;  %259 = vmatprep.mubr.msk.f32.mxu1 %vm39_vm0, %v22_v9 }
  0x13   :  { %257 = vmatmul.mubr.msk.f32.vlgmr.msra.gmra.mxu0 %vm39_vm0, %v21_v10  ;;  %260 = vmatmul.mubr.msk.f32.vlgmr.msra.gmra.mxu1 %vm39_vm0, %v23_v11 }
  0xd3   :  { %v258_v12 = vpop.f32.mrf.mxu0  ;;  %v261_v13 = vpop.f32.mrf.mxu1 }
  0xd4   :  { %v124_v19 = vadd.f32 %v258_v12, %v221_v14  ;;  %v134_v20 = vadd.f32 %v261_v13, %v221_v14 }
  0xd5   :  { %v118_v15 = vpop.f32.mrf.mxu0  ;;  %v128_v16 = vpop.f32.mrf.mxu1 }
  0xd6   :  { %v119_v17 = vadd.f32 %v221_v14, %v118_v15  ;;  %v129_v18 = vadd.f32 %v221_v14, %v128_v16  ;;  %v147_v23 = vsel %vm137_vm1, %v134_v20, 0.0  ;;  %v141_v24 = vsel %vm137_vm1, %v124_v19, 0.0 }
  0xd8   :  { %v144_v21 = vsel %vm137_vm1, %v129_v18, 0.0  ;;  %v138_v22 = vsel %vm137_vm1, %v119_v17, 0.0 }
  0xd9   :  { %145 = vadd.xlane.f32.xlu1 %v144_v21  ;;  %139 = vadd.xlane.f32.xlu0 %v138_v22 }
  0xdd   :  { %148 = vadd.xlane.f32.xlu1 %v147_v23  ;;  %142 = vadd.xlane.f32.xlu0 %v141_v24 }
 0x162   :  { %v146_v25 = vpop.xlane.xlu1 %145  ;;  %v140_v26 = vpop.xlane.xlu0 %139 }
 0x163   :  { %v153_v27 = vmul.f32 0.03125, %v146_v25  ;;  %v151_v28 = vmul.f32 0.03125, %v140_v26 }
 0x165   :  { %v157_v29 = vsub.f32 %v129_v18, %v153_v27  ;;  %v155_v30 = vsub.f32 %v119_v17, %v151_v28 }
 0x166   :  { %v149_v31 = vpop.xlane.xlu1 %148  ;;  %v143_v32 = vpop.xlane.xlu0 %142 }
 0x167   :  { %v154_v33 = vmul.f32 0.03125, %v149_v31  ;;  %v152_v34 = vmul.f32 0.03125, %v143_v32  ;;  %v159_v35 = vmul.f32 %v155_v30, %v155_v30  ;;  %v161_v39 = vmul.f32 %v157_v29, %v157_v29 }
 0x169   :  { %v158_v36 = vsub.f32 %v134_v20, %v154_v33  ;;  %v156_v37 = vsub.f32 %v124_v19, %v152_v34  ;;  %v163_v38 = vsel %vm137_vm1, %v159_v35, 0.0  ;;  %v169_v41 = vsel %vm137_vm1, %v161_v39, 0.0 }
 0x16a   :  { %164 = vadd.xlane.f32.xlu0 %v163_v38 }
 0x16b   :  { %v160_v40 = vmul.f32 %v156_v37, %v156_v37  ;;  %v162_v43 = vmul.f32 %v158_v36, %v158_v36 }
 0x16d   :  { %v166_v42 = vsel %vm137_vm1, %v160_v40, 0.0  ;;  %v172_v44 = vsel %vm137_vm1, %v162_v43, 0.0 }
 0x16e   :  { %170 = vadd.xlane.f32.xlu0 %v169_v41  ;;  %167 = vadd.xlane.f32.xlu1 %v166_v42 }
 0x172   :  { %173 = vadd.xlane.f32.xlu1 %v172_v44 }
 0x1f3   :  { %v165_v45 = vpop.xlane.xlu0 %164 }
 0x1f4   :  { %v175_v46 = vmul.f32 0.03125, %v165_v45 }
 0x1f6   :  { %v179_v47 = vadd.f32 1e-05, %v175_v46 }
 0x1f7   :  { %v168_v48 = vpop.xlane.xlu1 %167  ;;  %v171_v49 = vpop.xlane.xlu0 %170 }
 0x1f8   :  { %278 = vrsqrt.f32 %v179_v47  ;;  %v176_v50 = vmul.f32 0.03125, %v168_v48  ;;  %v177_v51 = vmul.f32 0.03125, %v171_v49 }
 0x1fa   :  { %v180_v52 = vadd.f32 1e-05, %v176_v50  ;;  %v181_v53 = vadd.f32 1e-05, %v177_v51 }
 0x1fb   :  { %v174_v54 = vpop.xlane.xlu1 %173 }
 0x1fc   :  { %280 = vrsqrt.f32 %v180_v52  ;;  %v178_v55 = vmul.f32 0.03125, %v174_v54 }
 0x1fd   :  { %282 = vrsqrt.f32 %v181_v53 }
 0x1fe   :  { %v182_v56 = vadd.f32 1e-05, %v178_v55 }
 0x200   :  { %284 = vrsqrt.f32 %v182_v56 }
 0x205   :  { %v279_v57 = vpop.eup %278 }
 0x206   :  { %v187_v59 = vmul.f32 %v279_v57, %v155_v30 }
 0x208   :  { %v198_v61 = vmul.f32 %v226_v58, %v187_v59 }
 0x209   :  { %v281_v62 = vpop.eup %280 }
 0x20a   :  { %v283_v63 = vpop.eup %282  ;;  %v209_v0 = vadd.f32 %v227_v60, %v198_v61  ;;  %v188_v1 = vmul.f32 %v281_v62, %v156_v37 }
 0x20b   :  { %v189_v2 = vmul.f32 %v283_v63, %v157_v29 }
 0x20c   :  { %213 = vst.msk [vmem:[%s390_s5] sm:$0xff] %vm137_vm1, %v209_v0  ;;  %v199_v3 = vmul.f32 %v226_v58, %v188_v1 }
 0x20d   :  { %v285_v4 = vpop.eup %284  ;;  %v200_v5 = vmul.f32 %v226_v58, %v189_v2 }
 0x20e   :  { %v210_v6 = vadd.f32 %v227_v60, %v199_v3  ;;  %v190_v7 = vmul.f32 %v285_v4, %v158_v36 }
 0x20f   :  { %v211_v8 = vadd.f32 %v227_v60, %v200_v5 }
 0x210   :  { %214 = vst.msk [vmem:[%s390_s5 + $0x8] sm:$0xff] %vm137_vm1, %v210_v6  ;;  %v201_v9 = vmul.f32 %v226_v58, %v190_v7 }
 0x211   :  { %215 = vst.msk [vmem:[%s390_s5 + $0x10] sm:$0xff] %vm137_vm1, %v211_v8 }
 0x212   :  { %v212_v10 = vadd.f32 %v227_v60, %v201_v9 }
 0x214   :  { %216 = vst.msk [vmem:[%s390_s5 + $0x18] sm:$0xff] %vm137_vm1, %v212_v10 }

// kernel: reconstruction_forward.59
= control target key start
LH: loop header
LB: loop body
LE: loop exit
PB: predicated region body
PF: predicated region fallthrough
CT: control target
= control target key end

     0   :  { %vm29_vm0 = vcmask 261120   ;;  %vm127_vm1 = vcmask 31744   ;;  %s230_s1 = inlined_call_operand.vmem [shape: f32[32,4], index: 1, kind: input, shape index: {}]   ;;  %s231_s0 = inlined_call_operand.vmem [shape: f32[32,32], index: 0, kind: input, shape index: {}]   ;;  %s232_s2 = inlined_call_operand.vmem [shape: f32[1,4], index: 2, kind: input, shape index: {}]   ;;  %s233_s3 = inlined_call_operand.vmem [shape: f32[32,4], index: 3, kind: output, shape index: {}]  }
   0x1   :  { %v21_v0 = vld [vmem:[%s230_s1 + $0x18] sm:$0xff]  ;;  %v20_v1 = vld [vmem:[%s230_s1 + $0x10] sm:$0xff]  ;;  %v19_v2 = vld [vmem:[%s230_s1 + $0x8] sm:$0xff] }
   0x2   :  { %149 = vmatprep.subr.mxu0 %v21_v0  ;;  %163 = vmatprep.subr.mxu1 %v21_v0  ;;  %v18_v3 = vld [vmem:[%s230_s1] sm:$0xff]  ;;  %v16_v5 = vld [vmem:[%s231_s0 + $0x10] sm:$0xff]  ;;  %v15_v6 = vld [vmem:[%s231_s0 + $0x8] sm:$0xff] }
   0x3   :  { %150 = vmatpush3.msra.mxu0 %v21_v0  ;;  %167 = vmatpush3.msra.mxu1 %v21_v0  ;;  %v14_v4 = vld [vmem:[%s231_s0] sm:$0xff]  ;;  %v17_v7 = vld [vmem:[%s231_s0 + $0x18] sm:$0xff] }
   0x4   :  { %151 = vmatprep.subr.mxu0 %v20_v1  ;;  %164 = vmatprep.subr.mxu1 %v20_v1  ;;  %v136_v8 = vld [vmem:[%s232_s2] ss:$0 sm:$0xff] }
   0x5   :  { %152 = vmatpush3.msra.mxu0 %v20_v1  ;;  %168 = vmatpush3.msra.mxu1 %v20_v1 }
   0x6   :  { %153 = vmatprep.subr.mxu0 %v19_v2  ;;  %165 = vmatprep.subr.mxu1 %v19_v2 }
   0x7   :  { %154 = vmatpush3.msra.mxu0 %v19_v2  ;;  %169 = vmatpush3.msra.mxu1 %v19_v2 }
   0x8   :  { %155 = vmatprep.subr.mxu0 %v18_v3  ;;  %166 = vmatprep.subr.mxu1 %v18_v3 }
   0x9   :  { %156 = vmatpush3.msra.mxu0 %v18_v3  ;;  %170 = vmatpush3.msra.mxu1 %v18_v3 }
   0xa   :  { %157 = vmatprep.mubr.msk.f32.mxu0 %vm29_vm0, %v14_v4  ;;  %160 = vmatprep.mubr.msk.f32.mxu1 %vm29_vm0, %v16_v5 }
   0xb   :  { %158 = vmatmul.mubr.msk.f32.vlgmr.msra.gmra.mxu0 %vm29_vm0, %v15_v6  ;;  %161 = vmatmul.mubr.msk.f32.vlgmr.msra.gmra.mxu1 %vm29_vm0, %v17_v7 }
  0xcb   :  { %v159_v9 = vpop.f32.mrf.mxu0  ;;  %v162_v10 = vpop.f32.mrf.mxu1 }
  0xcc   :  { %v114_v11 = vadd.f32 %v159_v9, %v136_v8  ;;  %v124_v12 = vadd.f32 %v162_v10, %v136_v8 }
  0xcd   :  { %v108_v13 = vpop.f32.mrf.mxu0  ;;  %v118_v14 = vpop.f32.mrf.mxu1 }
  0xce   :  { %129 = vst.msk [vmem:[%s233_s3 + $0x8] sm:$0xff] %vm127_vm1, %v114_v11  ;;  %131 = vst.msk [vmem:[%s233_s3 + $0x18] sm:$0xff] %vm127_vm1, %v124_v12  ;;  %v109_v15 = vadd.f32 %v136_v8, %v108_v13  ;;  %v119_v16 = vadd.f32 %v136_v8, %v118_v14 }
  0xd0   :  { %128 = vst.msk [vmem:[%s233_s3] sm:$0xff] %vm127_vm1, %v109_v15  ;;  %130 = vst.msk [vmem:[%s233_s3 + $0x10] sm:$0xff] %vm127_vm1, %v119_v16 }

</bundles_post_ra>
